<compile_context>
chip_gen: v7x
topology: tpu7x:2x2x1
jax: 0.10.0
libtpu: 0.0.40
codegen_flags: <defaults>
</compile_context>

<pallas_src>
from functools import partial

import jax
import jax.numpy as jnp
from jax.experimental import pallas as pl
from jax.experimental.pallas import tpu as pltpu


CIN0_PAD = 8          # pad first-layer input channels 3 -> 8 (alignment)
TM_TARGET = 2048      # target M-tile (rows); shrunk adaptively for small maps


def _round_up(x, m):
    return (x + m - 1) // m * m


def _cdiv(a, b):
    return (a + b - 1) // b


# -----------------------------------------------------------------------------
# Pallas kernel: in-kernel im2col (9 row-shifted bf16 windows concatenated along
# channels) -> ONE MXU matmul, fused with folded-BN affine, optional exact GELU,
# optional LayerNorm, and zeroing of invalid (border / wrap-around) rows.
# -----------------------------------------------------------------------------
def _conv_kernel(*refs, taps, tm, n_src, apply_gelu, fuse_ln):
    # refs: [cur_0, halo_0, ..., cur_{S-1}, halo_{S-1},
    #        w, scale, shift, mask, (ln_g, ln_b)?, out]
    idx = 0
    slabs = []
    for _ in range(n_src):
        cur = refs[idx][...]            # (tm,   cin) bf16
        hal = refs[idx + 1][...]        # (halo, cin) bf16
        idx += 2
        slabs.append(jnp.concatenate([cur, hal], axis=0))   # (tm+halo, cin)
    w_ref, scale_ref, shift_ref, mask_ref = refs[idx:idx + 4]
    idx += 4
    if fuse_ln:
        g_ref, b_ref = refs[idx:idx + 2]
        idx += 2
    o_ref = refs[idx]

    # im2col: each tap is a constant row shift of a flattened (padded) frame.
    pieces = [slabs[s][off:off + tm, :] for (s, off) in taps]   # 9 x (tm, cin)
    xcol = jnp.concatenate(pieces, axis=-1)                     # (tm, 9*cin)

    y = jnp.dot(xcol, w_ref[...], preferred_element_type=jnp.float32)
    y = y * scale_ref[...] + shift_ref[...]          # folded BN (+ conv bias)
    if apply_gelu:
        # exact GELU: x * 0.5 * (1 + erf(x / sqrt(2)))  (erf -> EUP slot)
        y = 0.5 * y * (1.0 + jax.lax.erf(y * jnp.float32(0.7071067811865476)))
    if fuse_ln:
        mu = jnp.mean(y, axis=-1, keepdims=True)
        yc = y - mu
        var = jnp.mean(yc * yc, axis=-1, keepdims=True)
        y = yc * jax.lax.rsqrt(var + 1e-6) * g_ref[...] + b_ref[...]
    # Zero invalid rows so the output frame is a clean zero-padded frame that
    # the next layer can consume with a single shift/pad (no crop needed).
    y = y * mask_ref[...]
    o_ref[...] = y.astype(o_ref.dtype)


def _conv_pallas(srcs, taps, tm, halo, m_out, mask, w_mat, scale, shift,
                 apply_gelu, ln=None, out_dtype=jnp.bfloat16):
    """Tiled, pipelined conv over flattened sources.  srcs[i]: (m_out+tm, cin);
    mask: (m_out, 1) f32; output: (m_out, cout)."""
    n_src = len(srcs)
    cin = srcs[0].shape[-1]
    cout = w_mat.shape[-1]
    assert tm % halo == 0 and tm % 16 == 0 and m_out % tm == 0
    n_tiles = m_out // tm
    nb_halo = tm // halo   # halo block index stride

    inputs, in_specs = [], []
    for s in srcs:
        inputs += [s, s]
        in_specs += [
            pl.BlockSpec((tm, cin), lambda i: (i, 0)),
            # small halo block right after the current tile (covers max tap off)
            pl.BlockSpec((halo, cin), lambda i: ((i + 1) * nb_halo, 0)),
        ]
    inputs += [w_mat, scale, shift, mask]
    in_specs += [
        pl.BlockSpec(w_mat.shape, lambda i: (0, 0)),
        pl.BlockSpec((1, cout), lambda i: (0, 0)),
        pl.BlockSpec((1, cout), lambda i: (0, 0)),
        pl.BlockSpec((tm, 1), lambda i: (i, 0)),
    ]
    fuse_ln = ln is not None
    if fuse_ln:
        inputs += [ln[0], ln[1]]
        in_specs += [pl.BlockSpec((1, cout), lambda i: (0, 0)),
                     pl.BlockSpec((1, cout), lambda i: (0, 0))]

    kernel = partial(_conv_kernel, taps=tuple(taps), tm=tm, n_src=n_src,
                     apply_gelu=apply_gelu, fuse_ln=fuse_ln)
    return pl.pallas_call(
        kernel,
        out_shape=jax.ShapeDtypeStruct((m_out, cout), out_dtype),
        grid=(n_tiles,),
        in_specs=in_specs,
        out_specs=pl.BlockSpec((tm, cout), lambda i: (i, 0)),
        compiler_params=pltpu.CompilerParams(
            dimension_semantics=("parallel",)),
    )(*inputs)


# -----------------------------------------------------------------------------
# Tile selection + JAX-side layout glue (single lax.pad per transition; the
# producing kernel already zeroed all rows outside the valid HxW region).
# -----------------------------------------------------------------------------
def _choose_tile(m_valid, max_off, tm_target):
    halo = _round_up(max(max_off, 16), 16)          # multiple of 16 (bf16)
    tm = _round_up(max(tm_target, 2 * halo), halo)  # halo | tm
    if m_valid <= tm:
        # small problem: aim for >=2 grid steps (v7x megacore)
        tm = max(halo, _round_up(_cdiv(m_valid, 2), halo))
    m_out = _round_up(m_valid, tm)
    return tm, halo, m_out


def _make_row_mask(N, Hf, Wf, Hv, Wv, m_out):
    ii = jnp.arange(Hf, dtype=jnp.int32)[:, None]
    jj = jnp.arange(Wf, dtype=jnp.int32)[None, :]
    m = ((ii < Hv) & (jj < Wv)).astype(jnp.float32)           # (Hf, Wf)
    m = jnp.broadcast_to(m[None], (N, Hf, Wf)).reshape(N * Hf * Wf, 1)
    return jnp.pad(m, ((0, m_out - N * Hf * Wf), (0, 0)))


def _prep_stride1(frame, Hv, Wv, tm_target):
    """frame: (N, Hf, Wf, C) with valid data at [0:Hv, 0:Wv], zeros elsewhere."""
    N, Hf, Wf, C = frame.shape
    Hp, Wp = Hv + 2, Wv + 2
    zero = jnp.zeros((), frame.dtype)
    # one pad (possibly with negative high) moves data to [1:Hv+1, 1:Wv+1]
    xp = jax.lax.pad(frame, zero,
                     [(0, 0, 0), (1, Hp - 1 - Hf, 0), (1, Wp - 1 - Wf, 0),
                      (0, 0, 0)])
    m_valid = N * Hp * Wp
    max_off = 2 * Wp + 2
    tm, halo, m_out = _choose_tile(m_valid, max_off, tm_target)
    flat = xp.reshape(m_valid, C)
    flat = jnp.pad(flat, ((0, m_out + tm - m_valid), (0, 0)))
    taps = tuple((0, ky * Wp + kx) for ky in range(3) for kx in range(3))
    mask = _make_row_mask(N, Hp, Wp, Hv, Wv, m_out)
    geom = (Hp, Wp, Hv, Wv)        # output frame dims, valid dims
    return [flat], taps, tm, halo, m_out, mask, geom


def _prep_stride2(frame, Hv, Wv, tm_target):
    N, Hf, Wf, C = frame.shape
    Ho = (Hv - 1) // 2 + 1
    Wo = (Wv - 1) // 2 + 1
    Hph, Wph = Ho + 1, Wo + 1
    zero = jnp.zeros((), frame.dtype)
    xp = jax.lax.pad(frame, zero,
                     [(0, 0, 0),
                      (1, 2 * Hph - 1 - Hf, 0),
                      (1, 2 * Wph - 1 - Wf, 0),
                      (0, 0, 0)])                    # (N, 2*Hph, 2*Wph, C)
    m_valid = N * Hph * Wph
    max_off = Wph + 1
    tm, halo, m_out = _choose_tile(m_valid, max_off, tm_target)
    pad_rows = m_out + tm - m_valid
    srcs = []
    for a in range(2):
        for b in range(2):
            ph = xp[:, a::2, b::2, :].reshape(m_valid, C)    # phase (row%2,col%2)
            srcs.append(jnp.pad(ph, ((0, pad_rows), (0, 0))))
    taps = tuple(((ky % 2) * 2 + (kx % 2), (ky // 2) * Wph + (kx // 2))
                 for ky in range(3) for kx in range(3))
    mask = _make_row_mask(N, Hph, Wph, Ho, Wo, m_out)
    geom = (Hph, Wph, Ho, Wo)
    return srcs, taps, tm, halo, m_out, mask, geom


# -----------------------------------------------------------------------------
# Stem forward
# -----------------------------------------------------------------------------
def stem_forward(x_nchw, params, tm_target=TM_TARGET):
    """Returns (tokens (N, H*W, out_chans), (H, W)) — matches the PyTorch module."""
    x = jnp.transpose(x_nchw, (0, 2, 3, 1)).astype(jnp.float32)   # NHWC
    if x.shape[-1] < CIN0_PAD:
        x = jnp.pad(x, ((0, 0), (0, 0), (0, 0), (0, CIN0_PAD - x.shape[-1])))
    frame = x.astype(jnp.bfloat16)
    N, Hv, Wv = frame.shape[0], frame.shape[1], frame.shape[2]

    strides = (2, 1, 2, 1)
    n_layers = len(params["convs"])
    for li, (w_mat, scale, shift) in enumerate(params["convs"]):
        last = li == n_layers - 1
        prep = _prep_stride2 if strides[li] == 2 else _prep_stride1
        srcs, taps, tm, halo, m_out, mask, geom = prep(frame, Hv, Wv, tm_target)
        y_flat = _conv_pallas(
            srcs, taps, tm, halo, m_out, mask, w_mat, scale, shift,
            apply_gelu=not last,
            ln=(params["ln_g"], params["ln_b"]) if last else None,
            out_dtype=jnp.float32 if last else jnp.bfloat16)
        Hf, Wf, Hv, Wv = geom
        m_valid = N * Hf * Wf
        frame = y_flat[:m_valid].reshape(N, Hf, Wf, -1)

    tokens = frame[:, :Hv, :Wv, :].reshape(N, Hv * Wv, frame.shape[-1])
    return tokens, (Hv, Wv)


# -----------------------------------------------------------------------------
# Pure-JAX reference (same bf16 activation/weight quantization) for checking.
# -----------------------------------------------------------------------------
def stem_reference(x_nchw, params):
    x = jnp.transpose(x_nchw, (0, 2, 3, 1)).astype(jnp.float32)
    if x.shape[-1] < CIN0_PAD:
        x = jnp.pad(x, ((0, 0), (0, 0), (0, 0), (0, CIN0_PAD - x.shape[-1])))
    x = x.astype(jnp.bfloat16)
    strides = (2, 1, 2, 1)
    n_layers = len(params["convs"])
    for li, (w_mat, scale, shift) in enumerate(params["convs"]):
        last = li == n_layers - 1
        cout = w_mat.shape[-1]
        cin = w_mat.shape[0] // 9
        w = w_mat.astype(jnp.float32).reshape(3, 3, cin, cout)
        y = jax.lax.conv_general_dilated(
            x.astype(jnp.float32), w, window_strides=(strides[li],) * 2,
            padding=((1, 1), (1, 1)),
            dimension_numbers=("NHWC", "HWIO", "NHWC"))
        y = y * scale + shift
        if not last:
            y = 0.5 * y * (1.0 + jax.lax.erf(y * 0.7071067811865476))
            x = y.astype(jnp.bfloat16)
        else:
            x = y
    mu = jnp.mean(x, axis=-1, keepdims=True)
    var = jnp.mean((x - mu) ** 2, axis=-1, keepdims=True)
    x = (x - mu) * jax.lax.rsqrt(var + 1e-6) * params["ln_g"][0] + params["ln_b"][0]
    N, H, W, C = x.shape
    return x.reshape(N, H * W, C), (H, W)


# -----------------------------------------------------------------------------
# Deterministic parameter construction (synthetic; eval-mode BatchNorm folded).
# -----------------------------------------------------------------------------
def make_params(key, in_chans, out_chans):
    c_mid = out_chans // 2
    layer_io = [(in_chans, c_mid), (c_mid, c_mid), (c_mid, out_chans),
                (out_chans, out_chans)]
    has_bn = [True, True, True, False]
    convs = []
    for idx, ((cin, cout), bn) in enumerate(zip(layer_io, has_bn)):
        key, k_w, k_b, k_g, k_be, k_m, k_v = jax.random.split(key, 7)
        # conv weight in (ky, kx, Cin, Cout) layout -> flat (9*Cin, Cout).
        w = jax.random.normal(k_w, (3, 3, cin, cout), jnp.float32) * 0.1
        b = jax.random.normal(k_b, (cout,), jnp.float32) * 0.1
        if idx == 0 and cin < CIN0_PAD:
            w = jnp.pad(w, ((0, 0), (0, 0), (0, CIN0_PAD - cin), (0, 0)))
            cin = CIN0_PAD
        w_mat = w.reshape(9 * cin, cout).astype(jnp.bfloat16)
        if bn:
            gamma = 1.0 + 0.1 * jax.random.normal(k_g, (cout,), jnp.float32)
            beta = 0.1 * jax.random.normal(k_be, (cout,), jnp.float32)
            mean = 0.1 * jax.random.normal(k_m, (cout,), jnp.float32)
            var = jnp.abs(jax.random.normal(k_v, (cout,), jnp.float32)) + 0.5
            scale = gamma / jnp.sqrt(var + 1e-5)          # BatchNorm2d eps
            shift = beta - mean * scale + b * scale       # conv bias folded through BN
        else:
            scale = jnp.ones((cout,), jnp.float32)
            shift = b
        convs.append((w_mat, scale.reshape(1, cout), shift.reshape(1, cout)))
    key, k_lg, k_lb = jax.random.split(key, 3)
    ln_g = (1.0 + 0.1 * jax.random.normal(k_lg, (out_chans,), jnp.float32)).reshape(1, out_chans)
    ln_b = (0.1 * jax.random.normal(k_lb, (out_chans,), jnp.float32)).reshape(1, out_chans)
    return {"convs": convs, "ln_g": ln_g, "ln_b": ln_b}


if __name__ == "__main__":
    key = jax.random.PRNGKey(0)
    k_x, k_p = jax.random.split(key)

    in_chans, out_chans = 3, 16
    x = jax.random.normal(k_x, (2, in_chans, 16, 16), jnp.float32)  # NCHW like PyTorch
    params = make_params(k_p, in_chans, out_chans)

    fwd = jax.jit(stem_forward)
    tokens, (H, W) = fwd(x, params)
    tokens = jax.block_until_ready(tokens)
    H, W = int(H), int(W)

    assert tokens.shape == (2, H * W, out_chans), tokens.shape
    assert (H, W) == (4, 4), (H, W)

    # Numerical check against a bf16-matched pure-JAX reference.
    ref_tokens, _ = stem_reference(x, params)
    err = float(jnp.max(jnp.abs(tokens - ref_tokens)))
    assert err < 3e-2, f"max abs err {err}"

    print("KERNEL_OK")
</pallas_src>

<mosaic_0001>
module attributes {stable_mosaic.version = 11 : i64} {
  func.func @_conv_kernel(%arg0: i32, %arg1: memref<96x8xbf16, #tpu.memory_space<vmem>>, %arg2: memref<16x8xbf16, #tpu.memory_space<vmem>>, %arg3: memref<96x8xbf16, #tpu.memory_space<vmem>>, %arg4: memref<16x8xbf16, #tpu.memory_space<vmem>>, %arg5: memref<96x8xbf16, #tpu.memory_space<vmem>>, %arg6: memref<16x8xbf16, #tpu.memory_space<vmem>>, %arg7: memref<96x8xbf16, #tpu.memory_space<vmem>>, %arg8: memref<16x8xbf16, #tpu.memory_space<vmem>>, %arg9: memref<72x8xbf16, #tpu.memory_space<vmem>>, %arg10: memref<1x8xf32, #tpu.memory_space<vmem>>, %arg11: memref<1x8xf32, #tpu.memory_space<vmem>>, %arg12: memref<96x1xf32, #tpu.memory_space<vmem>>, %arg13: memref<96x8xbf16, #tpu.memory_space<vmem>>) attributes {dimension_semantics = [#tpu.dimension_semantics<parallel>], iteration_bounds = array<i64: 2>, scalar_prefetch = 0 : i64, scratch_operands = 0 : i64, tpu.core_type = #tpu.core_type<tc>, window_params = [{transform_indices = @transform_0, window_bounds = array<i64: 96, 8>}, {transform_indices = @transform_1, window_bounds = array<i64: 16, 8>}, {transform_indices = @transform_2, window_bounds = array<i64: 96, 8>}, {transform_indices = @transform_3, window_bounds = array<i64: 16, 8>}, {transform_indices = @transform_4, window_bounds = array<i64: 96, 8>}, {transform_indices = @transform_5, window_bounds = array<i64: 16, 8>}, {transform_indices = @transform_6, window_bounds = array<i64: 96, 8>}, {transform_indices = @transform_7, window_bounds = array<i64: 16, 8>}, {pipeline_mode = #tpu.pipeline_mode<synchronous>, transform_indices = @transform_8, window_bounds = array<i64: 72, 8>}, {pipeline_mode = #tpu.pipeline_mode<synchronous>, transform_indices = @transform_9, window_bounds = array<i64: 1, 8>}, {pipeline_mode = #tpu.pipeline_mode<synchronous>, transform_indices = @transform_10, window_bounds = array<i64: 1, 8>}, {transform_indices = @transform_11, window_bounds = array<i64: 96, 1>}, {transform_indices = @transform_12, window_bounds = array<i64: 96, 8>}]} {
    %c0 = arith.constant 0 : index
    %c0_0 = arith.constant 0 : index
    %0 = vector.load %arg1[%c0, %c0_0] : memref<96x8xbf16, #tpu.memory_space<vmem>>, vector<96x8xbf16>
    %c0_1 = arith.constant 0 : index
    %c0_2 = arith.constant 0 : index
    %1 = vector.load %arg2[%c0_1, %c0_2] : memref<16x8xbf16, #tpu.memory_space<vmem>>, vector<16x8xbf16>
    %2 = tpu.concatenate %0, %1 in 0 : vector<96x8xbf16>, vector<16x8xbf16> -> vector<112x8xbf16>
    %c0_3 = arith.constant 0 : index
    %c0_4 = arith.constant 0 : index
    %3 = vector.load %arg3[%c0_3, %c0_4] : memref<96x8xbf16, #tpu.memory_space<vmem>>, vector<96x8xbf16>
    %c0_5 = arith.constant 0 : index
    %c0_6 = arith.constant 0 : index
    %4 = vector.load %arg4[%c0_5, %c0_6] : memref<16x8xbf16, #tpu.memory_space<vmem>>, vector<16x8xbf16>
    %5 = tpu.concatenate %3, %4 in 0 : vector<96x8xbf16>, vector<16x8xbf16> -> vector<112x8xbf16>
    %c0_7 = arith.constant 0 : index
    %c0_8 = arith.constant 0 : index
    %6 = vector.load %arg5[%c0_7, %c0_8] : memref<96x8xbf16, #tpu.memory_space<vmem>>, vector<96x8xbf16>
    %c0_9 = arith.constant 0 : index
    %c0_10 = arith.constant 0 : index
    %7 = vector.load %arg6[%c0_9, %c0_10] : memref<16x8xbf16, #tpu.memory_space<vmem>>, vector<16x8xbf16>
    %8 = tpu.concatenate %6, %7 in 0 : vector<96x8xbf16>, vector<16x8xbf16> -> vector<112x8xbf16>
    %c0_11 = arith.constant 0 : index
    %c0_12 = arith.constant 0 : index
    %9 = vector.load %arg7[%c0_11, %c0_12] : memref<96x8xbf16, #tpu.memory_space<vmem>>, vector<96x8xbf16>
    %c0_13 = arith.constant 0 : index
    %c0_14 = arith.constant 0 : index
    %10 = vector.load %arg8[%c0_13, %c0_14] : memref<16x8xbf16, #tpu.memory_space<vmem>>, vector<16x8xbf16>
    %11 = tpu.concatenate %9, %10 in 0 : vector<96x8xbf16>, vector<16x8xbf16> -> vector<112x8xbf16>
    %12 = vector.extract_strided_slice %2 {offsets = [0, 0], sizes = [96, 8], strides = [1, 1]} : vector<112x8xbf16> to vector<96x8xbf16>
    %13 = vector.extract_strided_slice %5 {offsets = [0, 0], sizes = [96, 8], strides = [1, 1]} : vector<112x8xbf16> to vector<96x8xbf16>
    %14 = vector.extract_strided_slice %2 {offsets = [1, 0], sizes = [96, 8], strides = [1, 1]} : vector<112x8xbf16> to vector<96x8xbf16>
    %15 = vector.extract_strided_slice %8 {offsets = [0, 0], sizes = [96, 8], strides = [1, 1]} : vector<112x8xbf16> to vector<96x8xbf16>
    %16 = vector.extract_strided_slice %11 {offsets = [0, 0], sizes = [96, 8], strides = [1, 1]} : vector<112x8xbf16> to vector<96x8xbf16>
    %17 = vector.extract_strided_slice %8 {offsets = [1, 0], sizes = [96, 8], strides = [1, 1]} : vector<112x8xbf16> to vector<96x8xbf16>
    %18 = vector.extract_strided_slice %2 {offsets = [9, 0], sizes = [96, 8], strides = [1, 1]} : vector<112x8xbf16> to vector<96x8xbf16>
    %19 = vector.extract_strided_slice %5 {offsets = [9, 0], sizes = [96, 8], strides = [1, 1]} : vector<112x8xbf16> to vector<96x8xbf16>
    %20 = vector.extract_strided_slice %2 {offsets = [10, 0], sizes = [96, 8], strides = [1, 1]} : vector<112x8xbf16> to vector<96x8xbf16>
    %21 = tpu.concatenate %12, %13, %14, %15, %16, %17, %18, %19, %20 in 1 : vector<96x8xbf16>, vector<96x8xbf16>, vector<96x8xbf16>, vector<96x8xbf16>, vector<96x8xbf16>, vector<96x8xbf16>, vector<96x8xbf16>, vector<96x8xbf16>, vector<96x8xbf16> -> vector<96x72xbf16>
    %c0_15 = arith.constant 0 : index
    %c0_16 = arith.constant 0 : index
    %22 = vector.load %arg9[%c0_15, %c0_16] : memref<72x8xbf16, #tpu.memory_space<vmem>>, vector<72x8xbf16>
    %cst = arith.constant dense<0.000000e+00> : vector<96x8xf32>
    %23 = tpu.matmul %21, %22, %cst {dimension_numbers = #tpu.dot_dimension_numbers<[1], [0], [0], [1], [0, 0, 1, 1], [], []>} : vector<96x72xbf16>, vector<72x8xbf16>, vector<96x8xf32> -> vector<96x8xf32>
    %c0_17 = arith.constant 0 : index
    %c0_18 = arith.constant 0 : index
    %24 = vector.load %arg10[%c0_17, %c0_18] : memref<1x8xf32, #tpu.memory_space<vmem>>, vector<1x8xf32>
    %25 = vector.broadcast %24 : vector<1x8xf32> to vector<96x8xf32>
    %26 = arith.mulf %23, %25 : vector<96x8xf32>
    %c0_19 = arith.constant 0 : index
    %c0_20 = arith.constant 0 : index
    %27 = vector.load %arg11[%c0_19, %c0_20] : memref<1x8xf32, #tpu.memory_space<vmem>>, vector<1x8xf32>
    %28 = vector.broadcast %27 : vector<1x8xf32> to vector<96x8xf32>
    %29 = arith.addf %26, %28 : vector<96x8xf32>
    %cst_21 = arith.constant 5.000000e-01 : f32
    %30 = vector.broadcast %cst_21 : f32 to vector<96x8xf32>
    %31 = arith.mulf %30, %29 : vector<96x8xf32>
    %cst_22 = arith.constant 0.707106769 : f32
    %32 = vector.broadcast %cst_22 : f32 to vector<96x8xf32>
    %33 = arith.mulf %29, %32 : vector<96x8xf32>
    %34 = math.erf %33 : vector<96x8xf32>
    %cst_23 = arith.constant 1.000000e+00 : f32
    %35 = vector.broadcast %cst_23 : f32 to vector<96x8xf32>
    %36 = arith.addf %35, %34 : vector<96x8xf32>
    %37 = arith.mulf %31, %36 : vector<96x8xf32>
    %c0_24 = arith.constant 0 : index
    %c0_25 = arith.constant 0 : index
    %38 = vector.load %arg12[%c0_24, %c0_25] : memref<96x1xf32, #tpu.memory_space<vmem>>, vector<96x1xf32>
    %39 = vector.broadcast %38 : vector<96x1xf32> to vector<96x8xf32>
    %40 = arith.mulf %37, %39 : vector<96x8xf32>
    %41 = arith.truncf %40 : vector<96x8xf32> to vector<96x8xbf16>
    %c0_26 = arith.constant 0 : index
    %c0_27 = arith.constant 0 : index
    %42 = vector.load %arg13[%c0_26, %c0_27] : memref<96x8xbf16, #tpu.memory_space<vmem>>, vector<96x8xbf16>
    tpu.vector_store %arg13[%c0_26, %c0_27], %41 {strides = array<i32>} : memref<96x8xbf16, #tpu.memory_space<vmem>>, vector<96x8xbf16>,
    return
  }
  func.func @transform_0(%arg0: i32) -> (i32, i32) {
    %c0_i32 = arith.constant 0 : i32
    %c0_i32_0 = arith.constant 0 : i32
    return %arg0, %c0_i32 : i32, i32
  }
  func.func @transform_1(%arg0: i32) -> (i32, i32) {
    %c1_i32 = arith.constant 1 : i32
    %0 = arith.addi %arg0, %c1_i32 : i32
    %c6_i32 = arith.constant 6 : i32
    %1 = arith.muli %0, %c6_i32 : i32
    %c0_i32 = arith.constant 0 : i32
    %c0_i32_0 = arith.constant 0 : i32
    return %1, %c0_i32 : i32, i32
  }
  func.func @transform_2(%arg0: i32) -> (i32, i32) {
    %c0_i32 = arith.constant 0 : i32
    %c0_i32_0 = arith.constant 0 : i32
    return %arg0, %c0_i32 : i32, i32
  }
  func.func @transform_3(%arg0: i32) -> (i32, i32) {
    %c1_i32 = arith.constant 1 : i32
    %0 = arith.addi %arg0, %c1_i32 : i32
    %c6_i32 = arith.constant 6 : i32
    %1 = arith.muli %0, %c6_i32 : i32
    %c0_i32 = arith.constant 0 : i32
    %c0_i32_0 = arith.constant 0 : i32
    return %1, %c0_i32 : i32, i32
  }
  func.func @transform_4(%arg0: i32) -> (i32, i32) {
    %c0_i32 = arith.constant 0 : i32
    %c0_i32_0 = arith.constant 0 : i32
    return %arg0, %c0_i32 : i32, i32
  }
  func.func @transform_5(%arg0: i32) -> (i32, i32) {
    %c1_i32 = arith.constant 1 : i32
    %0 = arith.addi %arg0, %c1_i32 : i32
    %c6_i32 = arith.constant 6 : i32
    %1 = arith.muli %0, %c6_i32 : i32
    %c0_i32 = arith.constant 0 : i32
    %c0_i32_0 = arith.constant 0 : i32
    return %1, %c0_i32 : i32, i32
  }
  func.func @transform_6(%arg0: i32) -> (i32, i32) {
    %c0_i32 = arith.constant 0 : i32
    %c0_i32_0 = arith.constant 0 : i32
    return %arg0, %c0_i32 : i32, i32
  }
  func.func @transform_7(%arg0: i32) -> (i32, i32) {
    %c1_i32 = arith.constant 1 : i32
    %0 = arith.addi %arg0, %c1_i32 : i32
    %c6_i32 = arith.constant 6 : i32
    %1 = arith.muli %0, %c6_i32 : i32
    %c0_i32 = arith.constant 0 : i32
    %c0_i32_0 = arith.constant 0 : i32
    return %1, %c0_i32 : i32, i32
  }
  func.func @transform_8(%arg0: i32) -> (i32, i32) {
    %c0_i32 = arith.constant 0 : i32
    %c0_i32_0 = arith.constant 0 : i32
    %c0_i32_1 = arith.constant 0 : i32
    return %c0_i32, %c0_i32_0 : i32, i32
  }
  func.func @transform_9(%arg0: i32) -> (i32, i32) {
    %c0_i32 = arith.constant 0 : i32
    %c0_i32_0 = arith.constant 0 : i32
    %c0_i32_1 = arith.constant 0 : i32
    return %c0_i32, %c0_i32_0 : i32, i32
  }
  func.func @transform_10(%arg0: i32) -> (i32, i32) {
    %c0_i32 = arith.constant 0 : i32
    %c0_i32_0 = arith.constant 0 : i32
    %c0_i32_1 = arith.constant 0 : i32
    return %c0_i32, %c0_i32_0 : i32, i32
  }
  func.func @transform_11(%arg0: i32) -> (i32, i32) {
    %c0_i32 = arith.constant 0 : i32
    %c0_i32_0 = arith.constant 0 : i32
    return %arg0, %c0_i32 : i32, i32
  }
  func.func @transform_12(%arg0: i32) -> (i32, i32) {
    %c0_i32 = arith.constant 0 : i32
    %c0_i32_0 = arith.constant 0 : i32
    return %arg0, %c0_i32 : i32, i32
  }
}

module attributes {stable_mosaic.version = 11 : i64} {
  func.func @_conv_kernel(%arg0: i32, %arg1: memref<128x8xbf16, #tpu.memory_space<vmem>>, %arg2: memref<32x8xbf16, #tpu.memory_space<vmem>>, %arg3: memref<72x8xbf16, #tpu.memory_space<vmem>>, %arg4: memref<1x8xf32, #tpu.memory_space<vmem>>, %arg5: memref<1x8xf32, #tpu.memory_space<vmem>>, %arg6: memref<128x1xf32, #tpu.memory_space<vmem>>, %arg7: memref<128x8xbf16, #tpu.memory_space<vmem>>) attributes {dimension_semantics = [#tpu.dimension_semantics<parallel>], iteration_bounds = array<i64: 2>, scalar_prefetch = 0 : i64, scratch_operands = 0 : i64, tpu.core_type = #tpu.core_type<tc>, window_params = [{transform_indices = @transform_0, window_bounds = array<i64: 128, 8>}, {transform_indices = @transform_1, window_bounds = array<i64: 32, 8>}, {pipeline_mode = #tpu.pipeline_mode<synchronous>, transform_indices = @transform_2, window_bounds = array<i64: 72, 8>}, {pipeline_mode = #tpu.pipeline_mode<synchronous>, transform_indices = @transform_3, window_bounds = array<i64: 1, 8>}, {pipeline_mode = #tpu.pipeline_mode<synchronous>, transform_indices = @transform_4, window_bounds = array<i64: 1, 8>}, {transform_indices = @transform_5, window_bounds = array<i64: 128, 1>}, {transform_indices = @transform_6, window_bounds = array<i64: 128, 8>}]} {
    %c0 = arith.constant 0 : index
    %c0_0 = arith.constant 0 : index
    %0 = vector.load %arg1[%c0, %c0_0] : memref<128x8xbf16, #tpu.memory_space<vmem>>, vector<128x8xbf16>
    %c0_1 = arith.constant 0 : index
    %c0_2 = arith.constant 0 : index
    %1 = vector.load %arg2[%c0_1, %c0_2] : memref<32x8xbf16, #tpu.memory_space<vmem>>, vector<32x8xbf16>
    %2 = tpu.concatenate %0, %1 in 0 : vector<128x8xbf16>, vector<32x8xbf16> -> vector<160x8xbf16>
    %3 = vector.extract_strided_slice %2 {offsets = [0, 0], sizes = [128, 8], strides = [1, 1]} : vector<160x8xbf16> to vector<128x8xbf16>
    %4 = vector.extract_strided_slice %2 {offsets = [1, 0], sizes = [128, 8], strides = [1, 1]} : vector<160x8xbf16> to vector<128x8xbf16>
    %5 = vector.extract_strided_slice %2 {offsets = [2, 0], sizes = [128, 8], strides = [1, 1]} : vector<160x8xbf16> to vector<128x8xbf16>
    %6 = vector.extract_strided_slice %2 {offsets = [10, 0], sizes = [128, 8], strides = [1, 1]} : vector<160x8xbf16> to vector<128x8xbf16>
    %7 = vector.extract_strided_slice %2 {offsets = [11, 0], sizes = [128, 8], strides = [1, 1]} : vector<160x8xbf16> to vector<128x8xbf16>
    %8 = vector.extract_strided_slice %2 {offsets = [12, 0], sizes = [128, 8], strides = [1, 1]} : vector<160x8xbf16> to vector<128x8xbf16>
    %9 = vector.extract_strided_slice %2 {offsets = [20, 0], sizes = [128, 8], strides = [1, 1]} : vector<160x8xbf16> to vector<128x8xbf16>
    %10 = vector.extract_strided_slice %2 {offsets = [21, 0], sizes = [128, 8], strides = [1, 1]} : vector<160x8xbf16> to vector<128x8xbf16>
    %11 = vector.extract_strided_slice %2 {offsets = [22, 0], sizes = [128, 8], strides = [1, 1]} : vector<160x8xbf16> to vector<128x8xbf16>
    %12 = tpu.concatenate %3, %4, %5, %6, %7, %8, %9, %10, %11 in 1 : vector<128x8xbf16>, vector<128x8xbf16>, vector<128x8xbf16>, vector<128x8xbf16>, vector<128x8xbf16>, vector<128x8xbf16>, vector<128x8xbf16>, vector<128x8xbf16>, vector<128x8xbf16> -> vector<128x72xbf16>
    %c0_3 = arith.constant 0 : index
    %c0_4 = arith.constant 0 : index
    %13 = vector.load %arg3[%c0_3, %c0_4] : memref<72x8xbf16, #tpu.memory_space<vmem>>, vector<72x8xbf16>
    %cst = arith.constant dense<0.000000e+00> : vector<128x8xf32>
    %14 = tpu.matmul %12, %13, %cst {dimension_numbers = #tpu.dot_dimension_numbers<[1], [0], [0], [1], [0, 0, 1, 1], [], []>} : vector<128x72xbf16>, vector<72x8xbf16>, vector<128x8xf32> -> vector<128x8xf32>
    %c0_5 = arith.constant 0 : index
    %c0_6 = arith.constant 0 : index
    %15 = vector.load %arg4[%c0_5, %c0_6] : memref<1x8xf32, #tpu.memory_space<vmem>>, vector<1x8xf32>
    %16 = vector.broadcast %15 : vector<1x8xf32> to vector<128x8xf32>
    %17 = arith.mulf %14, %16 : vector<128x8xf32>
    %c0_7 = arith.constant 0 : index
    %c0_8 = arith.constant 0 : index
    %18 = vector.load %arg5[%c0_7, %c0_8] : memref<1x8xf32, #tpu.memory_space<vmem>>, vector<1x8xf32>
    %19 = vector.broadcast %18 : vector<1x8xf32> to vector<128x8xf32>
    %20 = arith.addf %17, %19 : vector<128x8xf32>
    %cst_9 = arith.constant 5.000000e-01 : f32
    %21 = vector.broadcast %cst_9 : f32 to vector<128x8xf32>
    %22 = arith.mulf %21, %20 : vector<128x8xf32>
    %cst_10 = arith.constant 0.707106769 : f32
    %23 = vector.broadcast %cst_10 : f32 to vector<128x8xf32>
    %24 = arith.mulf %20, %23 : vector<128x8xf32>
    %25 = math.erf %24 : vector<128x8xf32>
    %cst_11 = arith.constant 1.000000e+00 : f32
    %26 = vector.broadcast %cst_11 : f32 to vector<128x8xf32>
    %27 = arith.addf %26, %25 : vector<128x8xf32>
    %28 = arith.mulf %22, %27 : vector<128x8xf32>
    %c0_12 = arith.constant 0 : index
    %c0_13 = arith.constant 0 : index
    %29 = vector.load %arg6[%c0_12, %c0_13] : memref<128x1xf32, #tpu.memory_space<vmem>>, vector<128x1xf32>
    %30 = vector.broadcast %29 : vector<128x1xf32> to vector<128x8xf32>
    %31 = arith.mulf %28, %30 : vector<128x8xf32>
    %32 = arith.truncf %31 : vector<128x8xf32> to vector<128x8xbf16>
    %c0_14 = arith.constant 0 : index
    %c0_15 = arith.constant 0 : index
    %33 = vector.load %arg7[%c0_14, %c0_15] : memref<128x8xbf16, #tpu.memory_space<vmem>>, vector<128x8xbf16>
    tpu.vector_store %arg7[%c0_14, %c0_15], %32 {strides = array<i32>} : memref<128x8xbf16, #tpu.memory_space<vmem>>, vector<128x8xbf16>,
    return
  }
  func.func @transform_0(%arg0: i32) -> (i32, i32) {
    %c0_i32 = arith.constant 0 : i32
    %c0_i32_0 = arith.constant 0 : i32
    return %arg0, %c0_i32 : i32, i32
  }
  func.func @transform_1(%arg0: i32) -> (i32, i32) {
    %c1_i32 = arith.constant 1 : i32
    %0 = arith.addi %arg0, %c1_i32 : i32
    %c4_i32 = arith.constant 4 : i32
    %1 = arith.muli %0, %c4_i32 : i32
    %c0_i32 = arith.constant 0 : i32
    %c0_i32_0 = arith.constant 0 : i32
    return %1, %c0_i32 : i32, i32
  }
  func.func @transform_2(%arg0: i32) -> (i32, i32) {
    %c0_i32 = arith.constant 0 : i32
    %c0_i32_0 = arith.constant 0 : i32
    %c0_i32_1 = arith.constant 0 : i32
    return %c0_i32, %c0_i32_0 : i32, i32
  }
  func.func @transform_3(%arg0: i32) -> (i32, i32) {
    %c0_i32 = arith.constant 0 : i32
    %c0_i32_0 = arith.constant 0 : i32
    %c0_i32_1 = arith.constant 0 : i32
    return %c0_i32, %c0_i32_0 : i32, i32
  }
  func.func @transform_4(%arg0: i32) -> (i32, i32) {
    %c0_i32 = arith.constant 0 : i32
    %c0_i32_0 = arith.constant 0 : i32
    %c0_i32_1 = arith.constant 0 : i32
    return %c0_i32, %c0_i32_0 : i32, i32
  }
  func.func @transform_5(%arg0: i32) -> (i32, i32) {
    %c0_i32 = arith.constant 0 : i32
    %c0_i32_0 = arith.constant 0 : i32
    return %arg0, %c0_i32 : i32, i32
  }
  func.func @transform_6(%arg0: i32) -> (i32, i32) {
    %c0_i32 = arith.constant 0 : i32
    %c0_i32_0 = arith.constant 0 : i32
    return %arg0, %c0_i32 : i32, i32
  }
}

module attributes {stable_mosaic.version = 11 : i64} {
  func.func @_conv_kernel(%arg0: i32, %arg1: memref<32x8xbf16, #tpu.memory_space<vmem>>, %arg2: memref<16x8xbf16, #tpu.memory_space<vmem>>, %arg3: memref<32x8xbf16, #tpu.memory_space<vmem>>, %arg4: memref<16x8xbf16, #tpu.memory_space<vmem>>, %arg5: memref<32x8xbf16, #tpu.memory_space<vmem>>, %arg6: memref<16x8xbf16, #tpu.memory_space<vmem>>, %arg7: memref<32x8xbf16, #tpu.memory_space<vmem>>, %arg8: memref<16x8xbf16, #tpu.memory_space<vmem>>, %arg9: memref<72x16xbf16, #tpu.memory_space<vmem>>, %arg10: memref<1x16xf32, #tpu.memory_space<vmem>>, %arg11: memref<1x16xf32, #tpu.memory_space<vmem>>, %arg12: memref<32x1xf32, #tpu.memory_space<vmem>>, %arg13: memref<32x16xbf16, #tpu.memory_space<vmem>>) attributes {dimension_semantics = [#tpu.dimension_semantics<parallel>], iteration_bounds = array<i64: 2>, scalar_prefetch = 0 : i64, scratch_operands = 0 : i64, tpu.core_type = #tpu.core_type<tc>, window_params = [{transform_indices = @transform_0, window_bounds = array<i64: 32, 8>}, {transform_indices = @transform_1, window_bounds = array<i64: 16, 8>}, {transform_indices = @transform_2, window_bounds = array<i64: 32, 8>}, {transform_indices = @transform_3, window_bounds = array<i64: 16, 8>}, {transform_indices = @transform_4, window_bounds = array<i64: 32, 8>}, {transform_indices = @transform_5, window_bounds = array<i64: 16, 8>}, {transform_indices = @transform_6, window_bounds = array<i64: 32, 8>}, {transform_indices = @transform_7, window_bounds = array<i64: 16, 8>}, {pipeline_mode = #tpu.pipeline_mode<synchronous>, transform_indices = @transform_8, window_bounds = array<i64: 72, 16>}, {pipeline_mode = #tpu.pipeline_mode<synchronous>, transform_indices = @transform_9, window_bounds = array<i64: 1, 16>}, {pipeline_mode = #tpu.pipeline_mode<synchronous>, transform_indices = @transform_10, window_bounds = array<i64: 1, 16>}, {transform_indices = @transform_11, window_bounds = array<i64: 32, 1>}, {transform_indices = @transform_12, window_bounds = array<i64: 32, 16>}]} {
    %c0 = arith.constant 0 : index
    %c0_0 = arith.constant 0 : index
    %0 = vector.load %arg1[%c0, %c0_0] : memref<32x8xbf16, #tpu.memory_space<vmem>>, vector<32x8xbf16>
    %c0_1 = arith.constant 0 : index
    %c0_2 = arith.constant 0 : index
    %1 = vector.load %arg2[%c0_1, %c0_2] : memref<16x8xbf16, #tpu.memory_space<vmem>>, vector<16x8xbf16>
    %2 = tpu.concatenate %0, %1 in 0 : vector<32x8xbf16>, vector<16x8xbf16> -> vector<48x8xbf16>
    %c0_3 = arith.constant 0 : index
    %c0_4 = arith.constant 0 : index
    %3 = vector.load %arg3[%c0_3, %c0_4] : memref<32x8xbf16, #tpu.memory_space<vmem>>, vector<32x8xbf16>
    %c0_5 = arith.constant 0 : index
    %c0_6 = arith.constant 0 : index
    %4 = vector.load %arg4[%c0_5, %c0_6] : memref<16x8xbf16, #tpu.memory_space<vmem>>, vector<16x8xbf16>
    %5 = tpu.concatenate %3, %4 in 0 : vector<32x8xbf16>, vector<16x8xbf16> -> vector<48x8xbf16>
    %c0_7 = arith.constant 0 : index
    %c0_8 = arith.constant 0 : index
    %6 = vector.load %arg5[%c0_7, %c0_8] : memref<32x8xbf16, #tpu.memory_space<vmem>>, vector<32x8xbf16>
    %c0_9 = arith.constant 0 : index
    %c0_10 = arith.constant 0 : index
    %7 = vector.load %arg6[%c0_9, %c0_10] : memref<16x8xbf16, #tpu.memory_space<vmem>>, vector<16x8xbf16>
    %8 = tpu.concatenate %6, %7 in 0 : vector<32x8xbf16>, vector<16x8xbf16> -> vector<48x8xbf16>
    %c0_11 = arith.constant 0 : index
    %c0_12 = arith.constant 0 : index
    %9 = vector.load %arg7[%c0_11, %c0_12] : memref<32x8xbf16, #tpu.memory_space<vmem>>, vector<32x8xbf16>
    %c0_13 = arith.constant 0 : index
    %c0_14 = arith.constant 0 : index
    %10 = vector.load %arg8[%c0_13, %c0_14] : memref<16x8xbf16, #tpu.memory_space<vmem>>, vector<16x8xbf16>
    %11 = tpu.concatenate %9, %10 in 0 : vector<32x8xbf16>, vector<16x8xbf16> -> vector<48x8xbf16>
    %12 = vector.extract_strided_slice %2 {offsets = [0, 0], sizes = [32, 8], strides = [1, 1]} : vector<48x8xbf16> to vector<32x8xbf16>
    %13 = vector.extract_strided_slice %5 {offsets = [0, 0], sizes = [32, 8], strides = [1, 1]} : vector<48x8xbf16> to vector<32x8xbf16>
    %14 = vector.extract_strided_slice %2 {offsets = [1, 0], sizes = [32, 8], strides = [1, 1]} : vector<48x8xbf16> to vector<32x8xbf16>
    %15 = vector.extract_strided_slice %8 {offsets = [0, 0], sizes = [32, 8], strides = [1, 1]} : vector<48x8xbf16> to vector<32x8xbf16>
    %16 = vector.extract_strided_slice %11 {offsets = [0, 0], sizes = [32, 8], strides = [1, 1]} : vector<48x8xbf16> to vector<32x8xbf16>
    %17 = vector.extract_strided_slice %8 {offsets = [1, 0], sizes = [32, 8], strides = [1, 1]} : vector<48x8xbf16> to vector<32x8xbf16>
    %18 = vector.extract_strided_slice %2 {offsets = [5, 0], sizes = [32, 8], strides = [1, 1]} : vector<48x8xbf16> to vector<32x8xbf16>
    %19 = vector.extract_strided_slice %5 {offsets = [5, 0], sizes = [32, 8], strides = [1, 1]} : vector<48x8xbf16> to vector<32x8xbf16>
    %20 = vector.extract_strided_slice %2 {offsets = [6, 0], sizes = [32, 8], strides = [1, 1]} : vector<48x8xbf16> to vector<32x8xbf16>
    %21 = tpu.concatenate %12, %13, %14, %15, %16, %17, %18, %19, %20 in 1 : vector<32x8xbf16>, vector<32x8xbf16>, vector<32x8xbf16>, vector<32x8xbf16>, vector<32x8xbf16>, vector<32x8xbf16>, vector<32x8xbf16>, vector<32x8xbf16>, vector<32x8xbf16> -> vector<32x72xbf16>
    %c0_15 = arith.constant 0 : index
    %c0_16 = arith.constant 0 : index
    %22 = vector.load %arg9[%c0_15, %c0_16] : memref<72x16xbf16, #tpu.memory_space<vmem>>, vector<72x16xbf16>
    %cst = arith.constant dense<0.000000e+00> : vector<32x16xf32>
    %23 = tpu.matmul %21, %22, %cst {dimension_numbers = #tpu.dot_dimension_numbers<[1], [0], [0], [1], [0, 0, 1, 1], [], []>} : vector<32x72xbf16>, vector<72x16xbf16>, vector<32x16xf32> -> vector<32x16xf32>
    %c0_17 = arith.constant 0 : index
    %c0_18 = arith.constant 0 : index
    %24 = vector.load %arg10[%c0_17, %c0_18] : memref<1x16xf32, #tpu.memory_space<vmem>>, vector<1x16xf32>
    %25 = vector.broadcast %24 : vector<1x16xf32> to vector<32x16xf32>
    %26 = arith.mulf %23, %25 : vector<32x16xf32>
    %c0_19 = arith.constant 0 : index
    %c0_20 = arith.constant 0 : index
    %27 = vector.load %arg11[%c0_19, %c0_20] : memref<1x16xf32, #tpu.memory_space<vmem>>, vector<1x16xf32>
    %28 = vector.broadcast %27 : vector<1x16xf32> to vector<32x16xf32>
    %29 = arith.addf %26, %28 : vector<32x16xf32>
    %cst_21 = arith.constant 5.000000e-01 : f32
    %30 = vector.broadcast %cst_21 : f32 to vector<32x16xf32>
    %31 = arith.mulf %30, %29 : vector<32x16xf32>
    %cst_22 = arith.constant 0.707106769 : f32
    %32 = vector.broadcast %cst_22 : f32 to vector<32x16xf32>
    %33 = arith.mulf %29, %32 : vector<32x16xf32>
    %34 = math.erf %33 : vector<32x16xf32>
    %cst_23 = arith.constant 1.000000e+00 : f32
    %35 = vector.broadcast %cst_23 : f32 to vector<32x16xf32>
    %36 = arith.addf %35, %34 : vector<32x16xf32>
    %37 = arith.mulf %31, %36 : vector<32x16xf32>
    %c0_24 = arith.constant 0 : index
    %c0_25 = arith.constant 0 : index
    %38 = vector.load %arg12[%c0_24, %c0_25] : memref<32x1xf32, #tpu.memory_space<vmem>>, vector<32x1xf32>
    %39 = vector.broadcast %38 : vector<32x1xf32> to vector<32x16xf32>
    %40 = arith.mulf %37, %39 : vector<32x16xf32>
    %41 = arith.truncf %40 : vector<32x16xf32> to vector<32x16xbf16>
    %c0_26 = arith.constant 0 : index
    %c0_27 = arith.constant 0 : index
    %42 = vector.load %arg13[%c0_26, %c0_27] : memref<32x16xbf16, #tpu.memory_space<vmem>>, vector<32x16xbf16>
    tpu.vector_store %arg13[%c0_26, %c0_27], %41 {strides = array<i32>} : memref<32x16xbf16, #tpu.memory_space<vmem>>, vector<32x16xbf16>,
    return
  }
  func.func @transform_0(%arg0: i32) -> (i32, i32) {
    %c0_i32 = arith.constant 0 : i32
    %c0_i32_0 = arith.constant 0 : i32
    return %arg0, %c0_i32 : i32, i32
  }
  func.func @transform_1(%arg0: i32) -> (i32, i32) {
    %c1_i32 = arith.constant 1 : i32
    %0 = arith.addi %arg0, %c1_i32 : i32
    %c2_i32 = arith.constant 2 : i32
    %1 = arith.muli %0, %c2_i32 : i32
    %c0_i32 = arith.constant 0 : i32
    %c0_i32_0 = arith.constant 0 : i32
    return %1, %c0_i32 : i32, i32
  }
  func.func @transform_2(%arg0: i32) -> (i32, i32) {
    %c0_i32 = arith.constant 0 : i32
    %c0_i32_0 = arith.constant 0 : i32
    return %arg0, %c0_i32 : i32, i32
  }
  func.func @transform_3(%arg0: i32) -> (i32, i32) {
    %c1_i32 = arith.constant 1 : i32
    %0 = arith.addi %arg0, %c1_i32 : i32
    %c2_i32 = arith.constant 2 : i32
    %1 = arith.muli %0, %c2_i32 : i32
    %c0_i32 = arith.constant 0 : i32
    %c0_i32_0 = arith.constant 0 : i32
    return %1, %c0_i32 : i32, i32
  }
  func.func @transform_4(%arg0: i32) -> (i32, i32) {
    %c0_i32 = arith.constant 0 : i32
    %c0_i32_0 = arith.constant 0 : i32
    return %arg0, %c0_i32 : i32, i32
  }
  func.func @transform_5(%arg0: i32) -> (i32, i32) {
    %c1_i32 = arith.constant 1 : i32
    %0 = arith.addi %arg0, %c1_i32 : i32
    %c2_i32 = arith.constant 2 : i32
    %1 = arith.muli %0, %c2_i32 : i32
    %c0_i32 = arith.constant 0 : i32
    %c0_i32_0 = arith.constant 0 : i32
    return %1, %c0_i32 : i32, i32
  }
  func.func @transform_6(%arg0: i32) -> (i32, i32) {
    %c0_i32 = arith.constant 0 : i32
    %c0_i32_0 = arith.constant 0 : i32
    return %arg0, %c0_i32 : i32, i32
  }
  func.func @transform_7(%arg0: i32) -> (i32, i32) {
    %c1_i32 = arith.constant 1 : i32
    %0 = arith.addi %arg0, %c1_i32 : i32
    %c2_i32 = arith.constant 2 : i32
    %1 = arith.muli %0, %c2_i32 : i32
    %c0_i32 = arith.constant 0 : i32
    %c0_i32_0 = arith.constant 0 : i32
    return %1, %c0_i32 : i32, i32
  }
  func.func @transform_8(%arg0: i32) -> (i32, i32) {
    %c0_i32 = arith.constant 0 : i32
    %c0_i32_0 = arith.constant 0 : i32
    %c0_i32_1 = arith.constant 0 : i32
    return %c0_i32, %c0_i32_0 : i32, i32
  }
  func.func @transform_9(%arg0: i32) -> (i32, i32) {
    %c0_i32 = arith.constant 0 : i32
    %c0_i32_0 = arith.constant 0 : i32
    %c0_i32_1 = arith.constant 0 : i32
    return %c0_i32, %c0_i32_0 : i32, i32
  }
  func.func @transform_10(%arg0: i32) -> (i32, i32) {
    %c0_i32 = arith.constant 0 : i32
    %c0_i32_0 = arith.constant 0 : i32
    %c0_i32_1 = arith.constant 0 : i32
    return %c0_i32, %c0_i32_0 : i32, i32
  }
  func.func @transform_11(%arg0: i32) -> (i32, i32) {
    %c0_i32 = arith.constant 0 : i32
    %c0_i32_0 = arith.constant 0 : i32
    return %arg0, %c0_i32 : i32, i32
  }
  func.func @transform_12(%arg0: i32) -> (i32, i32) {
    %c0_i32 = arith.constant 0 : i32
    %c0_i32_0 = arith.constant 0 : i32
    return %arg0, %c0_i32 : i32, i32
  }
}

module attributes {stable_mosaic.version = 11 : i64} {
  func.func @_conv_kernel(%arg0: i32, %arg1: memref<48x16xbf16, #tpu.memory_space<vmem>>, %arg2: memref<16x16xbf16, #tpu.memory_space<vmem>>, %arg3: memref<144x16xbf16, #tpu.memory_space<vmem>>, %arg4: memref<1x16xf32, #tpu.memory_space<vmem>>, %arg5: memref<1x16xf32, #tpu.memory_space<vmem>>, %arg6: memref<48x1xf32, #tpu.memory_space<vmem>>, %arg7: memref<1x16xf32, #tpu.memory_space<vmem>>, %arg8: memref<1x16xf32, #tpu.memory_space<vmem>>, %arg9: memref<48x16xf32, #tpu.memory_space<vmem>>) attributes {dimension_semantics = [#tpu.dimension_semantics<parallel>], iteration_bounds = array<i64: 2>, scalar_prefetch = 0 : i64, scratch_operands = 0 : i64, tpu.core_type = #tpu.core_type<tc>, window_params = [{transform_indices = @transform_0, window_bounds = array<i64: 48, 16>}, {transform_indices = @transform_1, window_bounds = array<i64: 16, 16>}, {pipeline_mode = #tpu.pipeline_mode<synchronous>, transform_indices = @transform_2, window_bounds = array<i64: 144, 16>}, {pipeline_mode = #tpu.pipeline_mode<synchronous>, transform_indices = @transform_3, window_bounds = array<i64: 1, 16>}, {pipeline_mode = #tpu.pipeline_mode<synchronous>, transform_indices = @transform_4, window_bounds = array<i64: 1, 16>}, {transform_indices = @transform_5, window_bounds = array<i64: 48, 1>}, {pipeline_mode = #tpu.pipeline_mode<synchronous>, transform_indices = @transform_6, window_bounds = array<i64: 1, 16>}, {pipeline_mode = #tpu.pipeline_mode<synchronous>, transform_indices = @transform_7, window_bounds = array<i64: 1, 16>}, {transform_indices = @transform_8, window_bounds = array<i64: 48, 16>}]} {
    %c0 = arith.constant 0 : index
    %c0_0 = arith.constant 0 : index
    %0 = vector.load %arg1[%c0, %c0_0] : memref<48x16xbf16, #tpu.memory_space<vmem>>, vector<48x16xbf16>
    %c0_1 = arith.constant 0 : index
    %c0_2 = arith.constant 0 : index
    %1 = vector.load %arg2[%c0_1, %c0_2] : memref<16x16xbf16, #tpu.memory_space<vmem>>, vector<16x16xbf16>
    %2 = tpu.concatenate %0, %1 in 0 : vector<48x16xbf16>, vector<16x16xbf16> -> vector<64x16xbf16>
    %3 = vector.extract_strided_slice %2 {offsets = [0, 0], sizes = [48, 16], strides = [1, 1]} : vector<64x16xbf16> to vector<48x16xbf16>
    %4 = vector.extract_strided_slice %2 {offsets = [1, 0], sizes = [48, 16], strides = [1, 1]} : vector<64x16xbf16> to vector<48x16xbf16>
    %5 = vector.extract_strided_slice %2 {offsets = [2, 0], sizes = [48, 16], strides = [1, 1]} : vector<64x16xbf16> to vector<48x16xbf16>
    %6 = vector.extract_strided_slice %2 {offsets = [6, 0], sizes = [48, 16], strides = [1, 1]} : vector<64x16xbf16> to vector<48x16xbf16>
    %7 = vector.extract_strided_slice %2 {offsets = [7, 0], sizes = [48, 16], strides = [1, 1]} : vector<64x16xbf16> to vector<48x16xbf16>
    %8 = vector.extract_strided_slice %2 {offsets = [8, 0], sizes = [48, 16], strides = [1, 1]} : vector<64x16xbf16> to vector<48x16xbf16>
    %9 = vector.extract_strided_slice %2 {offsets = [12, 0], sizes = [48, 16], strides = [1, 1]} : vector<64x16xbf16> to vector<48x16xbf16>
    %10 = vector.extract_strided_slice %2 {offsets = [13, 0], sizes = [48, 16], strides = [1, 1]} : vector<64x16xbf16> to vector<48x16xbf16>
    %11 = vector.extract_strided_slice %2 {offsets = [14, 0], sizes = [48, 16], strides = [1, 1]} : vector<64x16xbf16> to vector<48x16xbf16>
    %12 = tpu.concatenate %3, %4, %5, %6, %7, %8, %9, %10, %11 in 1 : vector<48x16xbf16>, vector<48x16xbf16>, vector<48x16xbf16>, vector<48x16xbf16>, vector<48x16xbf16>, vector<48x16xbf16>, vector<48x16xbf16>, vector<48x16xbf16>, vector<48x16xbf16> -> vector<48x144xbf16>
    %c0_3 = arith.constant 0 : index
    %c0_4 = arith.constant 0 : index
    %13 = vector.load %arg3[%c0_3, %c0_4] : memref<144x16xbf16, #tpu.memory_space<vmem>>, vector<144x16xbf16>
    %cst = arith.constant dense<0.000000e+00> : vector<48x16xf32>
    %14 = tpu.matmul %12, %13, %cst {dimension_numbers = #tpu.dot_dimension_numbers<[1], [0], [0], [1], [0, 0, 1, 1], [], []>} : vector<48x144xbf16>, vector<144x16xbf16>, vector<48x16xf32> -> vector<48x16xf32>
    %c0_5 = arith.constant 0 : index
    %c0_6 = arith.constant 0 : index
    %15 = vector.load %arg4[%c0_5, %c0_6] : memref<1x16xf32, #tpu.memory_space<vmem>>, vector<1x16xf32>
    %16 = vector.broadcast %15 : vector<1x16xf32> to vector<48x16xf32>
    %17 = arith.mulf %14, %16 : vector<48x16xf32>
    %c0_7 = arith.constant 0 : index
    %c0_8 = arith.constant 0 : index
    %18 = vector.load %arg5[%c0_7, %c0_8] : memref<1x16xf32, #tpu.memory_space<vmem>>, vector<1x16xf32>
    %19 = vector.broadcast %18 : vector<1x16xf32> to vector<48x16xf32>
    %20 = arith.addf %17, %19 : vector<48x16xf32>
    %cst_9 = arith.constant dense<0.000000e+00> : vector<48xf32>
    %21 = vector.multi_reduction <add>, %20, %cst_9 [1] : vector<48x16xf32> to vector<48xf32>
    %22 = vector.shape_cast %21 : vector<48xf32> to vector<48x1xf32>
    %cst_10 = arith.constant 1.600000e+01 : f32
    %23 = vector.broadcast %cst_10 : f32 to vector<48x1xf32>
    %24 = arith.divf %22, %23 : vector<48x1xf32>
    %25 = vector.broadcast %24 : vector<48x1xf32> to vector<48x16xf32>
    %26 = arith.subf %20, %25 : vector<48x16xf32>
    %27 = arith.mulf %26, %26 : vector<48x16xf32>
    %cst_11 = arith.constant dense<0.000000e+00> : vector<48xf32>
    %28 = vector.multi_reduction <add>, %27, %cst_11 [1] : vector<48x16xf32> to vector<48xf32>
    %29 = vector.shape_cast %28 : vector<48xf32> to vector<48x1xf32>
    %cst_12 = arith.constant 1.600000e+01 : f32
    %30 = vector.broadcast %cst_12 : f32 to vector<48x1xf32>
    %31 = arith.divf %29, %30 : vector<48x1xf32>
    %cst_13 = arith.constant 9.99999997E-7 : f32
    %32 = vector.broadcast %cst_13 : f32 to vector<48x1xf32>
    %33 = arith.addf %31, %32 : vector<48x1xf32>
    %34 = math.rsqrt %33 : vector<48x1xf32>
    %35 = vector.broadcast %34 : vector<48x1xf32> to vector<48x16xf32>
    %36 = arith.mulf %26, %35 : vector<48x16xf32>
    %c0_14 = arith.constant 0 : index
    %c0_15 = arith.constant 0 : index
    %37 = vector.load %arg7[%c0_14, %c0_15] : memref<1x16xf32, #tpu.memory_space<vmem>>, vector<1x16xf32>
    %38 = vector.broadcast %37 : vector<1x16xf32> to vector<48x16xf32>
    %39 = arith.mulf %36, %38 : vector<48x16xf32>
    %c0_16 = arith.constant 0 : index
    %c0_17 = arith.constant 0 : index
    %40 = vector.load %arg8[%c0_16, %c0_17] : memref<1x16xf32, #tpu.memory_space<vmem>>, vector<1x16xf32>
    %41 = vector.broadcast %40 : vector<1x16xf32> to vector<48x16xf32>
    %42 = arith.addf %39, %41 : vector<48x16xf32>
    %c0_18 = arith.constant 0 : index
    %c0_19 = arith.constant 0 : index
    %43 = vector.load %arg6[%c0_18, %c0_19] : memref<48x1xf32, #tpu.memory_space<vmem>>, vector<48x1xf32>
    %44 = vector.broadcast %43 : vector<48x1xf32> to vector<48x16xf32>
    %45 = arith.mulf %42, %44 : vector<48x16xf32>
    %c0_20 = arith.constant 0 : index
    %c0_21 = arith.constant 0 : index
    %46 = vector.load %arg9[%c0_20, %c0_21] : memref<48x16xf32, #tpu.memory_space<vmem>>, vector<48x16xf32>
    tpu.vector_store %arg9[%c0_20, %c0_21], %45 {strides = array<i32>} : memref<48x16xf32, #tpu.memory_space<vmem>>, vector<48x16xf32>,
    return
  }
  func.func @transform_0(%arg0: i32) -> (i32, i32) {
    %c0_i32 = arith.constant 0 : i32
    %c0_i32_0 = arith.constant 0 : i32
    return %arg0, %c0_i32 : i32, i32
  }
  func.func @transform_1(%arg0: i32) -> (i32, i32) {
    %c1_i32 = arith.constant 1 : i32
    %0 = arith.addi %arg0, %c1_i32 : i32
    %c3_i32 = arith.constant 3 : i32
    %1 = arith.muli %0, %c3_i32 : i32
    %c0_i32 = arith.constant 0 : i32
    %c0_i32_0 = arith.constant 0 : i32
    return %1, %c0_i32 : i32, i32
  }
  func.func @transform_2(%arg0: i32) -> (i32, i32) {
    %c0_i32 = arith.constant 0 : i32
    %c0_i32_0 = arith.constant 0 : i32
    %c0_i32_1 = arith.constant 0 : i32
    return %c0_i32, %c0_i32_0 : i32, i32
  }
  func.func @transform_3(%arg0: i32) -> (i32, i32) {
    %c0_i32 = arith.constant 0 : i32
    %c0_i32_0 = arith.constant 0 : i32
    %c0_i32_1 = arith.constant 0 : i32
    return %c0_i32, %c0_i32_0 : i32, i32
  }
  func.func @transform_4(%arg0: i32) -> (i32, i32) {
    %c0_i32 = arith.constant 0 : i32
    %c0_i32_0 = arith.constant 0 : i32
    %c0_i32_1 = arith.constant 0 : i32
    return %c0_i32, %c0_i32_0 : i32, i32
  }
  func.func @transform_5(%arg0: i32) -> (i32, i32) {
    %c0_i32 = arith.constant 0 : i32
    %c0_i32_0 = arith.constant 0 : i32
    return %arg0, %c0_i32 : i32, i32
  }
  func.func @transform_6(%arg0: i32) -> (i32, i32) {
    %c0_i32 = arith.constant 0 : i32
    %c0_i32_0 = arith.constant 0 : i32
    %c0_i32_1 = arith.constant 0 : i32
    return %c0_i32, %c0_i32_0 : i32, i32
  }
  func.func @transform_7(%arg0: i32) -> (i32, i32) {
    %c0_i32 = arith.constant 0 : i32
    %c0_i32_0 = arith.constant 0 : i32
    %c0_i32_1 = arith.constant 0 : i32
    return %c0_i32, %c0_i32_0 : i32, i32
  }
  func.func @transform_8(%arg0: i32) -> (i32, i32) {
    %c0_i32 = arith.constant 0 : i32
    %c0_i32_0 = arith.constant 0 : i32
    return %arg0, %c0_i32 : i32, i32
  }
}

</mosaic_0001>

<bundles_post_ra>
// kernel: stem_forward.4
= control target key start
LH: loop header
LB: loop body
LE: loop exit
PB: predicated region body
PF: predicated region fallthrough
CT: control target
= control target key end

     0   :  { %s2064_s21 = smov 0   ;;  %s2526_s0 = inlined_call_operand.vmem [shape: bf16[288,8], index: 0, kind: input, shape index: {}, may-alias: {0,1}]   ;;  %s2527_s1 = inlined_call_operand.vmem [shape: bf16[288,8], index: 1, kind: input, shape index: {}, may-alias: {0,1}]   ;;  %s2528_s2 = inlined_call_operand.vmem [shape: bf16[288,8], index: 2, kind: input, shape index: {}, may-alias: {2,3}]   ;;  %s2529_s3 = inlined_call_operand.vmem [shape: bf16[288,8], index: 3, kind: input, shape index: {}, may-alias: {2,3}]   ;;  %s2530_s4 = inlined_call_operand.vmem [shape: bf16[288,8], index: 4, kind: input, shape index: {}, may-alias: {4,5}]   ;;  %s2531_s5 = inlined_call_operand.vmem [shape: bf16[288,8], index: 5, kind: input, shape index: {}, may-alias: {4,5}]   ;;  %s2532_s6 = inlined_call_operand.vmem [shape: bf16[288,8], index: 6, kind: input, shape index: {}, may-alias: {6,7}]   ;;  %s2533_s7 = inlined_call_operand.vmem [shape: bf16[288,8], index: 7, kind: input, shape index: {}, may-alias: {6,7}]   ;;  %s2534_s8 = inlined_call_operand.vmem [shape: bf16[72,8], index: 8, kind: input, shape index: {}]   ;;  %s2535_s9 = inlined_call_operand.vmem [shape: f32[1,8], index: 9, kind: input, shape index: {}]   ;;  %s2536_s10 = inlined_call_operand.vmem [shape: f32[1,8], index: 10, kind: input, shape index: {}]   ;;  %s2537_s11 = inlined_call_operand.vmem [shape: f32[192,1], index: 11, kind: input, shape index: {}]   ;;  %s2538_s12 = inlined_call_operand.vmem [shape: bf16[192,8], index: 12, kind: output, shape index: {}]  }
   0x1 LB: > { %s1779_s7 = sadd.s32 4294967295, %s1988_s21   ;;  %p1783_p0 = scmp.ge.s32.totalorder %s1988_s21, 1  ;;  %s1988_s21 = sphi %s2064_s21, %s22_s21  }
   0x2   : > { %p483_p1 = scmp.lt.s32.totalorder %s1988_s21, 3 }
   0x4   : > { %p484_p2 = pnand %p1783_p0, %p483_p1 }
   0x5   : > { %s2072_s22 = smul.u32 (!%p484_p2), 12, %s1779_s7  ;;  %s2545_s16 = smov (!%p484_p2), 24   ;;  %vm851_vm0 = vsmask.f32 (!%p484_p2), 7424  ;;  %vm1004_vm1 = vsmask.f32 (!%p484_p2), 3328 }
   0x6   : > { %487 = sbr.rel (%p484_p2) target bundleno = 471 (0x1d7), region = 68  ;;  %s1991_s17 = smov (!%p484_p2), 8   ;;  %vm1120_vm2 = vcmask (!%p484_p2), 1042432   ;;  %vm1299_vm3 = vcmask (!%p484_p2), 1043456   ;;  %vm1146_vm4 = vcmask (!%p484_p2), 64512   ;;  %vm1159_vm5 = vcmask (!%p484_p2), 130048  }
   0x7   : > { %p574_p3 = scmp.lt.s32.totalorder (!%p484_p2), %s2072_s22, 35  ;;  %s2096_s18 = sadd.s32 (!%p484_p2), 1, %s1779_s7  ;;  %vm1172_vm6 = vcmask (!%p484_p2), 195584   ;;  %vm1185_vm7 = vcmask (!%p484_p2), 261120   ;;  %vm1198_vm8 = vcmask (!%p484_p2), 326656   ;;  %vm1211_vm9 = vcmask (!%p484_p2), 392192  }
   0x8   : > { %s2543_s25 = smov (!%p484_p2), 32   ;;  %s1785_s7 = smul.u32 (!%p484_p2), 12, %s2096_s18  ;;  %vm1224_vm10 = vcmask (!%p484_p2), 457728   ;;  %vm1237_vm11 = vcmask (!%p484_p2), 523264   ;;  %vm1286_vm12 = vcmask (!%p484_p2), 588800   ;;  %vm1614_vm13 = vcmask (!%p484_p2), 60416  }
   0x9   : > { %s2541_s26 = smov (!%p484_p2), 40   ;;  %s2539_s28 = smov (!%p484_p2), 48  }
   0xa   : > { %p582_p4 = scmp.lt.s32.totalorder (!%p484_p2), %s1785_s7, 35  ;;  %s1996_s19 = smov (!%p484_p2), 56  }
   0xb   : > { %s1997_s20 = smov (!%p484_p2), 64   ;;  %p638_p5 = scmp.lt.s32.totalorder (!%p484_p2), %s2072_s22, 23 }
   0xd   : > { %s575_s23 = scalar_select %p574_p3, %s2072_s22, 35 }
   0xe   : > { %s2555_s7 = smov (!%p582_p4, %s1785_s7), 35  ;;  %s2557_s22 = smov (!%p638_p5, %s2072_s22), 23 }
   0xf   : > { %s1784_s24 = sshll.u32 %s575_s23, 2  ;;  %s2177_s29 = sshll.u32 %s2555_s7, 2 }
  0x10   : > { %s2079_s27 = scalar_lea.vmem %s2530_s4, %s1784_s24  ;;  %s2085_s30 = scalar_lea.vmem %s2528_s2, %s1784_s24 }
  0x11   : > { %v1926_v0 = vld [vmem:[%s2079_s27 + $0x18] sm:$0xff]   ;;  %s2090_s15 = scalar_lea.vmem %s2532_s6, %s1784_s24  ;;  %v1927_v1 = vld [vmem:[%s2085_s30 + $0x10] sm:$0xff]   ;;  %s2101_s23 = scalar_lea.vmem %s2526_s0, %s1784_s24  ;;  %v2128_v26 = vld [vmem:[%s2079_s27 + $0x20] sm:$0xff]  }
  0x12   : > { %922 = vrot.lane.b32.xlu1 %v1926_v0, %s2545_s16  ;;  %v1928_v2 = vld [vmem:[%s2090_s15 + $0x18] sm:$0xff]   ;;  %v964_v3 = vshll.u32 %v1926_v0, 16  ;;  %843 = vrot.lane.b32.xlu0 %v1927_v1, %s1991_s17  ;;  %v1064_v4 = vshrl.u32 %v1927_v1, 16  ;;  %v1067_v6 = vshll.u32 %v1927_v1, 16  ;;  %v1930_v7 = vld [vmem:[%s2079_s27 + $0x10] sm:$0xff]   ;;  %v968_v9 = vshrl.u32 %v1926_v0, 16  ;;  %s585_s18 = scalar_lea.vmem %s2527_s1, %s2177_s29  ;;  %s617_s14 = scalar_lea.vmem %s2531_s5, %s2177_s29 }
  0x13   : > { %v1929_v5 = vld [vmem:[%s2085_s30 + $0x18] sm:$0xff]   ;;  %v956_v11 = vshll.u32 %v1930_v7, 16  ;;  %v2108_v12 = vld [vmem:[%s2101_s23 + $0x10] sm:$0xff]   ;;  %v960_v15 = vshrl.u32 %v1930_v7, 16  ;;  %v2117_v19 = vld [vmem:[%s2101_s23 + $0x20] sm:$0xff]   ;;  %v972_v36 = vshll.u32 %v2128_v26, 16 }
  0x14   : > { %v966_v8 = vrot.slane %v964_v3, 1  ;;  %v1073_v10 = vshrl.u32 %v1929_v5, 16  ;;  %v2111_v13 = vld [vmem:[%s2101_s23 + $0x18] sm:$0xff]   ;;  %v1076_v14 = vshll.u32 %v1929_v5, 16  ;;  %v868_v16 = vshll.u32 %v2108_v12, 16  ;;  %v1933_v24 = vld [vmem:[%s2090_s15 + $0x10] sm:$0xff]  }
  0x15   : > { %v872_v17 = vshrl.u32 %v2108_v12, 16  ;;  %v876_v18 = vshll.u32 %v2111_v13, 16  ;;  %v880_v20 = vshrl.u32 %v2111_v13, 16  ;;  %v2120_v21 = vrot.slane %v956_v11, 1  ;;  %v2132_v32 = vld [vmem:[%s2085_s30 + $0x20] sm:$0xff]   ;;  %s2547_s24 = smov 16  }
  0x16   : > { %934 = vrot.lane.b32.xlu1 %v1928_v2, %s2543_s25  ;;  %845 = vrot.lane.b32.xlu0 %v1929_v5, %s1991_s17  ;;  %v2123_v22 = vrot.slane %v868_v16, 1  ;;  %v884_v25 = vshll.u32 %v2117_v19, 16  ;;  %v1013_v29 = vrot.slane %v868_v16, 5  ;;  %v970_v38 = vor.u32 %v968_v9, %v966_v8  ;;  %v2166_v60 = vld [vmem:[%s2101_s23] sm:$0xff]   ;;  %v2185_v2 = vld [vmem:[%s2101_s23 + $0x8] sm:$0xff]   ;;  %s2551_s7 = smov 32  }
  0x17   : > { %v878_v23 = vrot.slane %v876_v18, 1  ;;  %v1012_v27 = vrot.slane %v872_v17, 4  ;;  %v962_v28 = vor.u32 %v960_v15, %v2120_v21  ;;  %v1016_v30 = vrot.slane %v880_v20, 4  ;;  %v2213_v11 = vld [vmem:[%s2101_s23 + $0x28] sm:$0xff]   ;;  %s2553_s23 = smov 48  }
  0x18   : > { %v1017_v31 = vrot.slane %v876_v18, 5  ;;  %v874_v33 = vor.u32 %v872_v17, %v2123_v22  ;;  %v2135_v35 = vrot.slane %v884_v25, 1  ;;  %v888_v39 = vshrl.u32 %v2117_v19, 16  ;;  %v1954_v15 = vld [vmem:[%s2534_s8 + $0x8] sm:$0xff]  }
  0x19   : > { %v882_v34 = vor.u32 %v880_v20, %v878_v23  ;;  %v967_v37 = vsel %vm851_vm0, %v962_v28, %v966_v8  ;;  %v1066_v40 = vrot.slane %v1064_v4, 4  ;;  %v2144_v43 = vor.u32 %v1013_v29, %v1012_v27  ;;  %v2224_v16 = vld [vmem:[%s2085_s30 + $0x8] sm:$0xff]   ;;  %v1955_v27 = vld [vmem:[%s2534_s8 + $0x10] sm:$0xff]  }
  0x1a   : > { %920 = vrot.lane.b32.xlu0 %v1930_v7, %s2545_s16  ;;  %v879_v41 = vsel %vm851_vm0, %v874_v33, %v878_v23  ;;  %v1018_v44 = vor.u32 %v1017_v31, %v1016_v30  ;;  %v2148_v45 = vrot.slane %v972_v36, 1  ;;  %v1021_v46 = vrot.slane %v884_v25, 5  ;;  %v2237_v25 = vld [vmem:[%s585_s18] sm:$0xff]   ;;  %v2246_v28 = vld [vmem:[%s2085_s30 + $0x28] sm:$0xff]   ;;  %v1956_v36 = vld [vmem:[%s2534_s8 + $0x18] sm:$0xff]   ;;  %s2550_s18 = smov 24  }
  0x1b   : > { %v887_v42 = vsel %vm851_vm0, %v882_v34, %v2135_v35  ;;  %908 = vrot.lane.b32.xlu1 %v879_v41, %s2547_s24  ;;  %v1069_v47 = vrot.slane %v1067_v6, 5  ;;  %v1075_v48 = vrot.slane %v1073_v10, 4  ;;  %v1020_v49 = vrot.slane %v888_v39, 4  ;;  %v2196_v6 = vld [vmem:[%s2085_s30] sm:$0xff]  }
  0x1c   : > { %v1078_v50 = vrot.slane %v1076_v14, 5  ;;  %v1082_v51 = vshrl.u32 %v2132_v32, 16  ;;  %v1085_v52 = vshll.u32 %v2132_v32, 16  ;;  %v1019_v53 = vsel %vm1004_vm1, %v2144_v43, %v1018_v44  ;;  %v1953_v14 = vld [vmem:[%s2534_s8] sm:$0xff]  }
  0x1d   : > { %v2158_v54 = vor.u32 %v1069_v47, %v1066_v40  ;;  %v975_v56 = vsel %vm851_vm0, %v970_v38, %v2148_v45  ;;  %v2162_v57 = vor.u32 %v1021_v46, %v1020_v49  ;;  %v1124_v62 = vrot.slane %v2108_v12, 5  ;;  %1895 = vmatprep.subr.bf16.mxu1 %v1953_v14  ;;  %1873 = vmatprep.subr.bf16.mxu0 %v1953_v14  ;;  %v1948_v49 = vld [vmem:[%s2090_s15] sm:$0xff]  }
  0x1e   : > { %932 = vrot.lane.b32.xlu0 %v1933_v24, %s2543_s25  ;;  %v1079_v55 = vor.u32 %v1078_v50, %v1075_v48  ;;  %v1084_v58 = vrot.slane %v1082_v51, 4  ;;  %v1087_v59 = vrot.slane %v1085_v52, 5  ;;  %v1126_v63 = vrot.slane %v2111_v13, 5  ;;  %s601_s25 = scalar_lea.vmem %s2529_s3, %s2177_s29  ;;  %1900 = vmatpush3.bf16.msra.mxu1 %v1953_v14  ;;  %v1946_v48 = vld [vmem:[%s2079_s27 + $0x8] sm:$0xff]  }
  0x1f   : > { %910 = vrot.lane.b32.xlu1 %v887_v42, %s2547_s24  ;;  %v1023_v0 = vsel %vm1004_vm1, %v1018_v44, %v2162_v57  ;;  %v855_v3 = vshll.u32 %v2166_v60, 16  ;;  %v853_v7 = vshrl.u32 %v2166_v60, 16  ;;  %v860_v9 = vshll.u32 %v2185_v2, 16  ;;  %1896 = vmatprep.subr.bf16.mxu1 %v1954_v15  ;;  %v1944_v42 = vld [vmem:[%s2079_s27] sm:$0xff]  }
  0x20   : > { %v1080_v61 = vsel %vm1004_vm1, %v2158_v54, %v1079_v55  ;;  %v2175_v1 = vor.u32 %v1087_v59, %v1084_v58  ;;  %v1127_v4 = vsel %vm1120_vm2, %v1124_v62, %v1126_v63  ;;  %v1128_v10 = vrot.slane %v2117_v19, 5  ;;  %1874 = vmatpush3.bf16.msra.mxu0 %v1953_v14  ;;  %v1947_v59 = vld [vmem:[%s2090_s15 + $0x20] sm:$0xff]  }
  0x21   : > { %v857_v8 = vrot.slane %v855_v3, 1  ;;  %v862_v18 = vrot.slane %v860_v9, 1  ;;  %v864_v20 = vshrl.u32 %v2185_v2, 16  ;;  %v892_v24 = vshll.u32 %v2213_v11, 16  ;;  %1875 = vmatprep.subr.bf16.mxu0 %v1954_v15 }
  0x22   : > { %996 = vrot.lane.b32.xlu0 %v967_v37, %s2541_s26  ;;  %v1089_v5 = vsel %vm1004_vm1, %v1079_v55, %v2175_v1  ;;  %v1129_v23 = vsel %vm1120_vm2, %v1126_v63, %v1128_v10  ;;  %v890_v31 = vor.u32 %v888_v39, %v2135_v35  ;;  %v896_v33 = vshrl.u32 %v2213_v11, 16  ;;  %1901 = vmatpush3.bf16.msra.mxu1 %v1954_v15  ;;  %v1950_v55 = vld [vmem:[%s2090_s15 + $0x8] sm:$0xff]  }
  0x23   : > { %998 = vrot.lane.b32.xlu1 %v975_v56, %s2541_s26  ;;  %v858_v17 = vor.u32 %v857_v8, %v853_v7  ;;  %v866_v30 = vor.u32 %v864_v20, %v862_v18  ;;  %v900_v34 = vshll.u32 %v2237_v25, 16  ;;  %1897 = vmatprep.subr.bf16.mxu1 %v1955_v27  ;;  %s2549_s26 = smov 16   ;;  %v1122_v37 = vrot.slane %v2185_v2, 5  ;;  %v1949_v8 = vld [vmem:[%s2090_s15 + $0x28] sm:$0xff]  }
  0x24   : > { %1876 = vmatpush3.bf16.msra.mxu0 %v1954_v15  ;;  %v943_v47 = vshll.u32 %v1944_v42, 16  ;;  %v941_v50 = vshrl.u32 %v1944_v42, 16  ;;  %v948_v52 = vshll.u32 %v1946_v48, 16  ;;  %v1008_v15 = vrot.slane %v864_v20, 4 }
  0x25   : > { %v863_v29 = vsel %vm851_vm0, %v858_v17, %v862_v18  ;;  %1877 = vmatprep.subr.bf16.mxu0 %v1955_v27  ;;  %v871_v35 = vsel %vm851_vm0, %v866_v30, %v2123_v22  ;;  %v902_v40 = vrot.slane %v900_v34, 1  ;;  %v2277_v41 = vsel %vm1120_vm2, %v1122_v37, %v1124_v62  ;;  %v1957_v22 = vld [vmem:[%s2534_s8 + $0x20] ss:$0 sps:$4 sm:$0xff]  }
  0x26   : > { %1038 = vrot.lane.b32.xlu0 %v1019_v53, %s2539_s28  ;;  %1902 = vmatpush3.bf16.msra.mxu1 %v1955_v27  ;;  %v1301_v46 = vsel %vm1299_vm3, %v1957_v22, 0  ;;  %v945_v51 = vrot.slane %v943_v47, 1  ;;  %v1945_v53 = vld [vmem:[%s2079_s27 + $0x28] sm:$0xff]   ;;  %v950_v58 = vrot.slane %v948_v52, 1  ;;  %v976_v62 = vshrl.u32 %v2128_v26, 16  ;;  %s2552_s27 = smov 40  }
  0x27   : > { %1040 = vrot.lane.b32.xlu1 %v1023_v0, %s2539_s28  ;;  %1898 = vmatprep.subr.bf16.mxu1 %v1956_v36  ;;  %v980_v63 = vshll.u32 %v1945_v53, 16  ;;  %v1951_v0 = vld [vmem:[%s617_s14] sm:$0xff]   ;;  %v1009_v17 = vrot.slane %v860_v9, 5  ;;  %v1050_v30 = vshll.u32 %v2196_v6, 16  ;;  %v1025_v20 = vrot.slane %v892_v24, 5  ;;  %s1795_s28 = sshll.u32 %s2557_s22, 2 }
  0x28   : > { %1878 = vmatpush3.bf16.msra.mxu0 %v1955_v27  ;;  %v946_v56 = vor.u32 %v945_v51, %v941_v50  ;;  %v978_v18 = vor.u32 %v976_v62, %v2148_v45  ;;  %v984_v27 = vshrl.u32 %v1945_v53, 16  ;;  %v1058_v9 = vshll.u32 %v2224_v16, 16  ;;  %s2477_s13 = scalar_lea.vmem %s2538_s12, %s1795_s28 }
  0x29   : > { %1879 = vmatprep.subr.bf16.mxu0 %v1956_v36 }
  0x2a   : > { %1112 = vrot.lane.b32.xlu0 %v1080_v61, %s1996_s19  ;;  %1903 = vmatpush3.bf16.msra.mxu1 %v1956_v36  ;;  %v952_v61 = vshrl.u32 %v1946_v48, 16 }
  0x2b   : > { %1114 = vrot.lane.b32.xlu1 %v1089_v5, %s1996_s19  ;;  %1906 = vmatprep.subr.msk.bf16.mxu1 %vm1299_vm3, %v1957_v22  ;;  %v1005_v5 = vrot.slane %v853_v7, 4  ;;  %v1047_v7 = vshrl.u32 %v2196_v6, 16 }
  0x2c   : > { %1880 = vmatpush3.bf16.msra.mxu0 %v1956_v36  ;;  %v954_v14 = vor.u32 %v952_v61, %v950_v58  ;;  %v1010_v36 = vor.u32 %v1009_v17, %v1008_v15 }
  0x2d   : > { %1905 = vmatprep.subr.msk.bf16.mxu0 %vm1299_vm3, %v1957_v22 }
  0x2e   : > { %1138 = vrot.lane.b32.xlu0 %v1127_v4, %s1997_s20  ;;  %1904 = vmatpush3.bf16.msra.mxu1 %v1301_v46  ;;  %v951_v4 = vsel %vm851_vm0, %v946_v56, %v950_v58  ;;  %v959_v45 = vsel %vm851_vm0, %v954_v14, %v2120_v21  ;;  %v1052_v21 = vrot.slane %v1050_v30, 5 }
  0x2f   : > { %839 = vrot.lane.b32.xlu1 %v2196_v6, %s1991_s17 }
  0x30   : > { %1882 = vmatpush3.bf16.msra.mxu0 %v1301_v46 }
  0x32   : > { %847 = vrot.lane.b32.xlu0 %v2132_v32, %s1991_s17  ;;  %v894_v32 = vrot.slane %v892_v24, 1 }
  0x33   : > { %1140 = vrot.lane.b32.xlu1 %v1129_v23, %s1997_s20  ;;  %v982_v23 = vrot.slane %v980_v63, 1 }
  0x34   : > { %v895_v38 = vsel %vm851_vm0, %v890_v31, %v894_v32  ;;  %v898_v39 = vor.u32 %v896_v33, %v894_v32  ;;  %v1055_v31 = vshrl.u32 %v2224_v16, 16 }
  0x35   : > { %v983_v6 = vsel %vm851_vm0, %v978_v18, %v982_v23 }
  0x36   : > { %841 = vrot.lane.b32.xlu0 %v2224_v16, %s1991_s17  ;;  %v903_v44 = vsel %vm851_vm0, %v898_v39, %v902_v40  ;;  %v1028_v39 = vshrl.u32 %v2237_v25, 16  ;;  %v1049_v16 = vrot.slane %v1047_v7, 4  ;;  %v1057_v22 = vrot.slane %v1055_v31, 4 }
  0x37   : > { %849 = vrot.lane.b32.xlu1 %v2246_v28, %s1991_s17 }
  0x38   : > { %v1030_v47 = vrot.slane %v1028_v39, 4  ;;  %v1053_v52 = vor.u32 %v1052_v21, %v1049_v16 }
  0x3a   : > { %904 = vrot.lane.b32.xlu0 %v863_v29, %s2549_s26  ;;  %v988_v29 = vshll.u32 %v1951_v0, 16  ;;  %v1121_v0 = vrot.slane %v2166_v60, 5 }
  0x3b   : > { %912 = vrot.lane.b32.xlu1 %v895_v38, %s2549_s26 }
  0x3c   : > { %v990_v38 = vrot.slane %v988_v29, 1 }
  0x3e   : > { %906 = vrot.lane.b32.xlu0 %v871_v35, %s2549_s26  ;;  %v986_v35 = vor.u32 %v984_v27, %v982_v23 }
  0x3f   : > { %914 = vrot.lane.b32.xlu1 %v903_v44, %s2549_s26  ;;  %v1094_v44 = vshll.u32 %v2246_v28, 16 }
  0x40   : > { %v991_v46 = vsel %vm851_vm0, %v986_v35, %v990_v38 }
  0x42   : > { %916 = vrot.lane.b32.xlu0 %v1944_v42, %s2550_s18  ;;  %v1060_v42 = vrot.slane %v1058_v9, 5 }
  0x43   : > { %924 = vrot.lane.b32.xlu1 %v2128_v26, %s2550_s18  ;;  %v1006_v26 = vrot.slane %v855_v3, 5  ;;  %v1024_v3 = vrot.slane %v896_v33, 4  ;;  %v1091_v33 = vshrl.u32 %v2246_v28, 16  ;;  %v1015_v28 = vsel %vm1004_vm1, %v1010_v36, %v2144_v43 }
  0x45   : > { %v1007_v32 = vor.u32 %v1006_v26, %v1005_v5  ;;  %v1026_v24 = vor.u32 %v1025_v20, %v1024_v3  ;;  %v1093_v50 = vrot.slane %v1091_v33, 4  ;;  %v1130_v26 = vrot.slane %v2213_v11, 5 }
  0x46   : > { %918 = vrot.lane.b32.xlu0 %v1946_v48, %s2550_s18  ;;  %v1031_v48 = vrot.slane %v900_v34, 5  ;;  %v1096_v34 = vrot.slane %v1094_v44, 5 }
  0x47   : > { %926 = vrot.lane.b32.xlu1 %v1945_v53, %s2550_s18  ;;  %v1011_v40 = vsel %vm1004_vm1, %v1007_v32, %v1010_v36  ;;  %v1027_v51 = vsel %vm1004_vm1, %v2162_v57, %v1026_v24  ;;  %v1061_v53 = vor.u32 %v1060_v42, %v1057_v22 }
  0x48   : > { %v1097_v62 = vor.u32 %v1096_v34, %v1093_v50 }
  0x49   : > { %v1071_v43 = vsel %vm1004_vm1, %v1061_v53, %v2158_v54  ;;  %v1998_v54 = vmov 0  }
  0x4a   : > { %928 = vrot.lane.b32.xlu0 %v1948_v49, %s2551_s7  ;;  %v1952_v49 = vld [vmem:[%s601_s25] sm:$0xff]   ;;  %1925 = vset.pattern.permute.xlu1 %v1998_v54  ;;  %s1794_s25 = sshll.u32 %s2557_s22, 3 }
  0x4b   : > { %936 = vrot.lane.b32.xlu1 %v1947_v59, %s2551_s7  ;;  %v1100_v56 = vshrl.u32 %v1952_v49, 16  ;;  %v1103_v58 = vshll.u32 %v1952_v49, 16  ;;  %v1062_v59 = vsel %vm1004_vm1, %v1053_v52, %v1061_v53  ;;  %1924 = vset.pattern.permute.xlu0 %v1998_v54  ;;  %s641_s24 = scalar_lea.vmem %s2537_s11, %s1794_s25 }
  0x4c   : > { %v1482_v15 = vld [vmem:[%s641_s24] sm:$0xff]  ;;  %v1485_v18 = vld [vmem:[%s641_s24 + $0x18] sm:$0xff]  ;;  %v1483_v23 = vld [vmem:[%s641_s24 + $0x8] sm:$0xff] }
  0x4d   : > { %v1102_v57 = vrot.slane %v1100_v56, 4  ;;  %v1105_v63 = vrot.slane %v1103_v58, 5  ;;  %v1486_v27 = vld [vmem:[%s641_s24 + $0x20] sm:$0xff]  ;;  %v1491_v29 = vld [vmem:[%s641_s24 + $0x48] sm:$0xff]  ;;  %v1488_v7 = vld [vmem:[%s641_s24 + $0x30] sm:$0xff] }
  0x4e   : > { %930 = vrot.lane.b32.xlu0 %v1950_v55, %s2551_s7  ;;  %v1032_v55 = vor.u32 %v1031_v48, %v1030_v47  ;;  %v1493_v30 = vld [vmem:[%s641_s24 + $0x58] sm:$0xff]  ;;  %v1490_v3 = vld [vmem:[%s641_s24 + $0x40] sm:$0xff] }
  0x4f   : > { %938 = vrot.lane.b32.xlu1 %v1949_v8, %s2551_s7  ;;  %v1106_v5 = vor.u32 %v1105_v63, %v1102_v57  ;;  %v1123_v8 = vsel %vm1120_vm2, %v1121_v0, %v1122_v37  ;;  %v1132_v37 = vrot.slane %v2237_v25, 5  ;;  %v1484_v25 = vld [vmem:[%s641_s24 + $0x10] sm:$0xff] }
  0x50   : > { %v1033_v61 = vsel %vm1004_vm1, %v1026_v24, %v1032_v55 }
  0x51   : > { %v1107_v14 = vsel %vm1004_vm1, %v1097_v62, %v1106_v5  ;;  %v1133_v17 = vsel %vm1120_vm2, %v1130_v26, %v1132_v37 }
  0x52   : > { %992 = vrot.lane.b32.xlu0 %v951_v4, %s2552_s27  ;;  %v1098_v4 = vsel %vm1004_vm1, %v2175_v1, %v1097_v62  ;;  %v1131_v1 = vsel %vm1120_vm2, %v1128_v10, %v1130_v26  ;;  %v1487_v10 = vld [vmem:[%s641_s24 + $0x28] sm:$0xff] }
  0x53   : > { %1000 = vrot.lane.b32.xlu1 %v983_v6, %s2552_s27 }
  0x56   : > { %994 = vrot.lane.b32.xlu0 %v959_v45, %s2552_s27  ;;  %v1492_v45 = vld [vmem:[%s641_s24 + $0x50] sm:$0xff] }
  0x57   : > { %1002 = vrot.lane.b32.xlu1 %v991_v46, %s2552_s27 }
  0x5a   : > { %1034 = vrot.lane.b32.xlu0 %v1011_v40, %s2553_s23 }
  0x5b   : > { %1042 = vrot.lane.b32.xlu1 %v1027_v51, %s2553_s23 }
  0x5e   : > { %1036 = vrot.lane.b32.xlu0 %v1015_v28, %s2553_s23 }
  0x5f   : > { %1044 = vrot.lane.b32.xlu1 %v1033_v61, %s2553_s23 }
  0x62   : > { %1108 = vrot.lane.b32.xlu0 %v1062_v59, %s1996_s19 }
  0x63   : > { %1116 = vrot.lane.b32.xlu1 %v1098_v4, %s1996_s19 }
  0x66   : > { %1110 = vrot.lane.b32.xlu0 %v1071_v43, %s1996_s19 }
  0x67   : > { %1118 = vrot.lane.b32.xlu1 %v1107_v14, %s1996_s19 }
  0x6a   : > { %1134 = vrot.lane.b32.xlu0 %v1123_v8, %s1997_s20 }
  0x6b   : > { %1142 = vrot.lane.b32.xlu1 %v1131_v1, %s1997_s20 }
  0x6e   : > { %1136 = vrot.lane.b32.xlu0 %v2277_v41, %s1997_s20  ;;  %v1489_v41 = vld [vmem:[%s641_s24 + $0x38] sm:$0xff] }
  0x6f   : > { %1144 = vrot.lane.b32.xlu1 %v1133_v17, %s1997_s20 }
  0x72   : > { %1496 = vperm.xlu0 %1924, %v1482_v15  }
  0x73   : > { %1501 = vperm.xlu1 %1925, %v1483_v23  }
  0x76   : > { %1511 = vperm.xlu0 %1924, %v1485_v18  }
  0x77   : > { %1506 = vperm.xlu1 %1925, %v1484_v25  }
  0x7a   : > { %1521 = vperm.xlu0 %1924, %v1487_v10  }
  0x7b   : > { %1516 = vperm.xlu1 %1925, %v1486_v27  }
  0x7e   : > { %1531 = vperm.xlu0 %1924, %v1489_v41  }
  0x7f   : > { %1526 = vperm.xlu1 %1925, %v1488_v7  }
  0x82   : > { %1541 = vperm.xlu0 %1924, %v1491_v29  }
  0x83   : > { %1536 = vperm.xlu1 %1925, %v1490_v3  }
  0x84   : > { %v844_v31 = vpop.permute.xlu0 %843  ;;  %v923_v20 = vpop.permute.xlu1 %922 }
  0x85   : > { %v1152_v33 = vsel %vm1146_vm4, %v2108_v12, %v844_v31 }
  0x86   : > { %1551 = vperm.xlu0 %1924, %v1493_v30  }
  0x87   : > { %1546 = vperm.xlu1 %1925, %v1492_v45  }
  0x88   : > { %v846_v9 = vpop.permute.xlu0 %845  ;;  %v935_v32 = vpop.permute.xlu1 %934 }
  0x89   : > { %v1154_v42 = vsel %vm1146_vm4, %v2111_v13, %v846_v9 }
  0x8c   : > { %v921_v36 = vpop.permute.xlu0 %920 }
  0x8d   : > { %v909_v35 = vpop.permute.xlu1 %908 }
  0x8e   : > { %v1165_v16 = vsel %vm1159_vm5, %v1152_v33, %v909_v35 }
  0x8f   : > { %v1178_v21 = vsel %vm1172_vm6, %v1165_v16, %v921_v36 }
  0x90   : > { %v933_v6 = vpop.permute.xlu0 %932 }
  0x91   : > { %v911_v39 = vpop.permute.xlu1 %910  ;;  %v1191_v44 = vsel %vm1185_vm7, %v1178_v21, %v933_v6 }
  0x92   : > { %v1167_v12 = vsel %vm1159_vm5, %v1154_v42, %v911_v39 }
  0x93   : > { %v1180_v51 = vsel %vm1172_vm6, %v1167_v12, %v923_v20 }
  0x94   : > { %v997_v38 = vpop.permute.xlu0 %996  ;;  %v1193_v52 = vsel %vm1185_vm7, %v1180_v51, %v935_v32 }
  0x95   : > { %v999_v40 = vpop.permute.xlu1 %998  ;;  %v1204_v47 = vsel %vm1198_vm8, %v1191_v44, %v997_v38 }
  0x96   : > { %v1206_v34 = vsel %vm1198_vm8, %v1193_v52, %v999_v40 }
  0x98   : > { %v1039_v24 = vpop.permute.xlu0 %1038 }
  0x99   : > { %v1041_v46 = vpop.permute.xlu1 %1040  ;;  %v1217_v48 = vsel %vm1211_vm9, %v1204_v47, %v1039_v24 }
  0x9a   : > { %v1219_v56 = vsel %vm1211_vm9, %v1206_v34, %v1041_v46 }
  0x9c   : > { %v1113_v22 = vpop.permute.xlu0 %1112 }
  0x9d   : > { %v1230_v49 = vsel %vm1224_vm10, %v1217_v48, %v1113_v22  ;;  %v1115_v28 = vpop.permute.xlu1 %1114 }
  0x9e   : > { %v1232_v59 = vsel %vm1224_vm10, %v1219_v56, %v1115_v28 }
  0xa0   : > { %v1139_v50 = vpop.permute.xlu0 %1138 }
  0xa1   : > { %v1243_v13 = vsel %vm1237_vm11, %v1230_v49, %v1139_v50  ;;  %v840_v55 = vpop.permute.xlu1 %839 }
  0xa2   : > { %1887 = vmatprep.mubr.msk.bf16.mxu1 %vm1286_vm12, %v1243_v13  ;;  %v1148_v16 = vsel %vm1146_vm4, %v2166_v60, %v840_v55 }
  0xa4   : > { %v848_v53 = vpop.permute.xlu0 %847 }
  0xa5   : > { %v1141_v61 = vpop.permute.xlu1 %1140  ;;  %v1156_v4 = vsel %vm1146_vm4, %v2117_v19, %v848_v53 }
  0xa6   : > { %v1245_v62 = vsel %vm1237_vm11, %v1232_v59, %v1141_v61  ;;  %v2450_v59 = vld [vmem:[%s2535_s9] ss:$0 sm:$0xff] }
  0xa7   : > { %1888 = vmatmul.mubr.msk.bf16.vlgmr.msra.gmra.mrb[0].mxu1 %vm1286_vm12, %v1245_v62  ;;  %v2455_v62 = vld [vmem:[%s2536_s10] ss:$0 sm:$0xff] }
  0xa8   : > { %v842_v58 = vpop.permute.xlu0 %841 }
  0xa9   : > { %v850_v63 = vpop.permute.xlu1 %849  ;;  %v1150_v43 = vsel %vm1146_vm4, %v2185_v2, %v842_v58 }
  0xaa   : > { %v1158_v54 = vsel %vm1146_vm4, %v2213_v11, %v850_v63 }
  0xac   : > { %v905_v57 = vpop.permute.xlu0 %904 }
  0xad   : > { %v913_v5 = vpop.permute.xlu1 %912  ;;  %v1161_v21 = vsel %vm1159_vm5, %v1148_v16, %v905_v57 }
  0xae   : > { %v1169_v14 = vsel %vm1159_vm5, %v1156_v4, %v913_v5 }
  0xb0   : > { %v907_v0 = vpop.permute.xlu0 %906 }
  0xb1   : > { %v1163_v8 = vsel %vm1159_vm5, %v1150_v43, %v907_v0  ;;  %v915_v1 = vpop.permute.xlu1 %914 }
  0xb2   : > { %v1171_v37 = vsel %vm1159_vm5, %v1158_v54, %v915_v1 }
  0xb4   : > { %v917_v26 = vpop.permute.xlu0 %916 }
  0xb5   : > { %v925_v17 = vpop.permute.xlu1 %924  ;;  %v1174_v22 = vsel %vm1172_vm6, %v1161_v21, %v917_v26 }
  0xb6   : > { %v1182_v18 = vsel %vm1172_vm6, %v1169_v14, %v925_v17 }
  0xb8   : > { %v919_v15 = vpop.permute.xlu0 %918 }
  0xb9   : > { %v1176_v2 = vsel %vm1172_vm6, %v1163_v8, %v919_v15  ;;  %v927_v19 = vpop.permute.xlu1 %926 }
  0xba   : > { %v1184_v10 = vsel %vm1172_vm6, %v1171_v37, %v927_v19 }
  0xbc   : > { %v929_v23 = vpop.permute.xlu0 %928 }
  0xbd   : > { %v937_v41 = vpop.permute.xlu1 %936  ;;  %v1187_v44 = vsel %vm1185_vm7, %v1174_v22, %v929_v23 }
  0xbe   : > { %v1195_v29 = vsel %vm1185_vm7, %v1182_v18, %v937_v41 }
  0xc0   : > { %v931_v25 = vpop.permute.xlu0 %930 }
  0xc1   : > { %v1189_v27 = vsel %vm1185_vm7, %v1176_v2, %v931_v25  ;;  %v939_v7 = vpop.permute.xlu1 %938 }
  0xc2   : > { %v1197_v30 = vsel %vm1185_vm7, %v1184_v10, %v939_v7 }
  0xc4   : > { %v993_v11 = vpop.permute.xlu0 %992 }
  0xc5   : > { %v1001_v3 = vpop.permute.xlu1 %1000  ;;  %v1200_v12 = vsel %vm1198_vm8, %v1187_v44, %v993_v11 }
  0xc6   : > { %v1208_v9 = vsel %vm1198_vm8, %v1195_v29, %v1001_v3 }
  0xc8   : > { %v995_v31 = vpop.permute.xlu0 %994 }
  0xc9   : > { %v1202_v20 = vsel %vm1198_vm8, %v1189_v27, %v995_v31  ;;  %v1003_v32 = vpop.permute.xlu1 %1002 }
  0xca   : > { %v1210_v36 = vsel %vm1198_vm8, %v1197_v30, %v1003_v32 }
  0xcc   : > { %v1035_v45 = vpop.permute.xlu0 %1034 }
  0xcd   : > { %v1043_v35 = vpop.permute.xlu1 %1042  ;;  %v1213_v47 = vsel %vm1211_vm9, %v1200_v12, %v1035_v45 }
  0xce   : > { %v1221_v39 = vsel %vm1211_vm9, %v1208_v9, %v1043_v35 }
  0xd0   : > { %v1037_v6 = vpop.permute.xlu0 %1036 }
  0xd1   : > { %v1215_v38 = vsel %vm1211_vm9, %v1202_v20, %v1037_v6  ;;  %v1045_v24 = vpop.permute.xlu1 %1044 }
  0xd2   : > { %v1223_v40 = vsel %vm1211_vm9, %v1210_v36, %v1045_v24 }
  0xd4   : > { %v1109_v33 = vpop.permute.xlu0 %1108 }
  0xd5   : > { %v1117_v46 = vpop.permute.xlu1 %1116  ;;  %v1226_v48 = vsel %vm1224_vm10, %v1213_v47, %v1109_v33 }
  0xd6   : > { %v1234_v13 = vsel %vm1224_vm10, %v1221_v39, %v1117_v46 }
  0xd8   : > { %v1111_v42 = vpop.permute.xlu0 %1110 }
  0xd9   : > { %v1119_v50 = vpop.permute.xlu1 %1118  ;;  %v1228_v51 = vsel %vm1224_vm10, %v1215_v38, %v1111_v42 }
  0xda   : > { %v1236_v34 = vsel %vm1224_vm10, %v1223_v40, %v1119_v50 }
  0xdc   : > { %v1135_v49 = vpop.permute.xlu0 %1134 }
  0xdd   : > { %v1239_v60 = vsel %vm1237_vm11, %v1226_v48, %v1135_v49  ;;  %v1143_v52 = vpop.permute.xlu1 %1142 }
  0xde   : > { %1883 = vmatprep.mubr.msk.bf16.mxu0 %vm1286_vm12, %v1239_v60  ;;  %v1247_v55 = vsel %vm1237_vm11, %v1234_v13, %v1143_v52 }
  0xdf   : > { %1891 = vmatprep.mubr.msk.bf16.mxu1 %vm1286_vm12, %v1247_v55 }
  0xe0   : > { %v1137_v28 = vpop.permute.xlu0 %1136 }
  0xe1   : > { %v1241_v53 = vsel %vm1237_vm11, %v1228_v51, %v1137_v28  ;;  %v1145_v56 = vpop.permute.xlu1 %1144 }
  0xe2   : > { %1884 = vmatmul.mubr.msk.bf16.vlgmr.msra.gmra.mrb[0].mxu0 %vm1286_vm12, %v1241_v53  ;;  %v1249_v58 = vsel %vm1237_vm11, %v1236_v34, %v1145_v56 }
  0xe3   : > { %1892 = vmatmul.mubr.msk.bf16.gmra.mrb[4].mxu1 %vm1286_vm12, %v1249_v58 }
  0xf1   : > { %v2463_v26 = vpop.permute.xlu0 %1496 }
  0xf2   : > { %v2458_v43 = vpop.permute.xlu1 %1501 }
  0xf5   : > { %v2471_v10 = vpop.permute.xlu0 %1511 }
  0xf6   : > { %v2469_v23 = vpop.permute.xlu1 %1506 }
  0xf9   : > { %v1522_v41 = vpop.permute.xlu0 %1521 }
  0xfa   : > { %v1517_v25 = vpop.permute.xlu1 %1516 }
  0xfd   : > { %v1532_v39 = vpop.permute.xlu0 %1531 }
  0xfe   : > { %v1527_v20 = vpop.permute.xlu1 %1526 }
 0x17a   : > { %v1889_v61 = vpop.f32.mrb[0].mxu1 }
 0x17b   : > { %v1397_v57 = vmul.f32 %v1889_v61, %v2450_v59  ;;  %v1353_v63 = vpop.f32.mrb[1].mxu1 }
 0x17c   : > { %v1395_v0 = vmul.f32 %v2450_v59, %v1353_v63  ;;  %v1890_v4 = vpop.f32.mrb[2].mxu1 }
 0x17d   : > { %v1416_v5 = vadd.f32 %v2455_v62, %v1397_v57  ;;  %v1398_v8 = vmul.f32 %v1890_v4, %v2450_v59  ;;  %v1356_v14 = vpop.f32.mrb[3].mxu1 }
 0x17e   : > { %v1414_v54 = vadd.f32 %v2455_v62, %v1395_v0  ;;  %v1396_v1 = vmul.f32 %v2450_v59, %v1356_v14 }
 0x17f   : > { %v1440_v37 = vmul.f32 0.70710677, %v1416_v5  ;;  %v1417_v15 = vadd.f32 %v2455_v62, %v1398_v8  ;;  %v1428_v11 = vmul.f32 0.5, %v1416_v5 }
 0x180   : > { %v1438_v17 = vmul.f32 0.70710677, %v1414_v54  ;;  %v1415_v2 = vadd.f32 %v2455_v62, %v1396_v1  ;;  %v1426_v31 = vmul.f32 0.5, %v1414_v54 }
 0x181   : > { %1958 = verf.f32 %v1440_v37  ;;  %v1441_v18 = vmul.f32 0.70710677, %v1417_v15  ;;  %v1429_v32 = vmul.f32 0.5, %v1417_v15 }
 0x182   : > { %1960 = verf.f32 %v1438_v17  ;;  %v1439_v19 = vmul.f32 0.70710677, %v1415_v2  ;;  %v1427_v35 = vmul.f32 0.5, %v1415_v2 }
 0x183   : > { %1962 = verf.f32 %v1441_v18 }
 0x184   : > { %1964 = verf.f32 %v1439_v19 }
 0x18b   : > { %v1959_v27 = vpop.eup %1958 }
 0x18c   : > { %v1961_v29 = vpop.eup %1960  ;;  %v1464_v7 = vadd.f32 1.0, %v1959_v27 }
 0x18d   : > { %v1963_v30 = vpop.eup %1962  ;;  %v1462_v3 = vadd.f32 1.0, %v1961_v29 }
 0x18e   : > { %v1965_v9 = vpop.eup %1964  ;;  %v1476_v45 = vmul.f32 %v1464_v7, %v1428_v11  ;;  %v1465_v36 = vadd.f32 1.0, %v1963_v30 }
 0x18f   : > { %v1474_v6 = vmul.f32 %v1462_v3, %v1426_v31  ;;  %v1463_v38 = vadd.f32 1.0, %v1965_v9  ;;  %v1537_v3 = vpop.permute.xlu1 %1536 }
 0x190   : > { %v1560_v33 = vmul.f32 %v1527_v20, %v1476_v45  ;;  %v1477_v24 = vmul.f32 %v1465_v36, %v1429_v32 }
 0x191   : > { %v1558_v16 = vmul.f32 %v1517_v25, %v1474_v6  ;;  %v1475_v40 = vmul.f32 %v1463_v38, %v1427_v35  ;;  %v1542_v38 = vpop.permute.xlu0 %1541 }
 0x192   : > { %v1856_v21 = vpack.c.bf16 %v1560_v33, %v1560_v33  ;;  %v1561_v22 = vmul.f32 %v1532_v39, %v1477_v24 }
 0x193   : > { %v1854_v42 = vpack.c.bf16 %v1558_v16, %v1558_v16  ;;  %v1559_v44 = vmul.f32 %v1522_v41, %v1475_v40 }
 0x194   : > { %1621 = vst.msk [vmem:[%s2477_s13 + $0x18] sm:$0xf] %vm1614_vm13, %v1856_v21  ;;  %v1857_v46 = vpack.c.bf16 %v1561_v22, %v1561_v22 }
 0x195   : > { %1619 = vst.msk [vmem:[%s2477_s13 + $0x10] sm:$0xf] %vm1614_vm13, %v1854_v42  ;;  %v1855_v12 = vpack.c.bf16 %v1559_v44, %v1559_v44 }
 0x196   : > { %1622 = vst.msk [vmem:[%s2477_s13 + $0x1c] sm:$0xf] %vm1614_vm13, %v1857_v46 }
 0x197   : > { %1620 = vst.msk [vmem:[%s2477_s13 + $0x14] sm:$0xf] %vm1614_vm13, %v1855_v12 }
 0x1b5   : > { %v1885_v47 = vpop.f32.mrb[0].mxu0 }
 0x1b6   : > { %v1393_v48 = vmul.f32 %v1885_v47, %v2450_v59  ;;  %v1337_v49 = vpop.f32.mrb[1].mxu0  ;;  %v1893_v55 = vpop.f32.mrb[4].mxu1 }
 0x1b7   : > { %v1391_v50 = vmul.f32 %v2450_v59, %v1337_v49  ;;  %v1886_v60 = vpop.f32.mrb[2].mxu0  ;;  %v1401_v58 = vmul.f32 %v1893_v55, %v2450_v59  ;;  %v1369_v57 = vpop.f32.mrb[5].mxu1 }
 0x1b8   : > { %v1412_v51 = vadd.f32 %v2455_v62, %v1393_v48  ;;  %v1394_v28 = vmul.f32 %v1886_v60, %v2450_v59  ;;  %v1340_v13 = vpop.f32.mrb[3].mxu0  ;;  %v1399_v0 = vmul.f32 %v2450_v59, %v1369_v57  ;;  %v1894_v5 = vpop.f32.mrb[6].mxu1 }
 0x1b9   : > { %v1410_v52 = vadd.f32 %v2455_v62, %v1391_v50  ;;  %v1392_v53 = vmul.f32 %v2450_v59, %v1340_v13  ;;  %v1420_v8 = vadd.f32 %v2455_v62, %v1401_v58  ;;  %v1402_v14 = vmul.f32 %v1894_v5, %v2450_v59  ;;  %v1372_v54 = vpop.f32.mrb[7].mxu1 }
 0x1ba   : > { %v1436_v34 = vmul.f32 0.70710677, %v1412_v51  ;;  %v1413_v56 = vadd.f32 %v2455_v62, %v1394_v28  ;;  %v1418_v1 = vadd.f32 %v2455_v62, %v1399_v0  ;;  %v1400_v15 = vmul.f32 %v2450_v59, %v1372_v54 }
 0x1bb   : > { %v1434_v61 = vmul.f32 0.70710677, %v1410_v52  ;;  %v1411_v63 = vadd.f32 %v2455_v62, %v1392_v53  ;;  %v1444_v17 = vmul.f32 0.70710677, %v1420_v8  ;;  %v1421_v2 = vadd.f32 %v2455_v62, %v1402_v14  ;;  %v1547_v53 = vpop.permute.xlu1 %1546 }
 0x1bc   : > { %1966 = verf.f32 %v1436_v34  ;;  %v1437_v4 = vmul.f32 0.70710677, %v1413_v56  ;;  %v1442_v18 = vmul.f32 0.70710677, %v1418_v1  ;;  %v1419_v19 = vadd.f32 %v2455_v62, %v1400_v15 }
 0x1bd   : > { %1968 = verf.f32 %v1434_v61  ;;  %v1435_v37 = vmul.f32 0.70710677, %v1411_v63  ;;  %v1445_v25 = vmul.f32 0.70710677, %v1421_v2  ;;  %v1424_v11 = vmul.f32 0.5, %v1412_v51  ;;  %v1552_v61 = vpop.permute.xlu0 %1551 }
 0x1be   : > { %1970 = verf.f32 %v1437_v4  ;;  %v1443_v41 = vmul.f32 0.70710677, %v1419_v19  ;;  %v1422_v31 = vmul.f32 0.5, %v1410_v52  ;;  %v1425_v9 = vmul.f32 0.5, %v1413_v56 }
 0x1bf   : > { %1972 = verf.f32 %v1435_v37  ;;  %v1423_v62 = vmul.f32 0.5, %v1411_v63  ;;  %v1432_v24 = vmul.f32 0.5, %v1420_v8  ;;  %v1430_v21 = vmul.f32 0.5, %v1418_v1 }
 0x1c0   : > { %1974 = verf.f32 %v1444_v17  ;;  %v1433_v42 = vmul.f32 0.5, %v1421_v2  ;;  %v1431_v50 = vmul.f32 0.5, %v1419_v19 }
 0x1c1   : > { %1976 = verf.f32 %v1442_v18 }
 0x1c2   : > { %1978 = verf.f32 %v1445_v25 }
 0x1c3   : > { %1980 = verf.f32 %v1443_v41 }
 0x1c6   : > { %v1967_v27 = vpop.eup %1966 }
 0x1c7   : > { %v1969_v29 = vpop.eup %1968  ;;  %v1460_v7 = vadd.f32 1.0, %v1967_v27 }
 0x1c8   : > { %v1971_v30 = vpop.eup %1970  ;;  %v1458_v59 = vadd.f32 1.0, %v1969_v29 }
 0x1c9   : > { %v1472_v20 = vmul.f32 %v1460_v7, %v1424_v11  ;;  %v1461_v45 = vadd.f32 1.0, %v1971_v30  ;;  %v1973_v32 = vpop.eup %1972 }
 0x1ca   : > { %v1470_v36 = vmul.f32 %v1458_v59, %v1422_v31  ;;  %v1975_v6 = vpop.eup %1974  ;;  %v1459_v33 = vadd.f32 1.0, %v1973_v32 }
 0x1cb   : > { %v1556_v35 = vmul.f32 %v2469_v23, %v1472_v20  ;;  %v1473_v39 = vmul.f32 %v1461_v45, %v1425_v9  ;;  %v1977_v16 = vpop.eup %1976  ;;  %v1468_v22 = vadd.f32 1.0, %v1975_v6 }
 0x1cc   : > { %v1554_v40 = vmul.f32 %v2463_v26, %v1470_v36  ;;  %v1979_v44 = vpop.eup %1978  ;;  %v1466_v12 = vadd.f32 1.0, %v1977_v16  ;;  %v1471_v48 = vmul.f32 %v1459_v33, %v1423_v62 }
 0x1cd   : > { %v1852_v46 = vpack.c.bf16 %v1556_v35, %v1556_v35  ;;  %v1557_v47 = vmul.f32 %v2471_v10, %v1473_v39  ;;  %v1981_v23 = vpop.eup %1980  ;;  %v1480_v60 = vmul.f32 %v1468_v22, %v1432_v24  ;;  %v1469_v51 = vadd.f32 1.0, %v1979_v44 }
 0x1ce   : > { %v1850_v49 = vpack.c.bf16 %v1554_v40, %v1554_v40  ;;  %v1478_v28 = vmul.f32 %v1466_v12, %v1430_v21  ;;  %v1555_v13 = vmul.f32 %v2458_v43, %v1471_v48  ;;  %v1467_v52 = vadd.f32 1.0, %v1981_v23 }
 0x1cf   : > { %1617 = vst.msk [vmem:[%s2477_s13 + $0x8] sm:$0xf] %vm1614_vm13, %v1852_v46  ;;  %v1853_v26 = vpack.c.bf16 %v1557_v47, %v1557_v47  ;;  %v1564_v10 = vmul.f32 %v1547_v53, %v1480_v60  ;;  %v1481_v55 = vmul.f32 %v1469_v51, %v1433_v42 }
 0x1d0   : > { %1615 = vst.msk [vmem:[%s2477_s13] sm:$0xf] %vm1614_vm13, %v1850_v49  ;;  %v1562_v34 = vmul.f32 %v1537_v3, %v1478_v28  ;;  %v1851_v56 = vpack.c.bf16 %v1555_v13, %v1555_v13  ;;  %v1479_v58 = vmul.f32 %v1467_v52, %v1431_v50 }
 0x1d1   : > { %1618 = vst.msk [vmem:[%s2477_s13 + $0xc] sm:$0xf] %vm1614_vm13, %v1853_v26  ;;  %v1860_v57 = vpack.c.bf16 %v1564_v10, %v1564_v10  ;;  %v1565_v63 = vmul.f32 %v1552_v61, %v1481_v55 }
 0x1d2   : > { %v1858_v0 = vpack.c.bf16 %v1562_v34, %v1562_v34  ;;  %1616 = vst.msk [vmem:[%s2477_s13 + $0x4] sm:$0xf] %vm1614_vm13, %v1851_v56  ;;  %v1563_v43 = vmul.f32 %v1542_v38, %v1479_v58 }
 0x1d3   : > { %1625 = vst.msk [vmem:[%s2477_s13 + $0x28] sm:$0xf] %vm1614_vm13, %v1860_v57  ;;  %v1861_v4 = vpack.c.bf16 %v1565_v63, %v1565_v63 }
 0x1d4   : > { %1623 = vst.msk [vmem:[%s2477_s13 + $0x20] sm:$0xf] %vm1614_vm13, %v1858_v0  ;;  %v1859_v5 = vpack.c.bf16 %v1563_v43, %v1563_v43 }
 0x1d5   : > { %1626 = vst.msk [vmem:[%s2477_s13 + $0x2c] sm:$0xf] %vm1614_vm13, %v1861_v4 }
 0x1d6   : > { %1624 = vst.msk [vmem:[%s2477_s13 + $0x24] sm:$0xf] %vm1614_vm13, %v1859_v5 }
 0x1d7 PF: > { %s22_s21 = sadd.s32 1, %s1988_s21  }
 0x1d8   : > { %p19_p6 = scmp.ge.s32.totalorder %s22_s21, 4  }
 0x1da   :  { %21 = sbr.rel (!%p19_p6) target bundleno = 1 (0x1), region = 122 }

// kernel: stem_forward.5
= control target key start
LH: loop header
LB: loop body
LE: loop exit
PB: predicated region body
PF: predicated region fallthrough
CT: control target
= control target key end

     0   :  { %s1692_s21 = smov 0   ;;  %s2450_s0 = inlined_call_operand.vmem [shape: bf16[384,8], index: 0, kind: input, shape index: {}, may-alias: {0,1}]   ;;  %s2451_s1 = inlined_call_operand.vmem [shape: bf16[384,8], index: 1, kind: input, shape index: {}, may-alias: {0,1}]   ;;  %s2452_s2 = inlined_call_operand.vmem [shape: bf16[72,8], index: 2, kind: input, shape index: {}]   ;;  %s2453_s3 = inlined_call_operand.vmem [shape: f32[1,8], index: 3, kind: input, shape index: {}]   ;;  %s2454_s4 = inlined_call_operand.vmem [shape: f32[1,8], index: 4, kind: input, shape index: {}]   ;;  %s2455_s5 = inlined_call_operand.vmem [shape: f32[256,1], index: 5, kind: input, shape index: {}]   ;;  %s2456_s6 = inlined_call_operand.vmem [shape: bf16[256,8], index: 6, kind: output, shape index: {}]  }
   0x1 LB: > { %s1439_s22 = sadd.s32 4294967295, %s1646_s21   ;;  %p1445_p0 = scmp.ge.s32.totalorder %s1646_s21, 1  ;;  %s1646_s21 = sphi %s1692_s21, %s16_s21  }
   0x2   : > { %p243_p1 = scmp.lt.s32.totalorder %s1646_s21, 3 }
   0x4   : > { %p244_p2 = pnand %p1445_p0, %p243_p1 }
   0x5   : > { %s1700_s23 = sshll.u32 (!%p244_p2), %s1439_s22, 4  ;;  %vm469_vm0 = vcmask (!%p244_p2), 1046528   ;;  %vm503_vm1 = vcmask (!%p244_p2), 1042432   ;;  %s1648_s30 = smov (!%p244_p2), 16   ;;  %vm384_vm2 = vsmask.f32 (!%p244_p2), 7424 }
   0x6   : > { %247 = sbr.rel (%p244_p2) target bundleno = 507 (0x1fb), region = 44  ;;  %p286_p3 = scmp.lt.s32.totalorder (!%p244_p2), %s1700_s23, 47  ;;  %vm537_vm3 = vsmask.f32 (!%p244_p2), 2304  ;;  %vm591_vm4 = vcmask (!%p244_p2), 1041408   ;;  %vm625_vm5 = vcmask (!%p244_p2), 1045504  }
   0x7   : > { %s1522_s29 = sadd.s32 (!%p244_p2), 16, %s1700_s23  ;;  %s1649_s11 = smov (!%p244_p2), 24   ;;  %vm659_vm6 = vsmask.f32 (!%p244_p2), 5376  ;;  %vm716_vm7 = vcmask (!%p244_p2), 1044480   ;;  %vm939_vm8 = vcmask (!%p244_p2), 1043456  }
   0x8   : > { %p294_p4 = scmp.lt.s32.totalorder (!%p244_p2), %s1522_s29, 47  ;;  %s1650_s12 = smov (!%p244_p2), 8   ;;  %vm750_vm9 = vcmask (!%p244_p2), 64512   ;;  %vm767_vm10 = vcmask (!%p244_p2), 130048   ;;  %vm801_vm11 = vcmask (!%p244_p2), 261120   ;;  %vm784_vm12 = vcmask (!%p244_p2), 195584  }
   0x9   : > { %s1651_s13 = smov (!%p244_p2), 32   ;;  %s1652_s14 = smov (!%p244_p2), 40   ;;  %vm818_vm13 = vcmask (!%p244_p2), 326656   ;;  %vm835_vm14 = vcmask (!%p244_p2), 392192   ;;  %vm852_vm15 = vcmask (!%p244_p2), 457728  }
   0xa   : > { %s1653_s19 = smov (!%p244_p2), 48   ;;  %s1654_s26 = smov (!%p244_p2), 56  }
   0xb   : > { %p302_p5 = scmp.lt.s32.totalorder (!%p244_p2), %s1700_s23, 31 }
   0xd   : > { %s287_s24 = scalar_select %p286_p3, %s1700_s23, 47 }
   0xe   : > { %s2470_s29 = smov (!%p294_p4, %s1522_s29), 47  ;;  %s2472_s23 = smov (!%p302_p5, %s1700_s23), 31 }
   0xf   : > { %s1447_s25 = sshll.u32 %s287_s24, 2  ;;  %s1450_s7 = sshll.u32 %s2470_s29, 2 }
  0x10   : > { %s1707_s28 = scalar_lea.vmem %s2450_s0, %s1447_s25  ;;  %s1796_s10 = scalar_lea.vmem %s2451_s1, %s1450_s7 }
  0x11   : > { %v1710_v0 = vld [vmem:[%s1707_s28 + $0x20] sm:$0xff]   ;;  %v1713_v1 = vld [vmem:[%s1707_s28 + $0x28] sm:$0xff]   ;;  %v1725_v6 = vld [vmem:[%s1707_s28 + $0x30] sm:$0xff]   ;;  %s1655_s29 = smov 64  }
  0x12   : > { %v477_v2 = vrot.slane %v1710_v0, 1  ;;  %v479_v3 = vrot.slane %v1713_v1, 1  ;;  %v1719_v4 = vld [vmem:[%s1707_s28] sm:$0xff]   ;;  %v1722_v5 = vld [vmem:[%s1707_s28 + $0x8] sm:$0xff]   ;;  %v511_v7 = vrot.slane %v1710_v0, 5  ;;  %v481_v11 = vrot.slane %v1725_v6, 1 }
  0x13   : > { %v470_v9 = vrot.slane %v1719_v4, 1  ;;  %v471_v10 = vrot.slane %v1722_v5, 1  ;;  %v1736_v12 = vld [vmem:[%s1707_s28 + $0x10] sm:$0xff]   ;;  %v513_v13 = vrot.slane %v1713_v1, 5  ;;  %v504_v14 = vrot.slane %v1719_v4, 5 }
  0x14   : > { %v480_v8 = vsel %vm469_vm0, %v477_v2, %v479_v3  ;;  %v505_v15 = vrot.slane %v1722_v5, 5  ;;  %v1743_v17 = vshll.u32 %v1722_v5, 16  ;;  %v1746_v18 = vshrl.u32 %v1722_v5, 16 }
  0x15   : > { %495 = vrot.lane.b32.xlu1 %v480_v8, %s1648_s30  ;;  %v472_v16 = vsel %vm469_vm0, %v470_v9, %v471_v10  ;;  %v386_v19 = vshrl.u32 %v1719_v4, 16  ;;  %v482_v20 = vsel %vm469_vm0, %v479_v3, %v481_v11  ;;  %v473_v21 = vrot.slane %v1736_v12, 1 }
  0x16   : > { %487 = vrot.lane.b32.xlu0 %v472_v16, %s1648_s30  ;;  %v514_v22 = vsel %vm503_vm1, %v511_v7, %v513_v13  ;;  %v395_v23 = vrot.slane %v1743_v17, 1  ;;  %v1761_v24 = vshll.u32 %v1736_v12, 16  ;;  %v388_v25 = vshll.u32 %v1719_v4, 16 }
  0x17   : > { %v1765_v26 = vshll.u32 %v1713_v1, 16  ;;  %v474_v27 = vsel %vm469_vm0, %v471_v10, %v473_v21  ;;  %v1772_v28 = vshrl.u32 %v1713_v1, 16  ;;  %v1775_v29 = vshll.u32 %v1725_v6, 16 }
  0x18   : > { %v1778_v30 = vshll.u32 %v1710_v0, 16  ;;  %v399_v31 = vor.u32 %v1746_v18, %v395_v23  ;;  %v403_v32 = vrot.slane %v1761_v24, 1  ;;  %v390_v33 = vrot.slane %v388_v25, 1 }
  0x19   : > { %497 = vrot.lane.b32.xlu1 %v482_v20, %s1648_s30  ;;  %v427_v34 = vrot.slane %v1765_v26, 1  ;;  %v1788_v36 = vshrl.u32 %v1710_v0, 16  ;;  %v506_v37 = vsel %vm503_vm1, %v504_v14, %v505_v15  ;;  %v435_v41 = vrot.slane %v1775_v29, 1 }
  0x1a   : > { %489 = vrot.lane.b32.xlu0 %v474_v27, %s1648_s30  ;;  %v419_v35 = vrot.slane %v1778_v30, 1  ;;  %v391_v38 = vor.u32 %v390_v33, %v386_v19  ;;  %v404_v39 = vsel %vm384_vm2, %v399_v31, %v403_v32  ;;  %v515_v44 = vrot.slane %v1725_v6, 5 }
  0x1b   : > { %v431_v40 = vor.u32 %v1772_v28, %v427_v34  ;;  %v553_v45 = vrot.slane %v1788_v36, 5  ;;  %v554_v46 = vrot.slane %v1778_v30, 6  ;;  %v557_v48 = vrot.slane %v1772_v28, 5 }
  0x1c   : > { %v423_v42 = vor.u32 %v1788_v36, %v419_v35  ;;  %v396_v43 = vsel %vm384_vm2, %v391_v38, %v395_v23  ;;  %v558_v49 = vrot.slane %v1765_v26, 6  ;;  %v1819_v50 = vshrl.u32 %v1725_v6, 16 }
  0x1d   : > { %529 = vrot.lane.b32.xlu1 %v514_v22, %s1649_s11  ;;  %v436_v47 = vsel %vm384_vm2, %v431_v40, %v435_v41  ;;  %v507_v52 = vrot.slane %v1736_v12, 5  ;;  %v538_v53 = vrot.slane %v386_v19, 5  ;;  %v539_v54 = vrot.slane %v388_v25, 6  ;;  %v1876_v40 = vld [vmem:[%s1707_s28 + $0x18] sm:$0xff]  }
  0x1e   : > { %521 = vrot.lane.b32.xlu0 %v506_v37, %s1649_s11  ;;  %v428_v51 = vsel %vm384_vm2, %v423_v42, %v427_v34  ;;  %v541_v55 = vrot.slane %v1746_v18, 5  ;;  %v542_v56 = vrot.slane %v1743_v17, 6  ;;  %v1827_v57 = vshrl.u32 %v1736_v12, 16  ;;  %v1868_v34 = vld [vmem:[%s1707_s28 + $0x38] sm:$0xff]  }
  0x1f   : > { %v516_v58 = vsel %vm503_vm1, %v513_v13, %v515_v44  ;;  %v1833_v59 = vor.u32 %v554_v46, %v553_v45  ;;  %v559_v60 = vor.u32 %v558_v49, %v557_v48  ;;  %v561_v61 = vrot.slane %v1819_v50, 5 }
  0x20   : > { %v562_v62 = vrot.slane %v1775_v29, 6  ;;  %v508_v63 = vsel %vm503_vm1, %v505_v15, %v507_v52  ;;  %v540_v3 = vor.u32 %v539_v54, %v538_v53  ;;  %v543_v8 = vor.u32 %v542_v56, %v541_v55 }
  0x21   : > { %455 = vrot.lane.b32.xlu1 %v404_v39, %s1650_s12  ;;  %v545_v9 = vrot.slane %v1827_v57, 5  ;;  %v546_v10 = vrot.slane %v1761_v24, 6  ;;  %v560_v13 = vsel %vm537_vm3, %v1833_v59, %v559_v60  ;;  %v599_v19 = vrot.slane %v1710_v0, 6 }
  0x22   : > { %453 = vrot.lane.b32.xlu0 %v396_v43, %s1650_s12  ;;  %v1848_v14 = vor.u32 %v562_v62, %v561_v61  ;;  %v544_v16 = vsel %vm537_vm3, %v540_v3, %v543_v8  ;;  %v601_v22 = vrot.slane %v1713_v1, 6  ;;  %v592_v23 = vrot.slane %v1719_v4, 6 }
  0x23   : > { %v1852_v15 = vor.u32 %v546_v10, %v545_v9  ;;  %v593_v25 = vrot.slane %v1722_v5, 6  ;;  %v603_v27 = vrot.slane %v1725_v6, 6  ;;  %v2459_v31 = vrot.slane %v1736_v12, 6 }
  0x24   : > { %v564_v20 = vsel %vm537_vm3, %v559_v60, %v1848_v14  ;;  %v602_v37 = vsel %vm591_vm4, %v599_v19, %v601_v22  ;;  %v633_v39 = vrot.slane %v1713_v1, 2  ;;  %v635_v45 = vrot.slane %v1725_v6, 2 }
  0x25   : > { %463 = vrot.lane.b32.xlu1 %v436_v47, %s1650_s12  ;;  %v548_v33 = vsel %vm537_vm3, %v543_v8, %v1852_v15  ;;  %v594_v38 = vsel %vm591_vm4, %v592_v23, %v593_v25  ;;  %v604_v42 = vsel %vm591_vm4, %v601_v22, %v603_v27  ;;  %v596_v43 = vsel %vm591_vm4, %v593_v25, %v2459_v31  ;;  %v1602_v25 = vld [vmem:[%s1796_s10 + $0x8] sm:$0xff]  }
  0x26   : > { %461 = vrot.lane.b32.xlu0 %v428_v51, %s1650_s12  ;;  %v675_v46 = vrot.slane %v1772_v28, 2  ;;  %v676_v47 = vrot.slane %v1765_v26, 3  ;;  %v679_v48 = vrot.slane %v1819_v50, 2  ;;  %v680_v49 = vrot.slane %v1775_v29, 3  ;;  %v1603_v26 = vld [vmem:[%s2452_s2] sm:$0xff]  }
  0x27   : > { %v483_v51 = vrot.slane %v1868_v34, 1  ;;  %v626_v53 = vrot.slane %v1722_v5, 2  ;;  %v627_v54 = vrot.slane %v1736_v12, 2  ;;  %v2458_v55 = vrot.slane %v1868_v34, 2  ;;  %1536 = vmatprep.subr.bf16.mxu0 %v1603_v26  ;;  %1562 = vmatprep.subr.bf16.mxu1 %v1603_v26 }
  0x28   : > { %v475_v56 = vrot.slane %v1876_v40, 1  ;;  %v2457_v28 = vrot.slane %v1876_v40, 2  ;;  %v509_v61 = vrot.slane %v1876_v40, 5  ;;  %v1911_v62 = vshll.u32 %v1876_v40, 16  ;;  %1537 = vmatpush3.bf16.msra.mxu0 %v1603_v26  ;;  %1567 = vmatpush3.bf16.msra.mxu1 %v1603_v26 }
  0x29   : > { %531 = vrot.lane.b32.xlu1 %v516_v58, %s1649_s11  ;;  %v660_v58 = vrot.slane %v1746_v18, 2  ;;  %v1906_v60 = vsel %vm469_vm0, %v481_v11, %v483_v51  ;;  %v1926_v3 = vor.u32 %v676_v47, %v675_v46  ;;  %v1928_v8 = vor.u32 %v680_v49, %v679_v48 }
  0x2a   : > { %523 = vrot.lane.b32.xlu0 %v508_v63, %s1649_s11  ;;  %v1914_v63 = vshrl.u32 %v1876_v40, 16  ;;  %v1919_v18 = vsel %vm469_vm0, %v473_v21, %v475_v56  ;;  %v1924_v11 = vsel %vm469_vm0, %v475_v56, %v477_v2  ;;  %v661_v9 = vrot.slane %v1743_v17, 3 }
  0x2b   : > { %v1936_v10 = vsel %vm503_vm1, %v509_v61, %v511_v7  ;;  %v1940_v2 = vshll.u32 %v1868_v34, 16  ;;  %v1943_v21 = vshrl.u32 %v1868_v34, 16  ;;  %v550_v17 = vrot.slane %v1911_v62, 6  ;;  %v1604_v7 = vld [vmem:[%s2452_s2 + $0x8] sm:$0xff]  }
  0x2c   : > { %v638_v22 = vsel %vm625_vm5, %v635_v45, %v2458_v55  ;;  %v2462_v23 = vrot.slane %v1876_v40, 6  ;;  %1538 = vmatprep.subr.bf16.mxu0 %v1604_v7  ;;  %v667_v47 = vrot.slane %v1914_v63, 2  ;;  %v668_v48 = vrot.slane %v1911_v62, 3  ;;  %1563 = vmatprep.subr.bf16.mxu1 %v1604_v7 }
  0x2d   : > { %583 = vrot.lane.b32.xlu1 %v560_v13, %s1651_s13  ;;  %v549_v13 = vrot.slane %v1914_v63, 5  ;;  %v682_v49 = vsel %vm659_vm6, %v1926_v3, %v1928_v8  ;;  %1539 = vmatpush3.bf16.msra.mxu0 %v1604_v7 }
  0x2e   : > { %575 = vrot.lane.b32.xlu0 %v544_v16, %s1651_s13  ;;  %v636_v16 = vsel %vm625_vm5, %v633_v39, %v635_v45  ;;  %v662_v45 = vor.u32 %v661_v9, %v660_v58  ;;  %v2460_v9 = vrot.slane %v1710_v0, 2  ;;  %1568 = vmatpush3.bf16.msra.mxu1 %v1604_v7  ;;  %v669_v55 = vor.u32 %v668_v48, %v667_v47  ;;  %v1606_v48 = vld [vmem:[%s2452_s2 + $0x18] sm:$0xff]  }
  0x2f   : > { %v1968_v46 = vor.u32 %v550_v17, %v549_v13  ;;  %v641_v13 = vrot.slane %v1602_v25, 2  ;;  %v695_v47 = vshll.u32 %v1602_v25, 16 }
  0x30   : > { %v2012_v7 = vsel %vm625_vm5, %v2460_v9, %v633_v39  ;;  %v724_v39 = vrot.slane %v1713_v1, 3 }
  0x31   : > { %585 = vrot.lane.b32.xlu1 %v564_v20, %s1651_s13  ;;  %v628_v20 = vsel %vm625_vm5, %v626_v53, %v627_v54  ;;  %v683_v53 = vrot.slane %v1943_v21, 2  ;;  %v1988_v56 = vsel %vm537_vm3, %v1968_v46, %v1833_v59  ;;  %v671_v59 = vrot.slane %v1788_v36, 2 }
  0x32   : > { %577 = vrot.lane.b32.xlu0 %v548_v33, %s1651_s13  ;;  %v630_v33 = vsel %vm625_vm5, %v627_v54, %v2457_v28  ;;  %v684_v54 = vrot.slane %v1940_v2, 3  ;;  %v672_v28 = vrot.slane %v1778_v30, 3 }
  0x35   : > { %617 = vrot.lane.b32.xlu1 %v602_v37, %s1652_s14  ;;  %v663_v37 = vrot.slane %v1827_v57, 2 }
  0x36   : > { %609 = vrot.lane.b32.xlu0 %v594_v38, %s1652_s14  ;;  %v664_v38 = vrot.slane %v1761_v24, 3 }
  0x38   : > { %v665_v17 = vor.u32 %v664_v38, %v663_v37  ;;  %v673_v37 = vor.u32 %v672_v28, %v671_v59  ;;  %v692_v38 = vshrl.u32 %v1602_v25, 16  ;;  %v697_v59 = vrot.slane %v695_v47, 3 }
  0x39   : > { %619 = vrot.lane.b32.xlu1 %v604_v42, %s1652_s14  ;;  %v1966_v42 = vld [vmem:[%s1796_s10] sm:$0xff]  }
  0x3a   : > { %611 = vrot.lane.b32.xlu0 %v596_v43, %s1652_s14  ;;  %v1977_v43 = vsel %vm591_vm4, %v2462_v23, %v599_v19  ;;  %v1605_v19 = vld [vmem:[%s2452_s2 + $0x10] sm:$0xff]   ;;  %v569_v26 = vshrl.u32 %v1966_v42, 16  ;;  %v2461_v58 = vrot.slane %v1966_v42, 2  ;;  %v730_v9 = vrot.slane %v1966_v42, 3 }
  0x3b   : > { %1540 = vmatprep.subr.bf16.mxu0 %v1605_v19  ;;  %1564 = vmatprep.subr.bf16.mxu1 %v1605_v19  ;;  %v694_v28 = vrot.slane %v692_v38, 2  ;;  %v722_v23 = vrot.slane %v1710_v0, 3  ;;  %v718_v38 = vrot.slane %v1736_v12, 3 }
  0x3c   : > { %v2005_v31 = vsel %vm625_vm5, %v2461_v58, %v641_v13  ;;  %v2021_v13 = vor.u32 %v684_v54, %v683_v53  ;;  %v732_v58 = vrot.slane %v1602_v25, 3  ;;  %1541 = vmatpush3.bf16.msra.mxu0 %v1605_v19  ;;  %1569 = vmatpush3.bf16.msra.mxu1 %v1605_v19  ;;  %v666_v53 = vsel %vm659_vm6, %v662_v45, %v665_v17 }
  0x3d   : > { %651 = vrot.lane.b32.xlu1 %v636_v16, %s1653_s19  ;;  %v1998_v16 = vshll.u32 %v1966_v42, 16  ;;  %1542 = vmatprep.subr.bf16.mxu0 %v1606_v48  ;;  %v2033_v54 = vsel %vm659_vm6, %v673_v37, %v1926_v3  ;;  %v698_v19 = vor.u32 %v697_v59, %v694_v28  ;;  %v2046_v45 = vsel %vm716_vm7, %v722_v23, %v724_v39  ;;  %v1607_v3 = vld [vmem:[%s2452_s2 + $0x20] ss:$0 sps:$4 sm:$0xff]  }
  0x3e   : > { %643 = vrot.lane.b32.xlu0 %v628_v20, %s1653_s19  ;;  %v687_v20 = vrot.slane %v569_v26, 2  ;;  %v2038_v25 = vsel %vm716_vm7, %v730_v9, %v732_v58  ;;  %1565 = vmatprep.subr.bf16.mxu1 %v1606_v48  ;;  %v686_v58 = vsel %vm659_vm6, %v1928_v8, %v2021_v13  ;;  %v941_v8 = vsel %vm939_vm8, %v1607_v3, 0 }
  0x3f   : > { %v688_v36 = vrot.slane %v1998_v16, 3  ;;  %v443_v28 = vrot.slane %v1940_v2, 1  ;;  %v411_v59 = vrot.slane %v1911_v62, 1 }
  0x40   : > { %1543 = vmatpush3.bf16.msra.mxu0 %v1606_v48  ;;  %1570 = vmatpush3.bf16.msra.mxu1 %v1606_v48  ;;  %v439_v48 = vor.u32 %v1819_v50, %v435_v41  ;;  %v728_v41 = vrot.slane %v1868_v34, 3 }
  0x41   : > { %653 = vrot.lane.b32.xlu1 %v638_v22, %s1653_s19  ;;  %v2027_v22 = vsel %vm659_vm6, %v669_v55, %v673_v37  ;;  %v726_v37 = vrot.slane %v1725_v6, 3  ;;  %1572 = vmatprep.subr.msk.bf16.mxu0 %vm939_vm8, %v1607_v3 }
  0x42   : > { %645 = vrot.lane.b32.xlu0 %v630_v33, %s1653_s19  ;;  %v2041_v33 = vor.u32 %v688_v36, %v687_v20  ;;  %v670_v20 = vsel %vm659_vm6, %v665_v17, %v669_v55  ;;  %v717_v36 = vrot.slane %v1722_v5, 3  ;;  %1573 = vmatprep.subr.msk.bf16.mxu1 %vm939_vm8, %v1607_v3  ;;  %v407_v17 = vor.u32 %v1827_v57, %v403_v32 }
  0x43   : > { %v727_v47 = vsel %vm716_vm7, %v724_v39, %v726_v37  ;;  %v444_v29 = vsel %vm384_vm2, %v439_v48, %v443_v28  ;;  %v720_v39 = vrot.slane %v1876_v40, 3  ;;  %v729_v24 = vsel %vm716_vm7, %v726_v37, %v728_v41 }
  0x44   : > { %1545 = vmatpush3.bf16.msra.mxu0 %v941_v8  ;;  %1571 = vmatpush3.bf16.msra.mxu1 %v941_v8  ;;  %v719_v55 = vsel %vm716_vm7, %v717_v36, %v718_v38  ;;  %v412_v50 = vsel %vm384_vm2, %v407_v17, %v411_v59  ;;  %v447_v32 = vor.u32 %v1943_v21, %v443_v28  ;;  %v451_v57 = vrot.slane %v1998_v16, 1 }
  0x45   : > { %708 = vrot.lane.b32.xlu1 %v682_v49, %s1654_s26  ;;  %v2058_v49 = vsel %vm659_vm6, %v2041_v33, %v698_v19  ;;  %v721_v62 = vsel %vm716_vm7, %v718_v38, %v720_v39  ;;  %v517_v37 = vrot.slane %v1868_v34, 5  ;;  %v571_v36 = vrot.slane %v569_v26, 5 }
  0x46   : > { %700 = vrot.lane.b32.xlu0 %v666_v53, %s1654_s26  ;;  %v415_v53 = vor.u32 %v1914_v63, %v411_v59  ;;  %v452_v19 = vsel %vm384_vm2, %v447_v32, %v451_v57  ;;  %v605_v26 = vrot.slane %v1868_v34, 6  ;;  %v2466_v8 = vrot.slane %v1868_v34, 2 }
  0x47   : > { %v518_v30 = vsel %vm503_vm1, %v515_v44, %v517_v37  ;;  %v2468_v48 = vrot.slane %v1876_v40, 2  ;;  %v1656_v17 = vmov 0  }
  0x48   : > { %v420_v3 = vsel %vm384_vm2, %v415_v53, %v419_v35  ;;  %v519_v35 = vrot.slane %v1966_v42, 5  ;;  %1592 = vset.pattern.permute.xlu1 %v1656_v17  ;;  %1591 = vset.pattern.permute.xlu0 %v1656_v17  ;;  %vm1342_vm2 = vcmask 60416  }
  0x49   : > { %710 = vrot.lane.b32.xlu1 %v686_v58, %s1654_s26  ;;  %v485_v58 = vrot.slane %v1966_v42, 1 }
  0x4a   : > { %702 = vrot.lane.b32.xlu0 %v670_v20, %s1654_s26  ;;  %v565_v20 = vrot.slane %v1943_v21, 5  ;;  %v572_v21 = vrot.slane %v1998_v16, 6 }
  0x4b   : > { %v486_v63 = vsel %vm469_vm0, %v483_v51, %v485_v58  ;;  %v510_v51 = vsel %vm503_vm1, %v507_v52, %v509_v61  ;;  %v552_v52 = vsel %vm537_vm3, %v1852_v15, %v1968_v46  ;;  %v2463_v15 = vrot.slane %v1876_v40, 6 }
  0x4c   : > { %v2464_v46 = vrot.slane %v1736_v12, 6  ;;  %vm869_vm0 = vcmask 523264  }
  0x4d   : > { %742 = vrot.lane.b32.xlu1 %v727_v47, %s1655_s29  ;;  %v2467_v47 = vrot.slane %v1710_v0, 2 }
  0x4e   : > { %734 = vrot.lane.b32.xlu0 %v719_v55, %s1655_s29  ;;  %v598_v16 = vsel %vm591_vm4, %v2464_v46, %v2463_v15  ;;  %v690_v55 = vsel %vm659_vm6, %v2021_v13, %v2041_v33  ;;  %v723_v13 = vsel %vm716_vm7, %v720_v39, %v722_v23 }
  0x4f   : > { %v632_v28 = vsel %vm625_vm5, %v2468_v48, %v2467_v47 }
  0x51   : > { %465 = vrot.lane.b32.xlu1 %v444_v29, %s1650_s12 }
  0x52   : > { %457 = vrot.lane.b32.xlu0 %v412_v50, %s1650_s12 }
  0x55   : > { %744 = vrot.lane.b32.xlu1 %v729_v24, %s1655_s29 }
  0x56   : > { %736 = vrot.lane.b32.xlu0 %v721_v62, %s1655_s29 }
  0x59   : > { %467 = vrot.lane.b32.xlu1 %v452_v19, %s1650_s12 }
  0x5a   : > { %459 = vrot.lane.b32.xlu0 %v420_v3, %s1650_s12 }
  0x5d   : > { %499 = vrot.lane.b32.xlu1 %v1906_v60, %s1648_s30  ;;  %v566_v60 = vrot.slane %v1940_v2, 6  ;;  %v573_v2 = vor.u32 %v572_v21, %v571_v36 }
  0x5e   : > { %491 = vrot.lane.b32.xlu0 %v1919_v18, %s1648_s30  ;;  %v520_v18 = vsel %vm503_vm1, %v517_v37, %v519_v35  ;;  %vm922_vm1 = vcmask 588800  }
  0x5f   : > { %v567_v44 = vor.u32 %v566_v60, %v565_v20 }
  0x61   : > { %501 = vrot.lane.b32.xlu1 %v486_v63, %s1648_s30  ;;  %v574_v61 = vsel %vm537_vm3, %v567_v44, %v573_v2 }
  0x62   : > { %493 = vrot.lane.b32.xlu0 %v1924_v11, %s1648_s30  ;;  %v568_v11 = vsel %vm537_vm3, %v1848_v14, %v567_v44  ;;  %v606_v14 = vsel %vm591_vm4, %v603_v27, %v605_v26  ;;  %v2465_v27 = vrot.slane %v1966_v42, 2  ;;  %s1452_s30 = sshll.u32 %s2472_s23, 3 }
  0x63   : > { %s2215_s9 = scalar_lea.vmem %s2455_s5, %s1452_s30 }
  0x64   : > { %v1166_v33 = vld [vmem:[%s2215_s9] sm:$0xff]  ;;  %v1168_v29 = vld [vmem:[%s2215_s9 + $0x10] sm:$0xff]  ;;  %v1169_v50 = vld [vmem:[%s2215_s9 + $0x18] sm:$0xff] }
  0x65   : > { %533 = vrot.lane.b32.xlu1 %v518_v30, %s1649_s11  ;;  %v1172_v57 = vld [vmem:[%s2215_s9 + $0x30] sm:$0xff]  ;;  %v1173_v53 = vld [vmem:[%s2215_s9 + $0x38] sm:$0xff]  ;;  %v1174_v3 = vld [vmem:[%s2215_s9 + $0x40] sm:$0xff] }
  0x66   : > { %525 = vrot.lane.b32.xlu0 %v510_v51, %s1649_s11  ;;  %v1175_v63 = vld [vmem:[%s2215_s9 + $0x48] sm:$0xff]  ;;  %v1176_v30 = vld [vmem:[%s2215_s9 + $0x50] sm:$0xff]  ;;  %v1177_v20 = vld [vmem:[%s2215_s9 + $0x58] sm:$0xff] }
  0x67   : > { %v1178_v51 = vld [vmem:[%s2215_s9 + $0x60] sm:$0xff]  ;;  %v1179_v44 = vld [vmem:[%s2215_s9 + $0x68] sm:$0xff]  ;;  %v1180_v21 = vld [vmem:[%s2215_s9 + $0x70] sm:$0xff] }
  0x68   : > { %v1181_v2 = vld [vmem:[%s2215_s9 + $0x78] sm:$0xff] }
  0x69   : > { %535 = vrot.lane.b32.xlu1 %v520_v18, %s1649_s11 }
  0x6a   : > { %527 = vrot.lane.b32.xlu0 %v1936_v10, %s1649_s11  ;;  %v607_v10 = vrot.slane %v1966_v42, 6 }
  0x6c   : > { %v608_v38 = vsel %vm591_vm4, %v605_v26, %v607_v10 }
  0x6d   : > { %587 = vrot.lane.b32.xlu1 %v568_v11, %s1651_s13 }
  0x6e   : > { %579 = vrot.lane.b32.xlu0 %v552_v52, %s1651_s13 }
  0x71   : > { %589 = vrot.lane.b32.xlu1 %v574_v61, %s1651_s13 }
  0x72   : > { %581 = vrot.lane.b32.xlu0 %v1988_v56, %s1651_s13  ;;  %v640_v56 = vsel %vm625_vm5, %v2466_v8, %v2465_v27 }
  0x75   : > { %621 = vrot.lane.b32.xlu1 %v606_v14, %s1652_s14 }
  0x76   : > { %613 = vrot.lane.b32.xlu0 %v598_v16, %s1652_s14 }
  0x79   : > { %623 = vrot.lane.b32.xlu1 %v608_v38, %s1652_s14 }
  0x7a   : > { %615 = vrot.lane.b32.xlu0 %v1977_v43, %s1652_s14  ;;  %s1454_s14 = sshll.u32 %s2472_s23, 2 }
  0x7b   : > { %s2389_s17 = scalar_lea.vmem %s2456_s6, %s1454_s14 }
  0x7d   : > { %655 = vrot.lane.b32.xlu1 %v640_v56, %s1653_s19 }
  0x7e   : > { %647 = vrot.lane.b32.xlu0 %v632_v28, %s1653_s19 }
  0x81   : > { %657 = vrot.lane.b32.xlu1 %v2005_v31, %s1653_s19  ;;  %v731_v31 = vsel %vm716_vm7, %v728_v41, %v730_v9  ;;  %v1167_v9 = vld [vmem:[%s2215_s9 + $0x8] sm:$0xff] }
  0x82   : > { %649 = vrot.lane.b32.xlu0 %v2012_v7, %s1653_s19 }
  0x85   : > { %712 = vrot.lane.b32.xlu1 %v690_v55, %s1654_s26 }
  0x86   : > { %704 = vrot.lane.b32.xlu0 %v2027_v22, %s1654_s26 }
  0x87   : > { %v2181_v43 = vpop.permute.xlu1 %495 }
  0x88   : > { %v2184_v59 = vpop.permute.xlu0 %487 }
  0x89   : > { %714 = vrot.lane.b32.xlu1 %v2058_v49, %s1654_s26 }
  0x8a   : > { %706 = vrot.lane.b32.xlu0 %v2033_v54, %s1654_s26 }
  0x8b   : > { %v2198_v7 = vpop.permute.xlu1 %497 }
  0x8c   : > { %v2206_v22 = vpop.permute.xlu0 %489 }
  0x8d   : > { %746 = vrot.lane.b32.xlu1 %v731_v31, %s1655_s29 }
  0x8e   : > { %738 = vrot.lane.b32.xlu0 %v723_v13, %s1655_s29 }
  0x8f   : > { %v2210_v42 = vpop.permute.xlu1 %529 }
  0x90   : > { %v2217_v23 = vpop.permute.xlu0 %521 }
  0x91   : > { %748 = vrot.lane.b32.xlu1 %v2038_v25, %s1655_s29  ;;  %v1170_v25 = vld [vmem:[%s2215_s9 + $0x20] sm:$0xff] }
  0x92   : > { %740 = vrot.lane.b32.xlu0 %v2046_v45, %s1655_s29  ;;  %v1171_v45 = vld [vmem:[%s2215_s9 + $0x28] sm:$0xff] }
  0x93   : > { %v2224_v54 = vpop.permute.xlu1 %455 }
  0x94   : > { %v454_v49 = vpop.permute.xlu0 %453 }
  0x95   : > { %1189 = vperm.xlu1 %1592, %v1167_v9   ;;  %v752_v10 = vsel %vm750_vm9, %v1719_v4, %v454_v49 }
  0x96   : > { %1184 = vperm.xlu0 %1591, %v1166_v33   ;;  %v769_v38 = vsel %vm767_vm10, %v752_v10, %v2184_v59 }
  0x97   : > { %v2228_v41 = vpop.permute.xlu1 %463  ;;  %v786_v4 = vsel %vm784_vm12, %v769_v38, %v2217_v23 }
  0x98   : > { %v462_v39 = vpop.permute.xlu0 %461  ;;  %v762_v55 = vsel %vm750_vm9, %v1713_v1, %v2228_v41 }
  0x99   : > { %1194 = vperm.xlu1 %1592, %v1168_v29   ;;  %v760_v26 = vsel %vm750_vm9, %v1710_v0, %v462_v39  ;;  %v779_v1 = vsel %vm767_vm10, %v762_v55, %v2198_v7 }
  0x9a   : > { %1199 = vperm.xlu0 %1591, %v1169_v50   ;;  %v777_v46 = vsel %vm767_vm10, %v760_v26, %v2181_v43 }
  0x9b   : > { %v2232_v24 = vpop.permute.xlu1 %531  ;;  %v794_v27 = vsel %vm784_vm12, %v777_v46, %v2210_v42  ;;  %v754_v42 = vsel %vm750_vm9, %v1722_v5, %v2224_v54 }
  0x9c   : > { %v2235_v32 = vpop.permute.xlu0 %523  ;;  %v796_v49 = vsel %vm784_vm12, %v779_v1, %v2232_v24  ;;  %v771_v41 = vsel %vm767_vm10, %v754_v42, %v2206_v22 }
  0x9d   : > { %1204 = vperm.xlu1 %1592, %v1170_v25   ;;  %v788_v54 = vsel %vm784_vm12, %v771_v41, %v2235_v32 }
  0x9e   : > { %1209 = vperm.xlu0 %1591, %v1171_v45  }
  0x9f   : > { %v584_v62 = vpop.permute.xlu1 %583 }
  0xa0   : > { %v576_v19 = vpop.permute.xlu0 %575  ;;  %v811_v8 = vsel %vm801_vm11, %v794_v27, %v584_v62 }
  0xa1   : > { %1214 = vperm.xlu1 %1592, %v1172_v57   ;;  %v803_v48 = vsel %vm801_vm11, %v786_v4, %v576_v19 }
  0xa2   : > { %1219 = vperm.xlu0 %1591, %v1173_v53  }
  0xa3   : > { %v2240_v58 = vpop.permute.xlu1 %585 }
  0xa4   : > { %v2243_v37 = vpop.permute.xlu0 %577  ;;  %v813_v5 = vsel %vm801_vm11, %v796_v49, %v2240_v58 }
  0xa5   : > { %1224 = vperm.xlu1 %1592, %v1174_v3   ;;  %v805_v39 = vsel %vm801_vm11, %v788_v54, %v2243_v37 }
  0xa6   : > { %1229 = vperm.xlu0 %1591, %v1175_v63  }
  0xa7   : > { %v618_v35 = vpop.permute.xlu1 %617 }
  0xa8   : > { %v610_v60 = vpop.permute.xlu0 %609  ;;  %v828_v56 = vsel %vm818_vm13, %v811_v8, %v618_v35 }
  0xa9   : > { %1234 = vperm.xlu1 %1592, %v1176_v30   ;;  %v820_v43 = vsel %vm818_vm13, %v803_v48, %v610_v60 }
  0xaa   : > { %1239 = vperm.xlu0 %1591, %v1177_v20  }
  0xab   : > { %v620_v18 = vpop.permute.xlu1 %619 }
  0xac   : > { %v612_v36 = vpop.permute.xlu0 %611  ;;  %v830_v50 = vsel %vm818_vm13, %v813_v5, %v620_v18 }
  0xad   : > { %1244 = vperm.xlu1 %1592, %v1178_v51   ;;  %v822_v24 = vsel %vm818_vm13, %v805_v39, %v612_v36 }
  0xae   : > { %1249 = vperm.xlu0 %1591, %v1179_v44  }
  0xaf   : > { %v652_v11 = vpop.permute.xlu1 %651 }
  0xb0   : > { %v644_v52 = vpop.permute.xlu0 %643  ;;  %v845_v28 = vsel %vm835_vm14, %v828_v56, %v652_v11 }
  0xb1   : > { %1254 = vperm.xlu1 %1592, %v1180_v21   ;;  %v837_v31 = vsel %vm835_vm14, %v820_v43, %v644_v52 }
  0xb2   : > { %1259 = vperm.xlu0 %1591, %v1181_v2  }
  0xb3   : > { %v654_v61 = vpop.permute.xlu1 %653 }
  0xb4   : > { %v646_v14 = vpop.permute.xlu0 %645  ;;  %v847_v25 = vsel %vm835_vm14, %v830_v50, %v654_v61 }
  0xb5   : > { %v839_v22 = vsel %vm835_vm14, %v822_v24, %v646_v14 }
  0xb7   : > { %v709_v15 = vpop.permute.xlu1 %708 }
  0xb8   : > { %v701_v16 = vpop.permute.xlu0 %700  ;;  %v862_v17 = vsel %vm852_vm15, %v845_v28, %v709_v15 }
  0xb9   : > { %v854_v23 = vsel %vm852_vm15, %v837_v31, %v701_v16 }
  0xbb   : > { %v711_v0 = vpop.permute.xlu1 %710 }
  0xbc   : > { %v703_v47 = vpop.permute.xlu0 %702  ;;  %v864_v45 = vsel %vm852_vm15, %v847_v25, %v711_v0 }
  0xbd   : > { %v856_v53 = vsel %vm852_vm15, %v839_v22, %v703_v47 }
  0xbf   : > { %v743_v59 = vpop.permute.xlu1 %742 }
  0xc0   : > { %v879_v13 = vsel %vm869_vm0, %v862_v17, %v743_v59  ;;  %v735_v9 = vpop.permute.xlu0 %734 }
  0xc1   : > { %1554 = vmatprep.mubr.msk.bf16.mxu1 %vm922_vm1, %v879_v13  ;;  %v871_v33 = vsel %vm869_vm0, %v854_v23, %v735_v9 }
  0xc2   : > { %1546 = vmatprep.mubr.msk.bf16.mxu0 %vm922_vm1, %v871_v33 }
  0xc3   : > { %v466_v29 = vpop.permute.xlu1 %465 }
  0xc4   : > { %v458_v7 = vpop.permute.xlu0 %457  ;;  %v764_v38 = vsel %vm750_vm9, %v1725_v6, %v466_v29 }
  0xc5   : > { %v756_v8 = vsel %vm750_vm9, %v1736_v12, %v458_v7 }
  0xc7   : > { %v745_v57 = vpop.permute.xlu1 %744 }
  0xc8   : > { %v881_v62 = vsel %vm869_vm0, %v864_v45, %v745_v57  ;;  %v737_v32 = vpop.permute.xlu0 %736 }
  0xc9   : > { %1555 = vmatmul.mubr.msk.bf16.vlgmr.msra.gmra.mrb[0].mxu1 %vm922_vm1, %v881_v62  ;;  %v873_v19 = vsel %vm869_vm0, %v856_v53, %v737_v32 }
  0xca   : > { %1547 = vmatmul.mubr.msk.bf16.vlgmr.msra.gmra.mrb[0].mxu0 %vm922_vm1, %v873_v19 }
  0xcb   : > { %v468_v3 = vpop.permute.xlu1 %467 }
  0xcc   : > { %v460_v58 = vpop.permute.xlu0 %459  ;;  %v766_v28 = vsel %vm750_vm9, %v1868_v34, %v468_v3 }
  0xcd   : > { %v758_v31 = vsel %vm750_vm9, %v1876_v40, %v460_v58  ;;  %v2352_v58 = vld [vmem:[%s2453_s3] ss:$0 sm:$0xff] }
  0xcf   : > { %v500_v63 = vpop.permute.xlu1 %499 }
  0xd0   : > { %v492_v37 = vpop.permute.xlu0 %491  ;;  %v781_v0 = vsel %vm767_vm10, %v764_v38, %v500_v63  ;;  %v2357_v63 = vld [vmem:[%s2454_s4] ss:$0 sm:$0xff] }
  0xd1   : > { %v773_v47 = vsel %vm767_vm10, %v756_v8, %v492_v37 }
  0xd3   : > { %v502_v30 = vpop.permute.xlu1 %501 }
  0xd4   : > { %v494_v35 = vpop.permute.xlu0 %493  ;;  %v783_v17 = vsel %vm767_vm10, %v766_v28, %v502_v30 }
  0xd5   : > { %v775_v9 = vsel %vm767_vm10, %v758_v31, %v494_v35 }
  0xd7   : > { %v534_v20 = vpop.permute.xlu1 %533 }
  0xd8   : > { %v526_v60 = vpop.permute.xlu0 %525  ;;  %v798_v4 = vsel %vm784_vm12, %v781_v0, %v534_v20 }
  0xd9   : > { %v790_v55 = vsel %vm784_vm12, %v773_v47, %v526_v60 }
  0xdb   : > { %v536_v51 = vpop.permute.xlu1 %535 }
  0xdc   : > { %v528_v18 = vpop.permute.xlu0 %527  ;;  %v800_v13 = vsel %vm784_vm12, %v783_v17, %v536_v51 }
  0xdd   : > { %v792_v29 = vsel %vm784_vm12, %v775_v9, %v528_v18 }
  0xdf   : > { %v588_v44 = vpop.permute.xlu1 %587 }
  0xe0   : > { %v580_v36 = vpop.permute.xlu0 %579  ;;  %v815_v48 = vsel %vm801_vm11, %v798_v4, %v588_v44 }
  0xe1   : > { %v807_v59 = vsel %vm801_vm11, %v790_v55, %v580_v36 }
  0xe3   : > { %v590_v21 = vpop.permute.xlu1 %589 }
  0xe4   : > { %v582_v11 = vpop.permute.xlu0 %581  ;;  %v817_v1 = vsel %vm801_vm11, %v800_v13, %v590_v21 }
  0xe5   : > { %v809_v54 = vsel %vm801_vm11, %v792_v29, %v582_v11 }
  0xe7   : > { %v622_v2 = vpop.permute.xlu1 %621 }
  0xe8   : > { %v614_v52 = vpop.permute.xlu0 %613  ;;  %v832_v6 = vsel %vm818_vm13, %v815_v48, %v622_v2 }
  0xe9   : > { %v824_v42 = vsel %vm818_vm13, %v807_v59, %v614_v52 }
  0xeb   : > { %v624_v61 = vpop.permute.xlu1 %623 }
  0xec   : > { %v616_v26 = vpop.permute.xlu0 %615  ;;  %v834_v41 = vsel %vm818_vm13, %v817_v1, %v624_v61 }
  0xed   : > { %v826_v39 = vsel %vm818_vm13, %v809_v54, %v616_v26 }
  0xef   : > { %v656_v14 = vpop.permute.xlu1 %655 }
  0xf0   : > { %v648_v10 = vpop.permute.xlu0 %647  ;;  %v849_v12 = vsel %vm835_vm14, %v832_v6, %v656_v14 }
  0xf1   : > { %v841_v33 = vsel %vm835_vm14, %v824_v42, %v648_v10 }
  0xf3   : > { %v658_v15 = vpop.permute.xlu1 %657 }
  0xf4   : > { %v650_v46 = vpop.permute.xlu0 %649  ;;  %v851_v50 = vsel %vm835_vm14, %v834_v41, %v658_v15 }
  0xf5   : > { %v843_v45 = vsel %vm835_vm14, %v826_v39, %v650_v46 }
  0xf7   : > { %v713_v16 = vpop.permute.xlu1 %712 }
  0xf8   : > { %v705_v27 = vpop.permute.xlu0 %704  ;;  %v866_v34 = vsel %vm852_vm15, %v849_v12, %v713_v16 }
  0xf9   : > { %v858_v40 = vsel %vm852_vm15, %v841_v33, %v705_v27 }
  0xfb   : > { %v715_v56 = vpop.permute.xlu1 %714 }
  0xfc   : > { %v707_v43 = vpop.permute.xlu0 %706  ;;  %v868_v25 = vsel %vm852_vm15, %v851_v50, %v715_v56 }
  0xfd   : > { %v860_v22 = vsel %vm852_vm15, %v843_v45, %v707_v43 }
  0xff   : > { %v747_v23 = vpop.permute.xlu1 %746 }
 0x100   : > { %v883_v49 = vsel %vm869_vm0, %v866_v34, %v747_v23  ;;  %v739_v5 = vpop.permute.xlu0 %738 }
 0x101   : > { %1558 = vmatprep.mubr.msk.bf16.mxu1 %vm922_vm1, %v883_v49  ;;  %v875_v7 = vsel %vm869_vm0, %v858_v40, %v739_v5 }
 0x102   : > { %1550 = vmatprep.mubr.msk.bf16.mxu0 %vm922_vm1, %v875_v7 }
 0x103   : > { %v749_v24 = vpop.permute.xlu1 %748 }
 0x104   : > { %v885_v57 = vsel %vm869_vm0, %v868_v25, %v749_v24  ;;  %v741_v62 = vpop.permute.xlu0 %740 }
 0x105   : > { %1559 = vmatmul.mubr.msk.bf16.gmra.mrb[4].mxu1 %vm922_vm1, %v885_v57  ;;  %v877_v53 = vsel %vm869_vm0, %v860_v22, %v741_v62 }
 0x106   : > { %1551 = vmatmul.mubr.msk.bf16.gmra.mrb[4].mxu0 %vm922_vm1, %v877_v53 }
 0x114   : > { %v2343_v32 = vpop.permute.xlu1 %1189 }
 0x115   : > { %v2345_v19 = vpop.permute.xlu0 %1184 }
 0x118   : > { %v2347_v3 = vpop.permute.xlu1 %1194 }
 0x119   : > { %v2359_v30 = vpop.permute.xlu0 %1199 }
 0x11c   : > { %v2362_v60 = vpop.permute.xlu1 %1204 }
 0x11d   : > { %v2377_v47 = vpop.permute.xlu0 %1209 }
 0x120   : > { %v2380_v55 = vpop.permute.xlu1 %1214 }
 0x121   : > { %v2383_v13 = vpop.permute.xlu0 %1219 }
 0x124   : > { %v1225_v42 = vpop.permute.xlu1 %1224 }
 0x125   : > { %v1230_v9 = vpop.permute.xlu0 %1229 }
 0x128   : > { %v1235_v40 = vpop.permute.xlu1 %1234 }
 0x19c   : > { %v1556_v37 = vpop.f32.mrb[0].mxu1 }
 0x19d   : > { %v1057_v35 = vmul.f32 %v1556_v37, %v2352_v58  ;;  %v1009_v20 = vpop.f32.mrb[1].mxu1  ;;  %v1548_v51 = vpop.f32.mrb[0].mxu0 }
 0x19e   : > { %v1055_v18 = vmul.f32 %v2352_v58, %v1009_v20  ;;  %v1557_v44 = vpop.f32.mrb[2].mxu1  ;;  %v1049_v36 = vmul.f32 %v1548_v51, %v2352_v58  ;;  %v977_v11 = vpop.f32.mrb[1].mxu0 }
 0x19f   : > { %v1080_v21 = vadd.f32 %v2357_v63, %v1057_v35  ;;  %v1058_v2 = vmul.f32 %v1557_v44, %v2352_v58  ;;  %v1012_v52 = vpop.f32.mrb[3].mxu1  ;;  %v1047_v61 = vmul.f32 %v2352_v58, %v977_v11  ;;  %v1549_v14 = vpop.f32.mrb[2].mxu0 }
 0x1a0   : > { %v1078_v26 = vadd.f32 %v2357_v63, %v1055_v18  ;;  %v1056_v10 = vmul.f32 %v2352_v58, %v1012_v52  ;;  %v1072_v15 = vadd.f32 %v2357_v63, %v1049_v36  ;;  %v1050_v16 = vmul.f32 %v1549_v14, %v2352_v58  ;;  %v980_v27 = vpop.f32.mrb[3].mxu0  ;;  %v1240_v14 = vpop.permute.xlu0 %1239 }
 0x1a1   : > { %v1112_v46 = vmul.f32 0.70710677, %v1080_v21  ;;  %v1081_v38 = vadd.f32 %v2357_v63, %v1058_v2  ;;  %v1070_v0 = vadd.f32 %v2357_v63, %v1047_v61  ;;  %v1048_v4 = vmul.f32 %v2352_v58, %v980_v27 }
 0x1a2   : > { %v1110_v8 = vmul.f32 0.70710677, %v1078_v26  ;;  %v1079_v56 = vadd.f32 %v2357_v63, %v1056_v10  ;;  %v1104_v48 = vmul.f32 0.70710677, %v1072_v15  ;;  %v1073_v28 = vadd.f32 %v2357_v63, %v1050_v16 }
 0x1a3   : > { %1608 = verf.f32 %v1112_v46  ;;  %v1102_v6 = vmul.f32 0.70710677, %v1070_v0  ;;  %v1113_v43 = vmul.f32 0.70710677, %v1081_v38  ;;  %v1071_v17 = vadd.f32 %v2357_v63, %v1048_v4 }
 0x1a4   : > { %1610 = verf.f32 %v1110_v8  ;;  %v1105_v59 = vmul.f32 0.70710677, %v1073_v28  ;;  %v1111_v31 = vmul.f32 0.70710677, %v1079_v56  ;;  %v1096_v1 = vmul.f32 0.5, %v1080_v21 }
 0x1a5   : > { %1612 = verf.f32 %v1104_v48  ;;  %v1103_v12 = vmul.f32 0.70710677, %v1071_v17  ;;  %v1094_v29 = vmul.f32 0.5, %v1078_v26  ;;  %v1086_v54 = vmul.f32 0.5, %v1070_v0 }
 0x1a6   : > { %1614 = verf.f32 %v1102_v6  ;;  %v1088_v50 = vmul.f32 0.5, %v1072_v15  ;;  %v1087_v24 = vmul.f32 0.5, %v1071_v17  ;;  %v1089_v57 = vmul.f32 0.5, %v1073_v28 }
 0x1a7   : > { %1616 = verf.f32 %v1105_v59  ;;  %v1095_v35 = vmul.f32 0.5, %v1079_v56  ;;  %v1097_v36 = vmul.f32 0.5, %v1081_v38 }
 0x1a8   : > { %1618 = verf.f32 %v1113_v43 }
 0x1a9   : > { %1620 = verf.f32 %v1103_v12 }
 0x1aa   : > { %1622 = verf.f32 %v1111_v31 }
 0x1ad   : > { %v1609_v34 = vpop.eup %1608 }
 0x1ae   : > { %v1611_v23 = vpop.eup %1610  ;;  %v1144_v33 = vadd.f32 1.0, %v1609_v34 }
 0x1af   : > { %v1613_v49 = vpop.eup %1612  ;;  %v1142_v41 = vadd.f32 1.0, %v1611_v23 }
 0x1b0   : > { %v1615_v5 = vpop.eup %1614  ;;  %v1136_v7 = vadd.f32 1.0, %v1613_v49  ;;  %v1160_v39 = vmul.f32 %v1144_v33, %v1096_v1 }
 0x1b1   : > { %v1617_v25 = vpop.eup %1616  ;;  %v1134_v45 = vadd.f32 1.0, %v1615_v5  ;;  %v1158_v22 = vmul.f32 %v1142_v41, %v1094_v29 }
 0x1b2   : > { %v1619_v62 = vpop.eup %1618  ;;  %v1152_v53 = vmul.f32 %v1136_v7, %v1088_v50  ;;  %v1137_v37 = vadd.f32 1.0, %v1617_v25  ;;  %v1272_v20 = vmul.f32 %v1235_v40, %v1160_v39 }
 0x1b3   : > { %v1621_v51 = vpop.eup %1620  ;;  %v1150_v18 = vmul.f32 %v1134_v45, %v1086_v54  ;;  %v1270_v44 = vmul.f32 %v1225_v42, %v1158_v22  ;;  %v1145_v21 = vadd.f32 1.0, %v1619_v62 }
 0x1b4   : > { %v1623_v11 = vpop.eup %1622  ;;  %v1135_v2 = vadd.f32 1.0, %v1621_v51  ;;  %v1264_v52 = vmul.f32 %v2347_v3, %v1152_v53  ;;  %v1153_v61 = vmul.f32 %v1137_v37, %v1089_v57  ;;  %v1515_v26 = vpack.c.bf16 %v1272_v20, %v1272_v20 }
 0x1b5   : > { %v1262_v10 = vmul.f32 %v2345_v19, %v1150_v18  ;;  %v1513_v15 = vpack.c.bf16 %v1270_v44, %v1270_v44  ;;  %v1143_v46 = vadd.f32 1.0, %v1623_v11  ;;  %v1161_v16 = vmul.f32 %v1145_v21, %v1097_v36  ;;  %v1245_v18 = vpop.permute.xlu1 %1244 }
 0x1b6   : > { %v1151_v27 = vmul.f32 %v1135_v2, %v1087_v24  ;;  %v1507_v0 = vpack.c.bf16 %v1264_v52, %v1264_v52  ;;  %v1265_v38 = vmul.f32 %v2359_v30, %v1153_v61  ;;  %1353 = vst.msk [vmem:[%s2389_s17 + $0x28] sm:$0xf] %vm1342_vm2, %v1515_v26 }
 0x1b7   : > { %v1505_v3 = vpack.c.bf16 %v1262_v10, %v1262_v10  ;;  %1351 = vst.msk [vmem:[%s2389_s17 + $0x20] sm:$0xf] %vm1342_vm2, %v1513_v15  ;;  %v1159_v8 = vmul.f32 %v1143_v46, %v1095_v35  ;;  %v1273_v4 = vmul.f32 %v1240_v14, %v1161_v16 }
 0x1b8   : > { %v1263_v19 = vmul.f32 %v2343_v32, %v1151_v27  ;;  %1345 = vst.msk [vmem:[%s2389_s17 + $0x8] sm:$0xf] %vm1342_vm2, %v1507_v0  ;;  %v1508_v56 = vpack.c.bf16 %v1265_v38, %v1265_v38 }
 0x1b9   : > { %1343 = vst.msk [vmem:[%s2389_s17] sm:$0xf] %vm1342_vm2, %v1505_v3  ;;  %v1271_v48 = vmul.f32 %v1230_v9, %v1159_v8  ;;  %v1516_v28 = vpack.c.bf16 %v1273_v4, %v1273_v4  ;;  %v1255_v16 = vpop.permute.xlu1 %1254 }
 0x1ba   : > { %v1506_v6 = vpack.c.bf16 %v1263_v19, %v1263_v19  ;;  %1346 = vst.msk [vmem:[%s2389_s17 + $0xc] sm:$0xf] %vm1342_vm2, %v1508_v56 }
 0x1bb   : > { %v1514_v30 = vpack.c.bf16 %v1271_v48, %v1271_v48  ;;  %1354 = vst.msk [vmem:[%s2389_s17 + $0x2c] sm:$0xf] %vm1342_vm2, %v1516_v28 }
 0x1bc   : > { %1344 = vst.msk [vmem:[%s2389_s17 + $0x4] sm:$0xf] %vm1342_vm2, %v1506_v6 }
 0x1bd   : > { %1352 = vst.msk [vmem:[%s2389_s17 + $0x24] sm:$0xf] %vm1342_vm2, %v1514_v30 }
 0x1d8   : > { %v1560_v43 = vpop.f32.mrb[4].mxu1 }
 0x1d9   : > { %v1061_v32 = vmul.f32 %v1560_v43, %v2352_v58  ;;  %v1025_v17 = vpop.f32.mrb[5].mxu1  ;;  %v1552_v59 = vpop.f32.mrb[4].mxu0 }
 0x1da   : > { %v1059_v12 = vmul.f32 %v2352_v58, %v1025_v17  ;;  %v1561_v31 = vpop.f32.mrb[6].mxu1  ;;  %v1053_v42 = vmul.f32 %v1552_v59, %v2352_v58  ;;  %v993_v23 = vpop.f32.mrb[5].mxu0 }
 0x1db   : > { %v1084_v34 = vadd.f32 %v2357_v63, %v1061_v32  ;;  %v1062_v9 = vmul.f32 %v1561_v31, %v2352_v58  ;;  %v1028_v1 = vpop.f32.mrb[7].mxu1  ;;  %v1051_v33 = vmul.f32 %v2352_v58, %v993_v23  ;;  %v1553_v29 = vpop.f32.mrb[6].mxu0 }
 0x1dc   : > { %v1082_v49 = vadd.f32 %v2357_v63, %v1059_v12  ;;  %v1076_v41 = vadd.f32 %v2357_v63, %v1053_v42  ;;  %v1054_v5 = vmul.f32 %v1553_v29, %v2352_v58  ;;  %v996_v54 = vpop.f32.mrb[7].mxu0  ;;  %v1060_v25 = vmul.f32 %v2352_v58, %v1028_v1 }
 0x1dd   : > { %v1116_v40 = vmul.f32 0.70710677, %v1084_v34  ;;  %v1074_v50 = vadd.f32 %v2357_v63, %v1051_v33  ;;  %v1085_v39 = vadd.f32 %v2357_v63, %v1062_v9  ;;  %v1052_v53 = vmul.f32 %v2352_v58, %v996_v54  ;;  %v1250_v58 = vpop.permute.xlu0 %1249 }
 0x1de   : > { %v1114_v7 = vmul.f32 0.70710677, %v1082_v49  ;;  %v1108_v24 = vmul.f32 0.70710677, %v1076_v41  ;;  %v1077_v45 = vadd.f32 %v2357_v63, %v1054_v5  ;;  %v1083_v37 = vadd.f32 %v2357_v63, %v1060_v25 }
 0x1df   : > { %1624 = verf.f32 %v1116_v40  ;;  %v1106_v57 = vmul.f32 0.70710677, %v1074_v50  ;;  %v1117_v62 = vmul.f32 0.70710677, %v1085_v39  ;;  %v1075_v35 = vadd.f32 %v2357_v63, %v1052_v53 }
 0x1e0   : > { %1626 = verf.f32 %v1114_v7  ;;  %v1109_v22 = vmul.f32 0.70710677, %v1077_v45  ;;  %v1115_v20 = vmul.f32 0.70710677, %v1083_v37  ;;  %v1100_v21 = vmul.f32 0.5, %v1084_v34 }
 0x1e1   : > { %1628 = verf.f32 %v1108_v24  ;;  %v1107_v51 = vmul.f32 0.70710677, %v1075_v35  ;;  %v1098_v52 = vmul.f32 0.5, %v1082_v49  ;;  %v1092_v14 = vmul.f32 0.5, %v1076_v41  ;;  %v1260_v9 = vpop.permute.xlu0 %1259 }
 0x1e2   : > { %1630 = verf.f32 %v1106_v57  ;;  %v1090_v63 = vmul.f32 0.5, %v1074_v50  ;;  %v1093_v4 = vmul.f32 0.5, %v1077_v45  ;;  %v1101_v28 = vmul.f32 0.5, %v1085_v39 }
 0x1e3   : > { %1632 = verf.f32 %v1109_v22  ;;  %v1099_v59 = vmul.f32 0.5, %v1083_v37 }
 0x1e4   : > { %1634 = verf.f32 %v1117_v62 }
 0x1e5   : > { %1636 = verf.f32 %v1115_v20 }
 0x1e6   : > { %1638 = verf.f32 %v1107_v51 }
 0x1e9   : > { %v1625_v44 = vpop.eup %1624 }
 0x1ea   : > { %v1627_v36 = vpop.eup %1626  ;;  %v1148_v11 = vadd.f32 1.0, %v1625_v44 }
 0x1eb   : > { %v1629_v2 = vpop.eup %1628  ;;  %v1146_v61 = vadd.f32 1.0, %v1627_v36 }
 0x1ec   : > { %v1631_v26 = vpop.eup %1630  ;;  %v1140_v10 = vadd.f32 1.0, %v1629_v2  ;;  %v1164_v15 = vmul.f32 %v1148_v11, %v1100_v21 }
 0x1ed   : > { %v1633_v46 = vpop.eup %1632  ;;  %v1138_v27 = vadd.f32 1.0, %v1631_v26  ;;  %v1162_v0 = vmul.f32 %v1146_v61, %v1098_v52 }
 0x1ee   : > { %v1635_v38 = vpop.eup %1634  ;;  %v1156_v3 = vmul.f32 %v1140_v10, %v1092_v14  ;;  %v1276_v8 = vmul.f32 %v1255_v16, %v1164_v15  ;;  %v1141_v19 = vadd.f32 1.0, %v1633_v46 }
 0x1ef   : > { %v1154_v56 = vmul.f32 %v1138_v27, %v1090_v63  ;;  %v1274_v48 = vmul.f32 %v1245_v18, %v1162_v0  ;;  %v1149_v6 = vadd.f32 1.0, %v1635_v38  ;;  %v1637_v30 = vpop.eup %1636 }
 0x1f0   : > { %v1268_v43 = vmul.f32 %v2380_v55, %v1156_v3  ;;  %v1519_v32 = vpack.c.bf16 %v1276_v8, %v1276_v8  ;;  %v1157_v17 = vmul.f32 %v1141_v19, %v1093_v4  ;;  %v1147_v34 = vadd.f32 1.0, %v1637_v30  ;;  %v1639_v23 = vpop.eup %1638 }
 0x1f1   : > { %v1266_v12 = vmul.f32 %v2362_v60, %v1154_v56  ;;  %v1517_v31 = vpack.c.bf16 %v1274_v48, %v1274_v48  ;;  %v1165_v42 = vmul.f32 %v1149_v6, %v1101_v28  ;;  %v1091_v55 = vmul.f32 0.5, %v1075_v35 }
 0x1f2   : > { %v1511_v1 = vpack.c.bf16 %v1268_v43, %v1268_v43  ;;  %1357 = vst.msk [vmem:[%s2389_s17 + $0x38] sm:$0xf] %vm1342_vm2, %v1519_v32  ;;  %v1269_v33 = vmul.f32 %v2383_v13, %v1157_v17  ;;  %v1139_v29 = vadd.f32 1.0, %v1639_v23  ;;  %v1163_v41 = vmul.f32 %v1147_v34, %v1099_v59 }
 0x1f3   : > { %v1509_v49 = vpack.c.bf16 %v1266_v12, %v1266_v12  ;;  %1355 = vst.msk [vmem:[%s2389_s17 + $0x30] sm:$0xf] %vm1342_vm2, %v1517_v31  ;;  %v1277_v60 = vmul.f32 %v1260_v9, %v1165_v42 }
 0x1f4   : > { %1349 = vst.msk [vmem:[%s2389_s17 + $0x18] sm:$0xf] %vm1342_vm2, %v1511_v1  ;;  %v1512_v40 = vpack.c.bf16 %v1269_v33, %v1269_v33  ;;  %v1155_v54 = vmul.f32 %v1139_v29, %v1091_v55  ;;  %v1275_v50 = vmul.f32 %v1250_v58, %v1163_v41 }
 0x1f5   : > { %1347 = vst.msk [vmem:[%s2389_s17 + $0x10] sm:$0xf] %vm1342_vm2, %v1509_v49  ;;  %v1520_v5 = vpack.c.bf16 %v1277_v60, %v1277_v60 }
 0x1f6   : > { %1350 = vst.msk [vmem:[%s2389_s17 + $0x1c] sm:$0xf] %vm1342_vm2, %v1512_v40  ;;  %v1267_v13 = vmul.f32 %v2377_v47, %v1155_v54  ;;  %v1518_v7 = vpack.c.bf16 %v1275_v50, %v1275_v50 }
 0x1f7   : > { %1358 = vst.msk [vmem:[%s2389_s17 + $0x3c] sm:$0xf] %vm1342_vm2, %v1520_v5 }
 0x1f8   : > { %v1510_v39 = vpack.c.bf16 %v1267_v13, %v1267_v13  ;;  %1356 = vst.msk [vmem:[%s2389_s17 + $0x34] sm:$0xf] %vm1342_vm2, %v1518_v7 }
 0x1fa   : > { %1348 = vst.msk [vmem:[%s2389_s17 + $0x14] sm:$0xf] %vm1342_vm2, %v1510_v39 }
 0x1fb PF: > { %s16_s21 = sadd.s32 1, %s1646_s21  }
 0x1fc   : > { %p13_p6 = scmp.ge.s32.totalorder %s16_s21, 4  }
 0x1fe   :  { %15 = sbr.rel (!%p13_p6) target bundleno = 1 (0x1), region = 80 }

// kernel: stem_forward.6
= control target key start
LH: loop header
LB: loop body
LE: loop exit
PB: predicated region body
PF: predicated region fallthrough
CT: control target
= control target key end

     0   :  { %s1465_s21 = smov 0   ;;  %s1584_s0 = inlined_call_operand.vmem [shape: bf16[96,8], index: 0, kind: input, shape index: {}, may-alias: {0,1}]   ;;  %s1585_s1 = inlined_call_operand.vmem [shape: bf16[96,8], index: 1, kind: input, shape index: {}, may-alias: {0,1}]   ;;  %s1586_s2 = inlined_call_operand.vmem [shape: bf16[96,8], index: 2, kind: input, shape index: {}, may-alias: {2,3}]   ;;  %s1587_s3 = inlined_call_operand.vmem [shape: bf16[96,8], index: 3, kind: input, shape index: {}, may-alias: {2,3}]   ;;  %s1588_s4 = inlined_call_operand.vmem [shape: bf16[96,8], index: 4, kind: input, shape index: {}, may-alias: {4,5}]   ;;  %s1589_s5 = inlined_call_operand.vmem [shape: bf16[96,8], index: 5, kind: input, shape index: {}, may-alias: {4,5}]   ;;  %s1590_s6 = inlined_call_operand.vmem [shape: bf16[96,8], index: 6, kind: input, shape index: {}, may-alias: {6,7}]   ;;  %s1591_s7 = inlined_call_operand.vmem [shape: bf16[96,8], index: 7, kind: input, shape index: {}, may-alias: {6,7}]   ;;  %s1592_s8 = inlined_call_operand.vmem [shape: bf16[72,16], index: 8, kind: input, shape index: {}]   ;;  %s1593_s9 = inlined_call_operand.vmem [shape: f32[1,16], index: 9, kind: input, shape index: {}]   ;;  %s1594_s10 = inlined_call_operand.vmem [shape: f32[1,16], index: 10, kind: input, shape index: {}]   ;;  %s1595_s11 = inlined_call_operand.vmem [shape: f32[64,1], index: 11, kind: input, shape index: {}]   ;;  %s1596_s12 = inlined_call_operand.vmem [shape: bf16[64,16], index: 12, kind: output, shape index: {}]  }
   0x1 LB: > { %s1223_s7 = sadd.s32 4294967295, %s1389_s21   ;;  %p1235_p0 = scmp.ge.s32.totalorder %s1389_s21, 1  ;;  %s1389_s21 = sphi %s1465_s21, %s22_s21  }
   0x2   : > { %p483_p1 = scmp.lt.s32.totalorder %s1389_s21, 3 }
   0x4   : > { %p484_p2 = pnand %p1235_p0, %p483_p1 }
   0x5   : > { %s1473_s22 = sshll.u32 (!%p484_p2), %s1223_s7, 2  ;;  %s1391_s17 = smov (!%p484_p2), 24   ;;  %vm731_vm0 = vsmask.f32 (!%p484_p2), 7424  ;;  %vm788_vm1 = vsmask.f32 (!%p484_p2), 5376 }
   0x6   : > { %487 = sbr.rel (%p484_p2) target bundleno = 405 (0x195), region = 68  ;;  %p574_p3 = scmp.lt.s32.totalorder (!%p484_p2), %s1473_s22, 11  ;;  %v1370_v40 = vld [vmem:[%s1592_s8] sm:$0xff] (!%p484_p2)   ;;  %v1371_v41 = vld [vmem:[%s1592_s8 + $0x8] sm:$0xff] (!%p484_p2)   ;;  %v1372_v55 = vld [vmem:[%s1592_s8 + $0x10] sm:$0xff] (!%p484_p2)   ;;  %vm836_vm2 = vcmask (!%p484_p2), 1044480  }
   0x7   : > { %s1313_s24 = sadd.s32 (!%p484_p2), 4, %s1473_s22  ;;  %s1392_s18 = smov (!%p484_p2), 8   ;;  %1325 = vmatprep.subr.bf16.mxu0 (!%p484_p2), %v1370_v40  ;;  %v1373_v63 = vld [vmem:[%s1592_s8 + $0x18] sm:$0xff] (!%p484_p2)   ;;  %vm927_vm3 = vcmask (!%p484_p2), 1043456   ;;  %vm846_vm4 = vcmask (!%p484_p2), 64512   ;;  %vm851_vm5 = vcmask (!%p484_p2), 130048  }
   0x8   : > { %p582_p4 = scmp.lt.s32.totalorder (!%p484_p2), %s1313_s24, 11  ;;  %s1393_s26 = smov (!%p484_p2), 32   ;;  %1326 = vmatpush3.bf16.msra.mxu0 (!%p484_p2), %v1370_v40  ;;  %vm856_vm6 = vcmask (!%p484_p2), 195584   ;;  %vm861_vm7 = vcmask (!%p484_p2), 261120   ;;  %vm866_vm8 = vcmask (!%p484_p2), 326656   ;;  %vm871_vm9 = vcmask (!%p484_p2), 392192  }
   0x9   : > { %s1394_s20 = smov (!%p484_p2), 16   ;;  %1327 = vmatprep.subr.bf16.mxu0 (!%p484_p2), %v1371_v41  ;;  %p638_p5 = scmp.lt.s32.totalorder (!%p484_p2), %s1473_s22, 7  ;;  %vm876_vm10 = vcmask (!%p484_p2), 457728   ;;  %vm881_vm11 = vcmask (!%p484_p2), 523264   ;;  %vm922_vm12 = vcmask (!%p484_p2), 588800   ;;  %vm1066_vm13 = vcmask (!%p484_p2), 125952  }
   0xc   : > { %1328 = vmatpush3.bf16.msra.mxu0 (!%p484_p2), %v1371_v41 }
   0xd   : > { %s575_s23 = scalar_select %p574_p3, %s1473_s22, 11  ;;  %1329 = vmatprep.subr.bf16.mxu0 %v1372_v55 }
   0xe   : > { %s1598_s24 = smov (!%p582_p4, %s1313_s24), 11  ;;  %s1600_s22 = smov (!%p638_p5, %s1473_s22), 7 }
   0xf   : > { %s1237_s25 = sshll.u32 %s575_s23, 2  ;;  %s1498_s23 = sshll.u32 %s1598_s24, 2 }
  0x10   : > { %s609_s28 = scalar_lea.vmem %s1588_s4, %s1237_s25  ;;  %s593_s13 = scalar_lea.vmem %s1586_s2, %s1237_s25  ;;  %1330 = vmatpush3.bf16.msra.mxu0 %v1372_v55 }
  0x11   : > { %v1359_v0 = vld [vmem:[%s609_s28 + $0x8] sm:$0xff]   ;;  %s1487_s16 = scalar_lea.vmem %s1590_s6, %s1237_s25  ;;  %v1489_v1 = vld [vmem:[%s593_s13] sm:$0xff]   ;;  %s577_s7 = scalar_lea.vmem %s1584_s0, %s1237_s25  ;;  %1331 = vmatprep.subr.bf16.mxu0 %v1373_v63 }
  0x12   : > { %758 = vrot.lane.b32.xlu1 %v1359_v0, %s1391_s17  ;;  %v1361_v2 = vld [vmem:[%s1487_s16 + $0x8] sm:$0xff]   ;;  %v772_v3 = vshll.u32 %v1359_v0, 16  ;;  %727 = vrot.lane.b32.xlu0 %v1489_v1, %s1392_s18  ;;  %v807_v4 = vshrl.u32 %v1489_v1, 16  ;;  %v810_v6 = vshll.u32 %v1489_v1, 16  ;;  %v1363_v7 = vld [vmem:[%s609_s28] sm:$0xff]   ;;  %s585_s30 = scalar_lea.vmem %s1585_s1, %s1498_s23  ;;  %s617_s28 = scalar_lea.vmem %s1589_s5, %s1498_s23  ;;  %v776_v15 = vshrl.u32 %v1359_v0, 16 }
  0x13   : > { %v1362_v5 = vld [vmem:[%s593_s13 + $0x8] sm:$0xff]   ;;  %v767_v11 = vshll.u32 %v1363_v7, 16  ;;  %v1506_v12 = vld [vmem:[%s577_s7] sm:$0xff]   ;;  %v765_v14 = vshrl.u32 %v1363_v7, 16  ;;  %s601_s15 = scalar_lea.vmem %s1587_s3, %s1498_s23  ;;  %s1254_s13 = sshll.u32 %s1600_s22, 3 }
  0x14   : > { %v815_v8 = vshrl.u32 %v1362_v5, 16  ;;  %v774_v9 = vrot.slane %v772_v3, 1  ;;  %v818_v10 = vshll.u32 %v1362_v5, 16  ;;  %v1508_v13 = vld [vmem:[%s577_s7 + $0x8] sm:$0xff]   ;;  %v733_v16 = vshrl.u32 %v1506_v12, 16  ;;  %v1517_v19 = vld [vmem:[%s585_s30] sm:$0xff]   ;;  %1332 = vmatpush3.bf16.msra.mxu0 %v1373_v63 }
  0x15   : > { %v735_v17 = vshll.u32 %v1506_v12, 16  ;;  %v740_v18 = vshll.u32 %v1508_v13, 16  ;;  %v744_v20 = vshrl.u32 %v1508_v13, 16  ;;  %v769_v21 = vrot.slane %v767_v11, 1  ;;  %v1366_v24 = vld [vmem:[%s1487_s16] sm:$0xff]   ;;  %s1396_s30 = smov 48   ;;  %s641_s16 = scalar_lea.vmem %s1595_s11, %s1254_s13 }
  0x16   : > { %762 = vrot.lane.b32.xlu1 %v1361_v2, %s1393_s26  ;;  %729 = vrot.lane.b32.xlu0 %v1362_v5, %s1392_s18  ;;  %v748_v25 = vshll.u32 %v1517_v19, 16  ;;  %v1368_v26 = vld [vmem:[%s617_s28] sm:$0xff]   ;;  %v789_v27 = vrot.slane %v733_v16, 2  ;;  %v778_v38 = vor.u32 %v776_v15, %v774_v9  ;;  %v796_v39 = vshrl.u32 %v1517_v19, 16  ;;  %s1398_s28 = smov 56   ;;  %v1025_v15 = vld [vmem:[%s641_s16 + $0x18] sm:$0xff] }
  0x17   : > { %v737_v22 = vrot.slane %v735_v17, 1  ;;  %v742_v23 = vrot.slane %v740_v18, 1  ;;  %v770_v28 = vor.u32 %v769_v21, %v765_v14  ;;  %v790_v29 = vrot.slane %v735_v17, 3  ;;  %v1369_v36 = vld [vmem:[%s601_s15] sm:$0xff]   ;;  %v1024_v17 = vld [vmem:[%s641_s16 + $0x10] sm:$0xff]  ;;  %s1256_s23 = sshll.u32 %s1600_s22, 2 }
  0x18   : > { %v792_v30 = vrot.slane %v744_v20, 2  ;;  %v793_v31 = vrot.slane %v740_v18, 3  ;;  %v750_v34 = vrot.slane %v748_v25, 1  ;;  %v780_v35 = vshll.u32 %v1368_v26, 16  ;;  %v1022_v11 = vld [vmem:[%s641_s16] sm:$0xff]  ;;  %s647_s29 = scalar_lea.vmem %s1596_s12, %s1256_s23 }
  0x19   : > { %v738_v32 = vor.u32 %v737_v22, %v733_v16  ;;  %v746_v33 = vor.u32 %v744_v20, %v742_v23  ;;  %v775_v37 = vsel %vm731_vm0, %v770_v28, %v774_v9  ;;  %v791_v44 = vor.u32 %v790_v29, %v789_v27  ;;  %v1023_v16 = vld [vmem:[%s641_s16 + $0x8] sm:$0xff] }
  0x1a   : > { %756 = vrot.lane.b32.xlu0 %v1363_v7, %s1391_s17  ;;  %v794_v45 = vor.u32 %v793_v31, %v792_v30  ;;  %v782_v46 = vrot.slane %v780_v35, 1  ;;  %v799_v47 = vrot.slane %v748_v25, 3  ;;  %v809_v48 = vrot.slane %v807_v4, 2  ;;  %s1399_s17 = smov 64  }
  0x1b   : > { %v743_v42 = vsel %vm731_vm0, %v738_v32, %v742_v23  ;;  %v751_v43 = vsel %vm731_vm0, %v746_v33, %v750_v34  ;;  %v812_v49 = vrot.slane %v810_v6, 3  ;;  %v798_v50 = vrot.slane %v796_v39, 2  ;;  %v1374_v6 = vld [vmem:[%s1592_s8 + $0x20] ss:$0 sps:$4 sm:$0xff]  }
  0x1c   : > { %752 = vrot.lane.b32.xlu1 %v743_v42, %s1394_s20  ;;  %v817_v51 = vrot.slane %v815_v8, 2  ;;  %v820_v52 = vrot.slane %v818_v10, 3  ;;  %v824_v53 = vshrl.u32 %v1369_v36, 16  ;;  %v827_v54 = vshll.u32 %v1369_v36, 16  ;;  %1339 = vmatprep.subr.msk.bf16.mxu0 %vm927_vm3, %v1374_v6 }
  0x1d   : > { %v795_v56 = vsel %vm788_vm1, %v791_v44, %v794_v45  ;;  %v813_v57 = vor.u32 %v812_v49, %v809_v48  ;;  %v783_v59 = vsel %vm731_vm0, %v778_v38, %v782_v46  ;;  %v800_v60 = vor.u32 %v799_v47, %v798_v50  ;;  %v1275_v48 = vld [vmem:[%s1593_s9] ss:$0 sm:$0xff] }
  0x1e   : > { %760 = vrot.lane.b32.xlu0 %v1366_v24, %s1393_s26  ;;  %s1395_s26 = smov 40   ;;  %v821_v58 = vor.u32 %v820_v52, %v817_v51  ;;  %v826_v61 = vrot.slane %v824_v53, 2  ;;  %v829_v62 = vrot.slane %v827_v54, 3  ;;  %v837_v1 = vrot.slane %v1506_v12, 3  ;;  %v1276_v50 = vld [vmem:[%s1594_s10] ss:$0 sm:$0xff] }
  0x1f   : > { %v838_v2 = vrot.slane %v1508_v13, 3  ;;  %v801_v3 = vsel %vm788_vm1, %v794_v45, %v800_v60  ;;  %v1397_v5 = vmov 0   ;;  %v840_v9 = vrot.slane %v1517_v19, 3 }
  0x20   : > { %754 = vrot.lane.b32.xlu1 %v751_v43, %s1394_s20  ;;  %v822_v0 = vsel %vm788_vm1, %v813_v57, %v821_v58  ;;  %v830_v4 = vor.u32 %v829_v62, %v826_v61  ;;  %1357 = vset.pattern.permute.xlu0 %v1397_v5  ;;  %v929_v10 = vsel %vm927_vm3, %v1374_v6, 0 }
  0x21   : > { %1358 = vset.pattern.permute.xlu1 %v1397_v5  ;;  %v839_v7 = vsel %vm836_vm2, %v837_v1, %v838_v2  ;;  %v841_v14 = vsel %vm836_vm2, %v838_v2, %v840_v9  ;;  %1334 = vmatpush3.bf16.msra.mxu0 %v929_v10 }
  0x22   : > { %784 = vrot.lane.b32.xlu0 %v775_v37, %s1395_s26  ;;  %v831_v8 = vsel %vm788_vm1, %v821_v58, %v830_v4 }
  0x24   : > { %786 = vrot.lane.b32.xlu1 %v783_v59, %s1395_s26 }
  0x26   : > { %802 = vrot.lane.b32.xlu0 %v795_v56, %s1396_s30 }
  0x28   : > { %804 = vrot.lane.b32.xlu1 %v801_v3, %s1396_s30 }
  0x2a   : > { %832 = vrot.lane.b32.xlu0 %v822_v0, %s1398_s28 }
  0x2c   : > { %834 = vrot.lane.b32.xlu1 %v831_v8, %s1398_s28 }
  0x2e   : > { %842 = vrot.lane.b32.xlu0 %v839_v7, %s1399_s17 }
  0x30   : > { %844 = vrot.lane.b32.xlu1 %v841_v14, %s1399_s17 }
  0x32   : > { %1028 = vperm.xlu0 %1357, %v1022_v11  }
  0x34   : > { %1033 = vperm.xlu1 %1358, %v1023_v16  }
  0x36   : > { %1043 = vperm.xlu0 %1357, %v1025_v15  }
  0x38   : > { %1038 = vperm.xlu1 %1358, %v1024_v17  }
  0x84   : > { %v728_v18 = vpop.permute.xlu0 %727  ;;  %v759_v19 = vpop.permute.xlu1 %758 }
  0x85   : > { %v848_v27 = vsel %vm846_vm4, %v1506_v12, %v728_v18 }
  0x88   : > { %v730_v20 = vpop.permute.xlu0 %729  ;;  %v763_v21 = vpop.permute.xlu1 %762 }
  0x89   : > { %v850_v29 = vsel %vm846_vm4, %v1508_v13, %v730_v20 }
  0x8c   : > { %v757_v22 = vpop.permute.xlu0 %756 }
  0x8e   : > { %v753_v24 = vpop.permute.xlu1 %752 }
  0x8f   : > { %v853_v30 = vsel %vm851_vm5, %v848_v27, %v753_v24 }
  0x90   : > { %v761_v23 = vpop.permute.xlu0 %760  ;;  %v858_v33 = vsel %vm856_vm6, %v853_v30, %v757_v22 }
  0x91   : > { %v863_v35 = vsel %vm861_vm7, %v858_v33, %v761_v23 }
  0x92   : > { %v755_v26 = vpop.permute.xlu1 %754 }
  0x93   : > { %v855_v32 = vsel %vm851_vm5, %v850_v29, %v755_v26 }
  0x94   : > { %v785_v25 = vpop.permute.xlu0 %784  ;;  %v860_v36 = vsel %vm856_vm6, %v855_v32, %v759_v19 }
  0x95   : > { %v868_v38 = vsel %vm866_vm8, %v863_v35, %v785_v25  ;;  %v865_v13 = vsel %vm861_vm7, %v860_v36, %v763_v21 }
  0x96   : > { %v787_v31 = vpop.permute.xlu1 %786 }
  0x97   : > { %v870_v43 = vsel %vm866_vm8, %v865_v13, %v787_v31 }
  0x98   : > { %v803_v28 = vpop.permute.xlu0 %802 }
  0x99   : > { %v873_v12 = vsel %vm871_vm9, %v868_v38, %v803_v28 }
  0x9a   : > { %v805_v37 = vpop.permute.xlu1 %804 }
  0x9b   : > { %v875_v44 = vsel %vm871_vm9, %v870_v43, %v805_v37 }
  0x9c   : > { %v833_v34 = vpop.permute.xlu0 %832 }
  0x9d   : > { %v878_v39 = vsel %vm876_vm10, %v873_v12, %v833_v34 }
  0x9e   : > { %v835_v41 = vpop.permute.xlu1 %834 }
  0x9f   : > { %v880_v45 = vsel %vm876_vm10, %v875_v44, %v835_v41 }
  0xa0   : > { %v843_v40 = vpop.permute.xlu0 %842 }
  0xa1   : > { %v883_v42 = vsel %vm881_vm11, %v878_v39, %v843_v40 }
  0xa2   : > { %1335 = vmatprep.mubr.msk.bf16.mxu0 %vm922_vm12, %v883_v42  ;;  %v845_v46 = vpop.permute.xlu1 %844 }
  0xa3   : > { %v885_v47 = vsel %vm881_vm11, %v880_v45, %v845_v46 }
  0xa4   : > { %1336 = vmatmul.mubr.msk.bf16.vlgmr.msra.gmra.mrb[0].mxu0 %vm922_vm12, %v885_v47 }
  0xb1   : > { %v1029_v3 = vpop.permute.xlu0 %1028 }
  0xb3   : > { %v1034_v2 = vpop.permute.xlu1 %1033 }
  0xb5   : > { %v1044_v21 = vpop.permute.xlu0 %1043 }
  0xb7   : > { %v1039_v20 = vpop.permute.xlu1 %1038 }
 0x177   : > { %v1337_v49 = vpop.f32.mrb[0].mxu0 }
 0x178   : > { %v989_v51 = vmul.f32 %v1337_v49, %v1275_v48  ;;  %v965_v52 = vpop.f32.mrb[1].mxu0 }
 0x179   : > { %v987_v53 = vmul.f32 %v1275_v48, %v965_v52  ;;  %v1338_v54 = vpop.f32.mrb[2].mxu0 }
 0x17a   : > { %v1000_v55 = vadd.f32 %v1276_v50, %v989_v51  ;;  %v990_v56 = vmul.f32 %v1338_v54, %v1275_v48  ;;  %v968_v57 = vpop.f32.mrb[3].mxu0 }
 0x17b   : > { %v998_v58 = vadd.f32 %v1276_v50, %v987_v53  ;;  %v988_v59 = vmul.f32 %v1275_v48, %v968_v57 }
 0x17c   : > { %v1008_v60 = vmul.f32 0.70710677, %v1000_v55  ;;  %v1001_v61 = vadd.f32 %v1276_v50, %v990_v56  ;;  %v1004_v6 = vmul.f32 0.5, %v1000_v55 }
 0x17d   : > { %v1006_v62 = vmul.f32 0.70710677, %v998_v58  ;;  %v999_v63 = vadd.f32 %v1276_v50, %v988_v59  ;;  %v1002_v9 = vmul.f32 0.5, %v998_v58 }
 0x17e   : > { %1375 = verf.f32 %v1008_v60  ;;  %v1009_v0 = vmul.f32 0.70710677, %v1001_v61  ;;  %v1005_v15 = vmul.f32 0.5, %v1001_v61 }
 0x17f   : > { %1377 = verf.f32 %v1006_v62  ;;  %v1007_v1 = vmul.f32 0.70710677, %v999_v63  ;;  %v1003_v17 = vmul.f32 0.5, %v999_v63 }
 0x180   : > { %1379 = verf.f32 %v1009_v0 }
 0x181   : > { %1381 = verf.f32 %v1007_v1 }
 0x188   : > { %v1376_v4 = vpop.eup %1375 }
 0x189   : > { %v1378_v5 = vpop.eup %1377  ;;  %v1016_v7 = vadd.f32 1.0, %v1376_v4 }
 0x18a   : > { %v1380_v8 = vpop.eup %1379  ;;  %v1014_v10 = vadd.f32 1.0, %v1378_v5 }
 0x18b   : > { %v1382_v11 = vpop.eup %1381  ;;  %v1020_v14 = vmul.f32 %v1016_v7, %v1004_v6  ;;  %v1017_v16 = vadd.f32 1.0, %v1380_v8 }
 0x18c   : > { %v1015_v18 = vadd.f32 1.0, %v1382_v11  ;;  %v1018_v19 = vmul.f32 %v1014_v10, %v1002_v9 }
 0x18d   : > { %v1021_v22 = vmul.f32 %v1017_v16, %v1005_v15  ;;  %v1048_v25 = vmul.f32 %v1039_v20, %v1020_v14 }
 0x18e   : > { %v1019_v23 = vmul.f32 %v1015_v18, %v1003_v17  ;;  %v1046_v24 = vmul.f32 %v1029_v3, %v1018_v19 }
 0x18f   : > { %v1049_v28 = vmul.f32 %v1044_v21, %v1021_v22  ;;  %v1310_v30 = vpack.c.bf16 %v1048_v25, %v1048_v25 }
 0x190   : > { %v1047_v26 = vmul.f32 %v1034_v2, %v1019_v23  ;;  %v1308_v27 = vpack.c.bf16 %v1046_v24, %v1046_v24 }
 0x191   : > { %v1311_v31 = vpack.c.bf16 %v1049_v28, %v1049_v28  ;;  %1069 = vst.msk [vmem:[%s647_s29 + $0x8] sm:$0xf] %vm1066_vm13, %v1310_v30 }
 0x192   : > { %v1309_v29 = vpack.c.bf16 %v1047_v26, %v1047_v26  ;;  %1067 = vst.msk [vmem:[%s647_s29] sm:$0xf] %vm1066_vm13, %v1308_v27 }
 0x193   : > { %1070 = vst.msk [vmem:[%s647_s29 + $0xc] sm:$0xf] %vm1066_vm13, %v1311_v31 }
 0x194   : > { %1068 = vst.msk [vmem:[%s647_s29 + $0x4] sm:$0xf] %vm1066_vm13, %v1309_v29 }
 0x195 PF: > { %s22_s21 = sadd.s32 1, %s1389_s21  }
 0x196   : > { %p19_p6 = scmp.ge.s32.totalorder %s22_s21, 4  }
 0x198   :  { %21 = sbr.rel (!%p19_p6) target bundleno = 1 (0x1), region = 122 }

// kernel: stem_forward.7
= control target key start
LH: loop header
LB: loop body
LE: loop exit
PB: predicated region body
PF: predicated region fallthrough
CT: control target
= control target key end

     0   :  { %s1144_s27 = smov 0   ;;  %s1467_s0 = inlined_call_operand.vmem [shape: bf16[144,16], index: 0, kind: input, shape index: {}, may-alias: {0,1}]   ;;  %s1468_s1 = inlined_call_operand.vmem [shape: bf16[144,16], index: 1, kind: input, shape index: {}, may-alias: {0,1}]   ;;  %s1469_s2 = inlined_call_operand.vmem [shape: bf16[144,16], index: 2, kind: input, shape index: {}]   ;;  %s1470_s3 = inlined_call_operand.vmem [shape: f32[1,16], index: 3, kind: input, shape index: {}]   ;;  %s1471_s4 = inlined_call_operand.vmem [shape: f32[1,16], index: 4, kind: input, shape index: {}]   ;;  %s1472_s5 = inlined_call_operand.vmem [shape: f32[96,1], index: 5, kind: input, shape index: {}]   ;;  %s1473_s6 = inlined_call_operand.vmem [shape: f32[1,16], index: 6, kind: input, shape index: {}]   ;;  %s1474_s7 = inlined_call_operand.vmem [shape: f32[1,16], index: 7, kind: input, shape index: {}]   ;;  %s1475_s8 = inlined_call_operand.vmem [shape: f32[96,16], index: 8, kind: output, shape index: {}]  }
   0x1 LB: > { %s990_s28 = sadd.s32 4294967295, %s1089_s27   ;;  %p994_p0 = scmp.ge.s32.totalorder %s1089_s27, 1  ;;  %s1089_s27 = sphi %s1144_s27, %s18_s27  }
   0x2   : > { %p293_p1 = scmp.lt.s32.totalorder %s1089_s27, 3 }
   0x4   : > { %p294_p2 = pnand %p994_p0, %p293_p1 }
   0x5   : > { %s1152_s29 = smul.u32 (!%p294_p2), 6, %s990_s28  ;;  %vm445_vm0 = vcmask (!%p294_p2), 1044480   ;;  %v1062_v0 = vld [vmem:[%s1469_s2] sm:$0xff] (!%p294_p2)   ;;  %vm431_vm1 = vcmask (!%p294_p2), 1046528   ;;  %v1091_v1 = vmov (!%p294_p2), 0   ;;  %v1063_v2 = vld [vmem:[%s1469_s2 + $0x8] sm:$0xff] (!%p294_p2)  }
   0x6   : > { %297 = sbr.rel (%p294_p2) target bundleno = 776 (0x308), region = 52  ;;  %1022 = vmatprep.subr.bf16.mxu1 (!%p294_p2), %v1091_v1  ;;  %674 = vmatprep.subr.bf16.mxu0 (!%p294_p2), %v1091_v1  ;;  %vm497_vm2 = vcmask (!%p294_p2), 1041408   ;;  %s345_s13 = sadd.s32 (!%p294_p2), 1, %s990_s28  ;;  %vm483_vm3 = vcmask (!%p294_p2), 1043456   ;;  %v1064_v3 = vld [vmem:[%s1469_s2 + $0x10] sm:$0xff] (!%p294_p2)   ;;  %v1065_v11 = vld [vmem:[%s1469_s2 + $0x18] sm:$0xff] (!%p294_p2)  }
   0x7   : > { %p340_p3 = scmp.lt.s32.totalorder (!%p294_p2), %s1152_s29, 17  ;;  %1031 = vmatpush1.bf16.msra.mxu1 (!%p294_p2), %v1062_v0  ;;  %675 = vmatpush1.bf16.msra.mxu0 (!%p294_p2), %v1062_v0  ;;  %s996_s15 = smul.u32 (!%p294_p2), 6, %s345_s13  ;;  %vm396_vm4 = vsmask.f32 (!%p294_p2), 7424  ;;  %vm459_vm5 = vsmask.f32 (!%p294_p2), 4352 }
   0x8   : > { %1023 = vmatprep.subr.bf16.mxu1 (!%p294_p2), %v1091_v1  ;;  %676 = vmatprep.subr.bf16.mxu0 (!%p294_p2), %v1091_v1  ;;  %s1092_s24 = smov (!%p294_p2), 48   ;;  %s1093_s25 = smov (!%p294_p2), 32   ;;  %v1066_v24 = vld [vmem:[%s1469_s2 + $0x20] sm:$0xff] (!%p294_p2)   ;;  %vm511_vm6 = vsmask.f32 (!%p294_p2), 1280  ;;  %v1067_v48 = vld [vmem:[%s1469_s2 + $0x28] sm:$0xff] (!%p294_p2)  }
   0x9   : > { %1057 = vset.pattern.permute.xlu1 (!%p294_p2), %v1091_v1  ;;  %1056 = vset.pattern.permute.xlu0 (!%p294_p2), %v1091_v1  ;;  %p348_p4 = scmp.lt.s32.totalorder (!%p294_p2), %s996_s15, 17  ;;  %s1094_s11 = smov (!%p294_p2), 96   ;;  %v1068_v54 = vld [vmem:[%s1469_s2 + $0x30] sm:$0xff] (!%p294_p2)   ;;  %v1069_v62 = vld [vmem:[%s1469_s2 + $0x38] sm:$0xff] (!%p294_p2)   ;;  %vm533_vm7 = vcmask (!%p294_p2), 1040384   ;;  %vm541_vm8 = vcmask (!%p294_p2), 130048  }
   0xa   : > { %s1095_s12 = smov (!%p294_p2), 80   ;;  %s1097_s18 = smov (!%p294_p2), 64   ;;  %vm548_vm9 = vcmask (!%p294_p2), 261120   ;;  %vm555_vm10 = vcmask (!%p294_p2), 392192   ;;  %vm562_vm11 = vcmask (!%p294_p2), 523264   ;;  %vm569_vm12 = vcmask (!%p294_p2), 654336  }
   0xb   : > { %1032 = vmatpush1.bf16.msra.mxu1 (!%p294_p2), %v1063_v2  ;;  %677 = vmatpush1.bf16.msra.mxu0 (!%p294_p2), %v1063_v2  ;;  %s1098_s19 = smov (!%p294_p2), 112   ;;  %vm576_vm13 = vcmask (!%p294_p2), 785408   ;;  %vm583_vm14 = vcmask (!%p294_p2), 916480   ;;  %p356_p5 = scmp.lt.s32.totalorder (!%p294_p2), %s1152_s29, 11 }
   0xc   : > { %1024 = vmatprep.subr.bf16.mxu1 (!%p294_p2), %v1091_v1  ;;  %678 = vmatprep.subr.bf16.mxu0 (!%p294_p2), %v1091_v1 }
   0xd   : > { %s341_s10 = scalar_select %p340_p3, %s1152_s29, 17 }
   0xe   : > { %s1477_s15 = smov (!%p348_p4, %s996_s15), 17  ;;  %s1479_s29 = smov (!%p356_p5, %s1152_s29), 11 }
   0xf   : > { %s995_s14 = sshll.u32 %s341_s10, 2  ;;  %1033 = vmatpush1.bf16.msra.mxu1 %v1064_v3  ;;  %679 = vmatpush1.bf16.msra.mxu0 %v1064_v3  ;;  %s997_s23 = sshll.u32 %s1477_s15, 2 }
  0x10   : > { %s343_s20 = scalar_lea.vmem %s1467_s0, %s995_s14  ;;  %1025 = vmatprep.subr.bf16.mxu1 %v1091_v1  ;;  %680 = vmatprep.subr.bf16.mxu0 %v1091_v1  ;;  %s351_s30 = scalar_lea.vmem %s1468_s1, %s997_s23 }
  0x11   : > { %v1174_v4 = vld [vmem:[%s343_s20 + $0x8] sm:$0xff]   ;;  %v1176_v5 = vld [vmem:[%s343_s20 + $0x10] sm:$0xff]   ;;  %v1180_v6 = vld [vmem:[%s343_s20] sm:$0xff]   ;;  %s1096_s15 = smov 16  }
  0x12   : > { %v447_v7 = vrot.slane %v1174_v4, 3  ;;  %v449_v8 = vrot.slane %v1176_v5, 3  ;;  %v433_v9 = vrot.slane %v1174_v4, 1  ;;  %v435_v10 = vrot.slane %v1176_v5, 1  ;;  %v1230_v32 = vld [vmem:[%s351_s30] sm:$0xff]   ;;  %s998_s30 = sshll.u32 %s1479_s29, 3 }
  0x13   : > { %v499_v12 = vrot.slane %v1174_v4, 6  ;;  %v501_v13 = vrot.slane %v1176_v5, 6  ;;  %v485_v14 = vrot.slane %v1174_v4, 4  ;;  %v487_v15 = vrot.slane %v1176_v5, 4  ;;  %1034 = vmatpush1.bf16.msra.mxu1 %v1065_v11  ;;  %681 = vmatpush1.bf16.msra.mxu0 %v1065_v11 }
  0x14   : > { %v450_v16 = vsel %vm445_vm0, %v447_v7, %v449_v8  ;;  %v436_v17 = vsel %vm431_vm1, %v433_v9, %v435_v10  ;;  %v1202_v18 = vshll.u32 %v1174_v4, 16  ;;  %v409_v19 = vshrl.u32 %v1174_v4, 16  ;;  %1026 = vmatprep.subr.bf16.mxu1 %v1091_v1  ;;  %682 = vmatprep.subr.bf16.mxu0 %v1091_v1 }
  0x15   : > { %455 = vrot.lane.b32.xlu1 %v450_v16, %s1092_s24  ;;  %441 = vrot.lane.b32.xlu0 %v436_v17, %s1093_s25  ;;  %v502_v20 = vsel %vm497_vm2, %v499_v12, %v501_v13  ;;  %v488_v21 = vsel %vm483_vm3, %v485_v14, %v487_v15  ;;  %v413_v22 = vshll.u32 %v1176_v5, 16  ;;  %v432_v23 = vrot.slane %v1180_v6, 1  ;;  %v1070_v17 = vld [vmem:[%s1469_s2 + $0x40] sm:$0xff]  }
  0x16   : > { %v407_v25 = vrot.slane %v1202_v18, 1  ;;  %v417_v26 = vshrl.u32 %v1176_v5, 16  ;;  %v463_v27 = vrot.slane %v409_v19, 3  ;;  %v464_v28 = vrot.slane %v1202_v18, 4 }
  0x17   : > { %v415_v29 = vrot.slane %v413_v22, 1  ;;  %v468_v30 = vrot.slane %v413_v22, 4  ;;  %v515_v31 = vrot.slane %v409_v19, 6  ;;  %v434_v34 = vsel %vm431_vm1, %v432_v23, %v433_v9  ;;  %1035 = vmatpush1.bf16.msra.mxu1 %v1066_v24  ;;  %683 = vmatpush1.bf16.msra.mxu0 %v1066_v24 }
  0x18   : > { %v411_v33 = vor.u32 %v409_v19, %v407_v25  ;;  %v467_v35 = vrot.slane %v417_v26, 3  ;;  %v516_v36 = vrot.slane %v1202_v18, 7  ;;  %v1238_v37 = vor.u32 %v464_v28, %v463_v27  ;;  %1027 = vmatprep.subr.bf16.mxu1 %v1091_v1  ;;  %684 = vmatprep.subr.bf16.mxu0 %v1091_v1 }
  0x19   : > { %507 = vrot.lane.b32.xlu1 %v502_v20, %s1094_s11  ;;  %493 = vrot.lane.b32.xlu0 %v488_v21, %s1095_s12  ;;  %v519_v38 = vrot.slane %v417_v26, 6  ;;  %v520_v39 = vrot.slane %v413_v22, 7  ;;  %v1241_v40 = vshll.u32 %v1180_v6, 16  ;;  %v1249_v44 = vshrl.u32 %v1180_v6, 16 }
  0x1a   : > { %v416_v41 = vsel %vm396_vm4, %v411_v33, %v415_v29  ;;  %v1244_v42 = vor.u32 %v468_v30, %v467_v35  ;;  %v1246_v43 = vor.u32 %v516_v36, %v515_v31  ;;  %v1255_v47 = vshll.u32 %v1230_v32, 16 }
  0x1b   : > { %v1251_v45 = vor.u32 %v520_v39, %v519_v38  ;;  %v402_v46 = vrot.slane %v1241_v40, 1  ;;  %v419_v49 = vor.u32 %v417_v26, %v415_v29  ;;  %1036 = vmatpush1.bf16.msra.mxu1 %v1067_v48  ;;  %685 = vmatpush1.bf16.msra.mxu0 %v1067_v48  ;;  %v446_v55 = vrot.slane %v1180_v6, 3 }
  0x1c   : > { %v470_v50 = vsel %vm459_vm5, %v1238_v37, %v1244_v42  ;;  %v423_v53 = vrot.slane %v1255_v47, 1  ;;  %1028 = vmatprep.subr.bf16.mxu1 %v1091_v1  ;;  %686 = vmatprep.subr.bf16.mxu0 %v1091_v1  ;;  %v437_v56 = vrot.slane %v1230_v32, 1  ;;  %v460_v57 = vrot.slane %v1249_v44, 3 }
  0x1d   : > { %427 = vrot.lane.b32.xlu0 %v416_v41, %s1096_s15  ;;  %439 = vrot.lane.b32.xlu1 %v434_v34, %s1093_s25  ;;  %v522_v51 = vsel %vm511_vm6, %v1246_v43, %v1251_v45  ;;  %v403_v52 = vor.u32 %v402_v46, %v1249_v44  ;;  %v461_v58 = vrot.slane %v1241_v40, 4  ;;  %v471_v61 = vshrl.u32 %v1230_v32, 16 }
  0x1e   : > { %v424_v60 = vsel %vm396_vm4, %v419_v49, %v423_v53  ;;  %v448_v63 = vsel %vm445_vm0, %v446_v55, %v447_v7  ;;  %v438_v0 = vsel %vm431_vm1, %v435_v10, %v437_v56  ;;  %v535_v3 = vrot.slane %v1174_v4, 7 }
  0x1f   : > { %v408_v59 = vsel %vm396_vm4, %v403_v52, %v407_v25  ;;  %1037 = vmatpush1.bf16.msra.mxu1 %v1068_v54  ;;  %687 = vmatpush1.bf16.msra.mxu0 %v1068_v54  ;;  %v462_v2 = vor.u32 %v461_v58, %v460_v57  ;;  %v451_v9 = vrot.slane %v1230_v32, 3  ;;  %v473_v11 = vrot.slane %v471_v61, 3 }
  0x20   : > { %1029 = vmatprep.subr.bf16.mxu1 %v1091_v1  ;;  %688 = vmatprep.subr.bf16.mxu0 %v1091_v1  ;;  %v474_v7 = vrot.slane %v1255_v47, 4  ;;  %v537_v16 = vrot.slane %v1176_v5, 7  ;;  %v484_v18 = vrot.slane %v1180_v6, 4  ;;  %v534_v19 = vrot.slane %v1180_v6, 7 }
  0x21   : > { %479 = vrot.lane.b32.xlu1 %v470_v50, %s1097_s18  ;;  %529 = vrot.lane.b32.xlu0 %v522_v51, %s1098_s19  ;;  %v466_v20 = vsel %vm459_vm5, %v462_v2, %v1238_v37  ;;  %v452_v21 = vsel %vm445_vm0, %v449_v8, %v451_v9  ;;  %v498_v24 = vrot.slane %v1180_v6, 6  ;;  %v489_v25 = vrot.slane %v1230_v32, 4 }
  0x22   : > { %v538_v10 = vsel %vm533_vm7, %v535_v3, %v537_v16  ;;  %v475_v22 = vor.u32 %v474_v7, %v473_v11  ;;  %v486_v23 = vsel %vm483_vm3, %v484_v18, %v485_v14  ;;  %v512_v26 = vrot.slane %v1249_v44, 6 }
  0x23   : > { %1038 = vmatpush1.bf16.msra.mxu1 %v1069_v62  ;;  %689 = vmatpush1.bf16.msra.mxu0 %v1069_v62  ;;  %v513_v27 = vrot.slane %v1241_v40, 7  ;;  %v539_v28 = vrot.slane %v1230_v32, 7  ;;  %v500_v14 = vsel %vm497_vm2, %v498_v24, %v499_v12  ;;  %v503_v29 = vrot.slane %v1230_v32, 6 }
  0x24   : > { %1030 = vmatprep.subr.bf16.mxu1 %v1091_v1  ;;  %690 = vmatprep.subr.bf16.mxu0 %v1091_v1  ;;  %v536_v1 = vsel %vm533_vm7, %v534_v19, %v535_v3  ;;  %v476_v8 = vsel %vm459_vm5, %v1244_v42, %v475_v22  ;;  %v490_v31 = vsel %vm483_vm3, %v487_v15, %v489_v25  ;;  %v523_v34 = vrot.slane %v471_v61, 6  ;;  %v1017_v22 = vld [vmem:[%s1471_s4] ss:$0 sm:$0xff] }
  0x25   : > { %425 = vrot.lane.b32.xlu1 %v408_v59, %s1096_s15  ;;  %429 = vrot.lane.b32.xlu0 %v424_v60, %s1096_s15  ;;  %v540_v30 = vsel %vm533_vm7, %v537_v16, %v539_v28  ;;  %v514_v33 = vor.u32 %v513_v27, %v512_v26  ;;  %v524_v35 = vrot.slane %v1255_v47, 7  ;;  %v504_v12 = vsel %vm497_vm2, %v501_v13, %v503_v29 }
  0x26   : > { %1014 = vmatprep.mubr.msk.bf16.mxu1 %vm541_vm8, %v538_v10  ;;  %1013 = vmatprep.mubr.msk.bf16.mxu0 %vm541_vm8, %v536_v1 }
  0x27   : > { %1039 = vmatpush1.bf16.msra.mxu1 %v1070_v17  ;;  %691 = vmatpush1.bf16.msra.mxu0 %v1070_v17  ;;  %v518_v36 = vsel %vm511_vm6, %v514_v33, %v1246_v43  ;;  %v525_v32 = vor.u32 %v524_v35, %v523_v34 }
  0x29   : > { %453 = vrot.lane.b32.xlu1 %v448_v63, %s1092_s24  ;;  %443 = vrot.lane.b32.xlu0 %v438_v0, %s1093_s25  ;;  %v526_v15 = vsel %vm511_vm6, %v1251_v45, %v525_v32 }
  0x2d   : > { %477 = vrot.lane.b32.xlu1 %v466_v20, %s1097_s18  ;;  %457 = vrot.lane.b32.xlu0 %v452_v21, %s1092_s24  ;;  %v1016_v20 = vld [vmem:[%s1470_s3] ss:$0 sm:$0xff] }
  0x31   : > { %491 = vrot.lane.b32.xlu1 %v486_v23, %s1095_s12  ;;  %481 = vrot.lane.b32.xlu0 %v476_v8, %s1097_s18  ;;  %s1447_s18 = scalar_lea.vmem %s1475_s8, %s998_s30 }
  0x35   : > { %505 = vrot.lane.b32.xlu1 %v500_v14, %s1094_s11  ;;  %495 = vrot.lane.b32.xlu0 %v490_v31, %s1095_s12 }
  0x39   : > { %527 = vrot.lane.b32.xlu1 %v518_v36, %s1098_s19  ;;  %509 = vrot.lane.b32.xlu0 %v504_v12, %s1094_s11  ;;  %s359_s11 = scalar_lea.vmem %s1472_s5, %s998_s30 }
  0x3d   : > { %531 = vrot.lane.b32.xlu0 %v526_v15, %s1098_s19 }
  0x87   : > { %v456_v37 = vpop.permute.xlu1 %455  ;;  %v442_v38 = vpop.permute.xlu0 %441 }
  0x8b   : > { %v508_v39 = vpop.permute.xlu1 %507  ;;  %v494_v40 = vpop.permute.xlu0 %493 }
  0x8f   : > { %v428_v41 = vpop.permute.xlu0 %427  ;;  %v440_v42 = vpop.permute.xlu1 %439 }
  0x90   : > { %v545_v13 = vsel %vm541_vm8, %v1174_v4, %v428_v41 }
  0x91   : > { %v552_v43 = vsel %vm548_vm9, %v545_v13, %v442_v38 }
  0x92   : > { %v559_v44 = vsel %vm555_vm10, %v552_v43, %v456_v37 }
  0x93   : > { %v480_v45 = vpop.permute.xlu1 %479  ;;  %v530_v46 = vpop.permute.xlu0 %529 }
  0x94   : > { %v566_v47 = vsel %vm562_vm11, %v559_v44, %v480_v45 }
  0x95   : > { %v573_v48 = vsel %vm569_vm12, %v566_v47, %v494_v40 }
  0x96   : > { %v580_v49 = vsel %vm576_vm13, %v573_v48, %v508_v39 }
  0x97   : > { %v426_v50 = vpop.permute.xlu1 %425  ;;  %v588_v51 = vsel %vm583_vm14, %v580_v49, %v530_v46  ;;  %v430_v4 = vpop.permute.xlu0 %429 }
  0x98   : > { %715 = vmatmul.mubr.bf16.vlgmr.msra.gmra.mrb[0].mxu1 %v588_v51  ;;  %v547_v54 = vsel %vm541_vm8, %v1176_v5, %v430_v4  ;;  %v543_v60 = vsel %vm541_vm8, %v1180_v6, %v426_v50 }
  0x99   : > { %1015 = vmatprep.mubr.msk.bf16.mxu1 %vm541_vm8, %v540_v30  ;;  %v550_v62 = vsel %vm548_vm9, %v543_v60, %v440_v42 }
  0x9b   : > { %v454_v52 = vpop.permute.xlu1 %453  ;;  %v444_v53 = vpop.permute.xlu0 %443 }
  0x9c   : > { %v554_v57 = vsel %vm548_vm9, %v547_v54, %v444_v53  ;;  %v557_v3 = vsel %vm555_vm10, %v550_v62, %v454_v52 }
  0x9f   : > { %v478_v55 = vpop.permute.xlu1 %477  ;;  %v458_v56 = vpop.permute.xlu0 %457 }
  0xa0   : > { %v561_v61 = vsel %vm555_vm10, %v554_v57, %v458_v56  ;;  %v564_v5 = vsel %vm562_vm11, %v557_v3, %v478_v55 }
  0xa3   : > { %v492_v58 = vpop.permute.xlu1 %491  ;;  %v482_v59 = vpop.permute.xlu0 %481 }
  0xa4   : > { %v568_v63 = vsel %vm562_vm11, %v561_v61, %v482_v59  ;;  %v571_v9 = vsel %vm569_vm12, %v564_v5, %v492_v58 }
  0xa7   : > { %v506_v0 = vpop.permute.xlu1 %505  ;;  %v496_v2 = vpop.permute.xlu0 %495 }
  0xa8   : > { %v575_v11 = vsel %vm569_vm12, %v568_v63, %v496_v2  ;;  %v578_v7 = vsel %vm576_vm13, %v571_v9, %v506_v0 }
  0xab   : > { %v528_v16 = vpop.permute.xlu1 %527  ;;  %v510_v6 = vpop.permute.xlu0 %509 }
  0xac   : > { %v585_v17 = vsel %vm583_vm14, %v578_v7, %v528_v16  ;;  %v582_v10 = vsel %vm576_vm13, %v575_v11, %v510_v6  ;;  %v863_v7 = vld [vmem:[%s359_s11 + $0x8] sm:$0xff]  ;;  %v864_v16 = vld [vmem:[%s359_s11 + $0x10] sm:$0xff]  ;;  %v862_v6 = vld [vmem:[%s359_s11] sm:$0xff] }
  0xad   : > { %707 = vmatmul.mubr.bf16.vlgmr.msra.gmra.mrb[0].mxu0 %v585_v17  ;;  %v865_v17 = vld [vmem:[%s359_s11 + $0x18] sm:$0xff] }
  0xaf   : > { %v532_v18 = vpop.permute.xlu0 %531 }
  0xb0   : > { %v591_v19 = vsel %vm583_vm14, %v582_v10, %v532_v18  ;;  %v866_v10 = vld [vmem:[%s359_s11 + $0x20] sm:$0xff] }
  0xb1   : > { %723 = vmatmul.mubr.bf16.gmra.mrb[4].mxu1 %v591_v19 }
 0x16b   : > { %v716_v21 = vpop.f32.mrb[0].mxu1 }
 0x16c   : > { %v740_v1 = vmul.f32 %v1016_v20, %v716_v21  ;;  %v718_v23 = vpop.f32.mrb[1].mxu1 }
 0x16d   : > { %v719_v24 = vpop.f32.mrb[2].mxu1 }
 0x16e   : > { %v721_v8 = vpop.f32.mrb[3].mxu1  ;;  %v753_v25 = vadd.f32 %v1017_v22, %v740_v1  ;;  %v741_v28 = vmul.f32 %v1016_v20, %v719_v24  ;;  %v867_v1 = vld [vmem:[%s359_s11 + $0x28] sm:$0xff] }
 0x170   : > { %v763_v26 = vsel %vm541_vm8, %v753_v25, 0.0  ;;  %v754_v37 = vadd.f32 %v1017_v22, %v741_v28 }
 0x171   : > { %764 = vadd.xlane.f32.xlu0 %v763_v26 }
 0x172   : > { %v766_v13 = vsel %vm541_vm8, %v754_v37, 0.0 }
 0x180   : > { %v708_v27 = vpop.f32.mrb[0].mxu0 }
 0x181   : > { %v738_v14 = vmul.f32 %v1016_v20, %v708_v27  ;;  %v710_v29 = vpop.f32.mrb[1].mxu0 }
 0x182   : > { %v711_v30 = vpop.f32.mrb[2].mxu0 }
 0x183   : > { %v739_v31 = vmul.f32 %v1016_v20, %v711_v30  ;;  %v713_v33 = vpop.f32.mrb[3].mxu0  ;;  %v751_v34 = vadd.f32 %v1017_v22, %v738_v14 }
 0x184   : > { %v724_v35 = vpop.f32.mrb[4].mxu1 }
 0x185   : > { %v742_v36 = vmul.f32 %v1016_v20, %v724_v35  ;;  %v757_v12 = vsel %vm541_vm8, %v751_v34, 0.0  ;;  %v726_v32 = vpop.f32.mrb[5].mxu1  ;;  %v752_v15 = vadd.f32 %v1017_v22, %v739_v31 }
 0x186   : > { %758 = vadd.xlane.f32.xlu1 %v757_v12  ;;  %v727_v38 = vpop.f32.mrb[6].mxu1 }
 0x187   : > { %v743_v39 = vmul.f32 %v1016_v20, %v727_v38  ;;  %v760_v40 = vsel %vm541_vm8, %v752_v15, 0.0  ;;  %v755_v41 = vadd.f32 %v1017_v22, %v742_v36  ;;  %v729_v42 = vpop.f32.mrb[7].mxu1 }
 0x188   : > { %761 = vadd.xlane.f32.xlu0 %v760_v40 }
 0x189   : > { %v769_v43 = vsel %vm541_vm8, %v755_v41, 0.0  ;;  %v756_v44 = vadd.f32 %v1017_v22, %v743_v39  ;;  %v1019_v39 = vld [vmem:[%s1474_s7] ss:$0 sm:$0xff] }
 0x18a   : > { %767 = vadd.xlane.f32.xlu1 %v766_v13 }
 0x18b   : > { %v772_v45 = vsel %vm541_vm8, %v756_v44, 0.0 }
 0x18c   : > { %770 = vadd.xlane.f32.xlu0 %v769_v43 }
 0x18e   : > { %773 = vadd.xlane.f32.xlu1 %v772_v45 }
 0x1fe   : > { %v765_v46 = vpop.xlane.xlu0 %764 }
 0x1ff   : > { %v778_v47 = vmul.f32 0.0625, %v765_v46 }
 0x201   : > { %v1393_v50 = vsub.f32 %v753_v25, %v778_v47 }
 0x203   : > { %v790_v58 = vmul.f32 %v1393_v50, %v1393_v50 }
 0x205   : > { %v800_v3 = vsel %vm541_vm8, %v790_v58, 0.0 }
 0x213   : > { %v759_v48 = vpop.xlane.xlu1 %758 }
 0x214   : > { %v776_v49 = vmul.f32 0.0625, %v759_v48 }
 0x215   : > { %v762_v51 = vpop.xlane.xlu0 %761 }
 0x216   : > { %v1395_v4 = vsub.f32 %v751_v34, %v776_v49  ;;  %v777_v52 = vmul.f32 0.0625, %v762_v51 }
 0x217   : > { %v768_v53 = vpop.xlane.xlu1 %767 }
 0x218   : > { %v1397_v54 = vsub.f32 %v752_v15, %v777_v52  ;;  %v779_v55 = vmul.f32 0.0625, %v768_v53  ;;  %v788_v56 = vmul.f32 %v1395_v4, %v1395_v4  ;;  %v1018_v15 = vld [vmem:[%s1473_s6] ss:$0 sm:$0xff] }
 0x219   : > { %v771_v57 = vpop.xlane.xlu0 %770 }
 0x21a   : > { %v1403_v59 = vsub.f32 %v754_v37, %v779_v55  ;;  %v780_v60 = vmul.f32 0.0625, %v771_v57  ;;  %v794_v61 = vsel %vm541_vm8, %v788_v56, 0.0  ;;  %v789_v62 = vmul.f32 %v1397_v54, %v1397_v54 }
 0x21b   : > { %795 = vadd.xlane.f32.xlu0 %v794_v61  ;;  %v774_v18 = vpop.xlane.xlu1 %773 }
 0x21c   : > { %v1408_v63 = vsub.f32 %v755_v41, %v780_v60  ;;  %v797_v0 = vsel %vm541_vm8, %v789_v62, 0.0  ;;  %v791_v2 = vmul.f32 %v1403_v59, %v1403_v59  ;;  %v781_v19 = vmul.f32 0.0625, %v774_v18 }
 0x21d   : > { %798 = vadd.xlane.f32.xlu1 %v797_v0 }
 0x21e   : > { %v792_v5 = vmul.f32 %v1408_v63, %v1408_v63  ;;  %v803_v9 = vsel %vm541_vm8, %v791_v2, 0.0  ;;  %v1428_v20 = vsub.f32 %v756_v44, %v781_v19 }
 0x21f   : > { %801 = vadd.xlane.f32.xlu0 %v800_v3 }
 0x220   : > { %v806_v11 = vsel %vm541_vm8, %v792_v5, 0.0  ;;  %v793_v21 = vmul.f32 %v1428_v20, %v1428_v20 }
 0x221   : > { %804 = vadd.xlane.f32.xlu1 %v803_v9 }
 0x222   : > { %v809_v22 = vsel %vm541_vm8, %v793_v21, 0.0 }
 0x223   : > { %807 = vadd.xlane.f32.xlu0 %v806_v11 }
 0x232   : > { %875 = vperm.xlu1 %1057, %v863_v7  }
 0x236   : > { %880 = vperm.xlu1 %1057, %v864_v16  }
 0x239   : > { %870 = vperm.xlu0 %1056, %v862_v6  }
 0x23a   : > { %885 = vperm.xlu1 %1057, %v865_v17  }
 0x23e   : > { %890 = vperm.xlu1 %1057, %v866_v10  }
 0x262   : > { %810 = vadd.xlane.f32.xlu1 %v809_v22 }
 0x273   : > { %895 = vperm.xlu1 %1057, %v867_v1  }
 0x2a8   : > { %v796_v23 = vpop.xlane.xlu0 %795 }
 0x2a9   : > { %v812_v24 = vmul.f32 0.0625, %v796_v23 }
 0x2aa   : > { %v799_v8 = vpop.xlane.xlu1 %798 }
 0x2ab   : > { %v818_v25 = vadd.f32 1e-06, %v812_v24  ;;  %v813_v26 = vmul.f32 0.0625, %v799_v8 }
 0x2ac   : > { %v802_v27 = vpop.xlane.xlu0 %801 }
 0x2ad   : > { %1071 = vrsqrt.f32 %v818_v25  ;;  %v819_v28 = vadd.f32 1e-06, %v813_v26  ;;  %v814_v14 = vmul.f32 0.0625, %v802_v27 }
 0x2ae   : > { %v805_v29 = vpop.xlane.xlu1 %804 }
 0x2af   : > { %1073 = vrsqrt.f32 %v819_v28  ;;  %v820_v30 = vadd.f32 1e-06, %v814_v14  ;;  %v815_v31 = vmul.f32 0.0625, %v805_v29 }
 0x2b0   : > { %v808_v33 = vpop.xlane.xlu0 %807 }
 0x2b1   : > { %1075 = vrsqrt.f32 %v820_v30  ;;  %v821_v34 = vadd.f32 1e-06, %v815_v31  ;;  %v816_v35 = vmul.f32 0.0625, %v808_v33 }
 0x2b2   : > { %v876_v12 = vpop.permute.xlu1 %875 }
 0x2b3   : > { %1077 = vrsqrt.f32 %v821_v34  ;;  %v822_v36 = vadd.f32 1e-06, %v816_v35 }
 0x2b5   : > { %1079 = vrsqrt.f32 %v822_v36 }
 0x2b6   : > { %v881_v40 = vpop.permute.xlu1 %880 }
 0x2b7   : > { %v1072_v32 = vpop.eup %1071 }
 0x2b8   : > { %v830_v37 = vmul.f32 %v1072_v32, %v1395_v4  ;;  %v871_v43 = vpop.permute.xlu0 %870 }
 0x2b9   : > { %v1074_v38 = vpop.eup %1073 }
 0x2ba   : > { %v831_v41 = vmul.f32 %v1074_v38, %v1397_v54  ;;  %v843_v42 = vmul.f32 %v1018_v15, %v830_v37  ;;  %v886_v53 = vpop.permute.xlu1 %885 }
 0x2bb   : > { %v1076_v13 = vpop.eup %1075 }
 0x2bc   : > { %v844_v44 = vmul.f32 %v1018_v15, %v831_v41  ;;  %v832_v45 = vmul.f32 %v1076_v13, %v1393_v50  ;;  %v856_v46 = vadd.f32 %v1019_v39, %v843_v42 }
 0x2bd   : > { %v1078_v47 = vpop.eup %1077 }
 0x2be   : > { %v857_v48 = vadd.f32 %v1019_v39, %v844_v44  ;;  %v845_v49 = vmul.f32 %v1018_v15, %v832_v45  ;;  %v833_v51 = vmul.f32 %v1078_v47, %v1403_v59  ;;  %v898_v4 = vmul.f32 %v871_v43, %v856_v46  ;;  %v891_v62 = vpop.permute.xlu1 %890 }
 0x2bf   : > { %v1080_v52 = vpop.eup %1079 }
 0x2c0   : > { %v899_v50 = vmul.f32 %v876_v12, %v857_v48  ;;  %v858_v54 = vadd.f32 %v1019_v39, %v845_v49  ;;  %v846_v55 = vmul.f32 %v1018_v15, %v833_v51  ;;  %904 = vst.msk [vmem:[%s1447_s18] sm:$0xff] %vm541_vm8, %v898_v4  ;;  %v834_v56 = vmul.f32 %v1080_v52, %v1408_v63 }
 0x2c2   : > { %905 = vst.msk [vmem:[%s1447_s18 + $0x8] sm:$0xff] %vm541_vm8, %v899_v50  ;;  %v900_v57 = vmul.f32 %v881_v40, %v858_v54  ;;  %v859_v58 = vadd.f32 %v1019_v39, %v846_v55  ;;  %v847_v60 = vmul.f32 %v1018_v15, %v834_v56 }
 0x2c4   : > { %906 = vst.msk [vmem:[%s1447_s18 + $0x10] sm:$0xff] %vm541_vm8, %v900_v57  ;;  %v901_v59 = vmul.f32 %v886_v53, %v859_v58  ;;  %v860_v61 = vadd.f32 %v1019_v39, %v847_v60 }
 0x2c6   : > { %907 = vst.msk [vmem:[%s1447_s18 + $0x18] sm:$0xff] %vm541_vm8, %v901_v59  ;;  %v902_v0 = vmul.f32 %v891_v62, %v860_v61 }
 0x2c8   : > { %908 = vst.msk [vmem:[%s1447_s18 + $0x20] sm:$0xff] %vm541_vm8, %v902_v0 }
 0x2ef   : > { %v811_v2 = vpop.xlane.xlu1 %810 }
 0x2f0   : > { %v817_v3 = vmul.f32 0.0625, %v811_v2 }
 0x2f2   : > { %v823_v5 = vadd.f32 1e-06, %v817_v3 }
 0x2f3   : > { %v896_v16 = vpop.permute.xlu1 %895 }
 0x2f4   : > { %1081 = vrsqrt.f32 %v823_v5 }
 0x2fe   : > { %v1082_v63 = vpop.eup %1081 }
 0x2ff   : > { %v835_v9 = vmul.f32 %v1082_v63, %v1428_v20 }
 0x301   : > { %v848_v11 = vmul.f32 %v1018_v15, %v835_v9 }
 0x303   : > { %v861_v7 = vadd.f32 %v1019_v39, %v848_v11 }
 0x305   : > { %v903_v6 = vmul.f32 %v896_v16, %v861_v7 }
 0x307   : > { %909 = vst.msk [vmem:[%s1447_s18 + $0x28] sm:$0xff] %vm541_vm8, %v903_v6 }
 0x308 PF: > { %s18_s27 = sadd.s32 1, %s1089_s27  }
 0x309   : > { %p15_p6 = scmp.ge.s32.totalorder %s18_s27, 4  }
 0x30b   :  { %17 = sbr.rel (!%p15_p6) target bundleno = 1 (0x1), region = 88 }

</bundles_post_ra>
